<compile_context>
chip_gen: v7x
topology: tpu7x:2x2x1
jax: 0.10.0
libtpu: 0.0.40
codegen_flags: <defaults>
</compile_context>

<pallas_src>
import functools
import math

import jax
import jax.numpy as jnp
from jax.experimental import pallas as pl
from jax.experimental.pallas import tpu as pltpu


def _nearest_rows_kernel(x_ref, o_ref, *, scale, group, width):
    """x_ref: (Rb, group*width);  o_ref: (Rb, group*scale*scale*width).

    Row r of x_ref holds `group` consecutive input scanlines of one (H, W)
    plane; row r of o_ref holds the corresponding `group*scale` upsampled
    scanlines, flattened contiguously (lane-dense store).
    """
    x = x_ref[...]
    pieces = []
    for i in range(group):
        xi = x[:, i * width:(i + 1) * width]      # one input scanline strip
        wi = jnp.repeat(xi, scale, axis=1)        # nearest along W
        pieces.extend([wi] * scale)               # nearest along H (flattened)
    y = pieces[0] if len(pieces) == 1 else jnp.concatenate(pieces, axis=1)
    o_ref[...] = y


def _divisors(n):
    out = set()
    for d in range(1, int(math.isqrt(n)) + 1):
        if n % d == 0:
            out.add(d)
            out.add(n // d)
    return sorted(out)


def _choose_group(H, W, scale, max_group=32):
    # Smallest divisor of H whose flattened output row is lane-dense (>=128).
    for d in _divisors(H):
        if d <= max_group and d * scale * scale * W >= 128:
            return d
    capped = [d for d in _divisors(H) if d <= max_group]
    return capped[-1] if capped else 1


def _choose_row_block(nrows, row_out_bytes, budget_bytes=2 << 20):
    # Largest divisor of nrows that keeps one output block under budget and
    # respects the (8, 128) sublane rule (multiple of 8, or the full dim).
    cands = [d for d in _divisors(nrows) if d == nrows or d % 8 == 0]
    fitting = [d for d in cands if d * row_out_bytes <= budget_bytes]
    return max(fitting) if fitting else min(cands)


def interpolate_nearest(x, size=None, scale_factor=None):
    """Pallas equivalent of F.interpolate(x, size, scale_factor, mode='nearest')
    for NCHW inputs and integer, isotropic upsampling factors."""
    N, C, H, W = x.shape
    if size is not None:
        oh, ow = (size, size) if isinstance(size, int) else tuple(size)
        assert oh % H == 0 and ow % W == 0 and oh // H == ow // W, \
            "only integer, isotropic nearest upsampling supported"
        scale = oh // H
    else:
        scale = int(scale_factor)
        assert float(scale_factor) == scale, "integer scale_factor required"
    assert scale >= 1
    OH, OW = H * scale, W * scale
    itemsize = jnp.dtype(x.dtype).itemsize

    g = _choose_group(H, W, scale)
    nrows = N * C * (H // g)
    row_in_w = g * W
    row_out_w = g * scale * scale * W

    rb = _choose_row_block(nrows, row_out_w * itemsize)
    grid = (nrows // rb,)

    x2 = x.reshape(nrows, row_in_w)               # free contiguous reshape
    kernel = functools.partial(_nearest_rows_kernel,
                               scale=scale, group=g, width=W)

    out2 = pl.pallas_call(
        kernel,
        out_shape=jax.ShapeDtypeStruct((nrows, row_out_w), x.dtype),
        grid=grid,
        in_specs=[pl.BlockSpec((rb, row_in_w), lambda i: (i, 0))],
        out_specs=pl.BlockSpec((rb, row_out_w), lambda i: (i, 0)),
        compiler_params=pltpu.CompilerParams(
            dimension_semantics=("parallel",)),
        cost_estimate=pl.CostEstimate(
            flops=0, transcendentals=0,
            bytes_accessed=(1 + scale * scale) * N * C * H * W * itemsize),
    )(x2)

    return out2.reshape(N, C, OH, OW)             # free contiguous reshape


class Interpolate:
    """JAX/Pallas port of the PyTorch Interpolate module (mode='nearest')."""

    def __init__(self, size=None, scale_factor=None, mode='nearest',
                 align_corners=None):
        self.size = size
        self.scale_factor = scale_factor
        self.mode = mode
        self.align_corners = align_corners
        # TODO(synk): only 'nearest' with integer scale is implemented;
        # bilinear / align_corners variants are not ported.
        assert mode == 'nearest', "only mode='nearest' is implemented"

    def __call__(self, x):
        return interpolate_nearest(x, size=self.size,
                                   scale_factor=self.scale_factor)


def _reference_nearest(x, scale):
    # Pure-JAX reference: identical semantics to PyTorch nearest upsampling
    # with an integer scale factor.
    y = jnp.repeat(x, scale, axis=2)
    y = jnp.repeat(y, scale, axis=3)
    return y


if __name__ == "__main__":
    key = jax.random.PRNGKey(0)
    x = jax.random.normal(key, (2, 4, 16, 16), dtype=jnp.float32)

    module = Interpolate(scale_factor=2, mode='nearest')
    out = module(x)
    out = jax.block_until_ready(out)

    ref = _reference_nearest(x, 2)
    assert out.shape == (2, 4, 32, 32), out.shape
    assert out.dtype == x.dtype
    assert bool(jnp.array_equal(out, ref)), "mismatch vs reference"
    print("KERNEL_OK")
</pallas_src>

<mosaic_0001>
module attributes {stable_mosaic.version = 11 : i64} {
  func.func @_nearest_rows_kernel(%arg0: i32, %arg1: memref<64x32xf32, #tpu.memory_space<vmem>>, %arg2: memref<64x128xf32, #tpu.memory_space<vmem>>) attributes {dimension_semantics = [#tpu.dimension_semantics<parallel>], iteration_bounds = array<i64: 1>, scalar_prefetch = 0 : i64, scratch_operands = 0 : i64, tpu.core_type = #tpu.core_type<tc>, window_params = [{transform_indices = @transform_0, window_bounds = array<i64: 64, 32>}, {transform_indices = @transform_1, window_bounds = array<i64: 64, 128>}]} {
    %c0 = arith.constant 0 : index
    %c0_0 = arith.constant 0 : index
    %0 = vector.load %arg1[%c0, %c0_0] : memref<64x32xf32, #tpu.memory_space<vmem>>, vector<64x32xf32>
    %1 = vector.extract_strided_slice %0 {offsets = [0, 0], sizes = [64, 16], strides = [1, 1]} : vector<64x32xf32> to vector<64x16xf32>
    %2 = vector.shape_cast %1 : vector<64x16xf32> to vector<64x16x1xf32>
    %3 = vector.broadcast %2 : vector<64x16x1xf32> to vector<64x16x2xf32>
    %4 = vector.shape_cast %3 : vector<64x16x2xf32> to vector<64x32xf32>
    %5 = vector.extract_strided_slice %0 {offsets = [0, 16], sizes = [64, 16], strides = [1, 1]} : vector<64x32xf32> to vector<64x16xf32>
    %6 = vector.shape_cast %5 : vector<64x16xf32> to vector<64x16x1xf32>
    %7 = vector.broadcast %6 : vector<64x16x1xf32> to vector<64x16x2xf32>
    %8 = vector.shape_cast %7 : vector<64x16x2xf32> to vector<64x32xf32>
    %9 = tpu.concatenate %4, %4, %8, %8 in 1 : vector<64x32xf32>, vector<64x32xf32>, vector<64x32xf32>, vector<64x32xf32> -> vector<64x128xf32>
    %c0_1 = arith.constant 0 : index
    %c0_2 = arith.constant 0 : index
    %10 = vector.load %arg2[%c0_1, %c0_2] : memref<64x128xf32, #tpu.memory_space<vmem>>, vector<64x128xf32>
    tpu.vector_store %arg2[%c0_1, %c0_2], %9 {strides = array<i32>} : memref<64x128xf32, #tpu.memory_space<vmem>>, vector<64x128xf32>,
    return
  }
  func.func @transform_0(%arg0: i32) -> (i32, i32) {
    %c0_i32 = arith.constant 0 : i32
    %c0_i32_0 = arith.constant 0 : i32
    return %arg0, %c0_i32 : i32, i32
  }
  func.func @transform_1(%arg0: i32) -> (i32, i32) {
    %c0_i32 = arith.constant 0 : i32
    %c0_i32_0 = arith.constant 0 : i32
    return %arg0, %c0_i32 : i32, i32
  }
}

</mosaic_0001>

<bundles_post_ra>
// kernel: tpu_custom_call.1
= control target key start
LH: loop header
LB: loop body
LE: loop exit
PB: predicated region body
PF: predicated region fallthrough
CT: control target
= control target key end

     0   :  { %v17_v0 = vlaneseq  ;;  %s11962_s0 = inlined_call_operand.vmem [shape: f32[64,32], index: 0, kind: input, shape index: {}]   ;;  %s11963_s1 = inlined_call_operand.hbm [shape: f32[64,128], index: 1, kind: output, shape index: {}]  }
   0x1   :  { %6 = vsyncpa [#allocation3], 0  ;;  %v9_v2 = vld [vmem:[%s11962_s0] sm:$0xff]  ;;  %v10_v19 = vld [vmem:[%s11962_s0 + $0x8] sm:$0xff]  ;;  %v6985_v47 = vmov 1983009808  }
   0x2   :  { %v7017_v1 = vshrl.u32 %v17_v0, 7  ;;  %v11_v28 = vld [vmem:[%s11962_s0 + $0x10] sm:$0xff]  ;;  %v12_v37 = vld [vmem:[%s11962_s0 + $0x18] sm:$0xff]  ;;  %v724_v48 = vunpack.c.l.s4 %v6985_v47  ;;  %v13_v52 = vld [vmem:[%s11962_s0 + $0x20] sm:$0xff]  ;;  %s6988_s22 = smov 4   ;;  %s6989_s23 = smov 6  }
   0x3   :  { %s6990_s24 = smov 8   ;;  %s6991_s25 = smov 10   ;;  %vm3377_vm0 = vcmask 15360   ;;  %vm3386_vm1 = vcmask 31744   ;;  %vm3395_vm2 = vcmask 48128   ;;  %vm3404_vm3 = vcmask 64512  }
   0x4   :  { %v7023_v3 = vsub.s32 1, %v7017_v1  ;;  %v7026_v4 = vsub.s32 0, %v7017_v1  ;;  %v7037_v7 = vsub.s32 2, %v7017_v1  ;;  %v7045_v9 = vsub.s32 3, %v7017_v1  ;;  %s6992_s26 = smov 12   ;;  %s6993_s27 = smov 14  }
   0x5   :  { %v7053_v11 = vsub.s32 4, %v7017_v1  ;;  %v7061_v13 = vsub.s32 5, %v7017_v1  ;;  %v7069_v15 = vsub.s32 6, %v7017_v1  ;;  %v7077_v17 = vsub.s32 7, %v7017_v1  ;;  %s6994_s28 = smov 16   ;;  %s6995_s29 = smov 18  }
   0x6   :  { %v7029_v5 = vrot.slane %v9_v2, %v7023_v3  ;;  %v7032_v6 = vrot.slane %v9_v2, %v7026_v4  ;;  %v7042_v8 = vrot.slane %v9_v2, %v7037_v7  ;;  %v7050_v10 = vrot.slane %v9_v2, %v7045_v9  ;;  %s6996_s30 = smov 20   ;;  %s6997_s2 = smov 22  }
   0x7   :  { %v7058_v12 = vrot.slane %v9_v2, %v7053_v11  ;;  %v7066_v14 = vrot.slane %v9_v2, %v7061_v13  ;;  %v7074_v16 = vrot.slane %v9_v2, %v7069_v15  ;;  %v7082_v18 = vrot.slane %v9_v2, %v7077_v17  ;;  %s6998_s3 = smov 24   ;;  %s6999_s4 = smov 26  }
   0x8   :  { %12293 = vst [vmem:[#allocation5_spill] sm:$0xff] %v7029_v5  ;;  %12294 = vst [vmem:[#allocation6_spill] sm:$0xff] %v7032_v6  ;;  %33 = vbcast.lane.b32.xlu1 %v7029_v5, 256  ;;  %22 = vbcast.lane.b32.xlu0 %v7032_v6, 256  ;;  %v7090_v20 = vrot.slane %v10_v19, %v7026_v4  ;;  %v7095_v21 = vrot.slane %v10_v19, %v7023_v3  ;;  %v725_v53 = vunpack.c.0.s8 %v724_v48  ;;  %s7000_s5 = smov 28   ;;  %s7001_s6 = smov 30  }
   0x9   :  { %12295 = vst [vmem:[#allocation7_spill] sm:$0xff] %v7042_v8  ;;  %12296 = vst [vmem:[#allocation8_spill] sm:$0xff] %v7050_v10  ;;  %v7100_v22 = vrot.slane %v10_v19, %v7037_v7  ;;  %v7105_v23 = vrot.slane %v10_v19, %v7045_v9  ;;  %v7110_v24 = vrot.slane %v10_v19, %v7053_v11  ;;  %vm3413_vm4 = vcmask 80896   ;;  %s7002_s7 = smov 32   ;;  %s7003_s8 = smov 64  }
   0xa   :  { %12297 = vst [vmem:[#allocation9_spill] sm:$0xff] %v7058_v12  ;;  %12298 = vst [vmem:[#allocation10_spill] sm:$0xff] %v7066_v14  ;;  %v7115_v25 = vrot.slane %v10_v19, %v7061_v13  ;;  %v7120_v26 = vrot.slane %v10_v19, %v7069_v15  ;;  %v7125_v27 = vrot.slane %v10_v19, %v7077_v17  ;;  %vm3422_vm5 = vcmask 97280   ;;  %s7004_s9 = smov 96   ;;  %s7005_s10 = smov [#allocation2]  }
   0xb   :  { %12299 = vst [vmem:[#allocation11_spill] sm:$0xff] %v7074_v16  ;;  %12300 = vst [vmem:[#allocation12_spill] sm:$0xff] %v7082_v18  ;;  %v7133_v29 = vrot.slane %v11_v28, %v7026_v4  ;;  %v7138_v30 = vrot.slane %v11_v28, %v7023_v3  ;;  %v7143_v31 = vrot.slane %v11_v28, %v7037_v7  ;;  %vm3431_vm6 = vcmask 113664   ;;  %s6928_s11 = sshll.u32 %s7005_s10, 4  ;;  %s6929_s11 = int_to_ptr.vmem [resolvable:$true] %s6928_s11 }
   0xc   :  { %37 = vbcast.lane.b32.xlu1 %v7029_v5, 264  ;;  %26 = vbcast.lane.b32.xlu0 %v7032_v6, 264  ;;  %12301 = vst [vmem:[#allocation13_spill] sm:$0xff] %v7090_v20  ;;  %12302 = vst [vmem:[#allocation14_spill] sm:$0xff] %v7095_v21  ;;  %v7148_v32 = vrot.slane %v11_v28, %v7045_v9  ;;  %v7153_v33 = vrot.slane %v11_v28, %v7053_v11  ;;  %vm3440_vm7 = vcmask 130048   ;;  %vm3449_vm8 = vcmask 146432   ;;  %p6966_p1 = scmp.lt.s32.totalorder %s6929_s11, %s6929_s11 }
   0xd   :  { %12303 = vst [vmem:[#allocation15_spill] sm:$0xff] %v7100_v22  ;;  %12304 = vst [vmem:[#allocation16_spill] sm:$0xff] %v7105_v23  ;;  %v7158_v34 = vrot.slane %v11_v28, %v7061_v13  ;;  %v7163_v35 = vrot.slane %v11_v28, %v7069_v15  ;;  %v7168_v36 = vrot.slane %v11_v28, %v7077_v17  ;;  %vm3458_vm9 = vcmask 162816   ;;  %s6961_s12 = scalar_lea.vmem %s6929_s11, 1024 }
   0xe   :  { %12305 = vst [vmem:[#allocation17_spill] sm:$0xff] %v7110_v24  ;;  %12306 = vst [vmem:[#allocation18_spill] sm:$0xff] %v7115_v25  ;;  %v7176_v38 = vrot.slane %v12_v37, %v7026_v4  ;;  %v7181_v39 = vrot.slane %v12_v37, %v7023_v3  ;;  %v7186_v40 = vrot.slane %v12_v37, %v7037_v7  ;;  %vm3467_vm10 = vcmask 179200   ;;  %p6962_p0 = scmp.ne.s32.totalorder %s6929_s11, %s6961_s12  ;;  %p6967_p2 = scmp.lt.s32.totalorder %s6961_s12, %s6961_s12 }
   0xf   :  { %12307 = vst [vmem:[#allocation19_spill] sm:$0xff] %v7120_v26  ;;  %12308 = vst [vmem:[#allocation20_spill] sm:$0xff] %v7125_v27  ;;  %v7191_v41 = vrot.slane %v12_v37, %v7045_v9  ;;  %v7196_v42 = vrot.slane %v12_v37, %v7053_v11  ;;  %v7201_v43 = vrot.slane %v12_v37, %v7061_v13  ;;  %vm3476_vm11 = vcmask 195584  }
  0x10   :  { %48 = vbcast.lane.b32.xlu1 %v7042_v8, 264  ;;  %44 = vbcast.lane.b32.xlu0 %v7042_v8, 256  ;;  %12309 = vst [vmem:[#allocation21_spill] sm:$0xff] %v7133_v29  ;;  %12310 = vst [vmem:[#allocation22_spill] sm:$0xff] %v7138_v30  ;;  %v7210_v46 = vrot.slane %v12_v37, %v7069_v15  ;;  %v7219_v51 = vrot.slane %v12_v37, %v7077_v17  ;;  %vm3485_vm12 = vcmask 211968   ;;  %vm3494_vm13 = vcmask 228352   ;;  %p6968_p3 = por %p6967_p2, %p6966_p1 }
  0x11   :  { %12311 = vst [vmem:[#allocation23_spill] sm:$0xff] %v7143_v31  ;;  %12312 = vst [vmem:[#allocation24_spill] sm:$0xff] %v7148_v32  ;;  %v7231_v56 = vrot.slane %v13_v52, %v7026_v4  ;;  %v7234_v57 = vsub.s32 %v725_v53, %v7017_v1  ;;  %v7247_v62 = vrot.slane %v13_v52, %v7023_v3  ;;  %vm3503_vm14 = vcmask 244736  }
  0x12   :  { %12313 = vst [vmem:[#allocation25_spill] sm:$0xff] %v7153_v33  ;;  %12314 = vst [vmem:[#allocation26_spill] sm:$0xff] %v7158_v34  ;;  %v7257_v37 = vrot.slane %v13_v52, %v7037_v7  ;;  %v7266_v53 = vrot.slane %v13_v52, %v7045_v9  ;;  %vm6888_vm15 = vcmask 261120   ;;  %p6969_p4 = pnand %p6968_p3, %p6962_p0 }
  0x13   :  { %12315 = vst [vmem:[#allocation27_spill] sm:$0xff] %v7163_v35  ;;  %12316 = vst [vmem:[#allocation28_spill] sm:$0xff] %v7168_v36 }
  0x14   :  { %59 = vbcast.lane.b32.xlu1 %v7050_v10, 264  ;;  %55 = vbcast.lane.b32.xlu0 %v7050_v10, 256  ;;  %12317 = vst [vmem:[#allocation29_spill] sm:$0xff] %v7176_v38  ;;  %12318 = vst [vmem:[#allocation30_spill] sm:$0xff] %v7181_v39 }
  0x15   :  { %12319 = vst [vmem:[#allocation31_spill] sm:$0xff] %v7186_v40  ;;  %12320 = vst [vmem:[#allocation32_spill] sm:$0xff] %v7191_v41 }
  0x16   :  { %12321 = vst [vmem:[#allocation33_spill] sm:$0xff] %v7196_v42  ;;  %12322 = vst [vmem:[#allocation34_spill] sm:$0xff] %v7201_v43 }
  0x17   :  { %12323 = vst [vmem:[#allocation35_spill] sm:$0xff] %v7210_v46  ;;  %12326 = vst [vmem:[#allocation38_spill] sm:$0xff] %v7219_v51 }
  0x18   :  { %70 = vbcast.lane.b32.xlu1 %v7058_v12, 264  ;;  %66 = vbcast.lane.b32.xlu0 %v7058_v12, 256  ;;  %12328 = vst [vmem:[#allocation40_spill] sm:$0xff] %v7231_v56  ;;  %12330 = vst [vmem:[#allocation42_spill] sm:$0xff] %v7247_v62 }
  0x19   :  { %12332 = vst [vmem:[#allocation44_spill] sm:$0xff] %v7257_v37  ;;  %12334 = vst [vmem:[#allocation46_spill] sm:$0xff] %v7266_v53 }
  0x1c   :  { %81 = vbcast.lane.b32.xlu1 %v7066_v14, 264  ;;  %77 = vbcast.lane.b32.xlu0 %v7066_v14, 256 }
  0x20   :  { %92 = vbcast.lane.b32.xlu1 %v7074_v16, 264  ;;  %88 = vbcast.lane.b32.xlu0 %v7074_v16, 256 }
  0x24   :  { %103 = vbcast.lane.b32.xlu1 %v7082_v18, 264  ;;  %99 = vbcast.lane.b32.xlu0 %v7082_v18, 256 }
  0x28   :  { %114 = vbcast.lane.b32.xlu1 %v7090_v20, 264  ;;  %110 = vbcast.lane.b32.xlu0 %v7090_v20, 256 }
  0x2c   :  { %125 = vbcast.lane.b32.xlu1 %v7095_v21, 264  ;;  %121 = vbcast.lane.b32.xlu0 %v7095_v21, 256 }
  0x30   :  { %136 = vbcast.lane.b32.xlu1 %v7100_v22, 264  ;;  %132 = vbcast.lane.b32.xlu0 %v7100_v22, 256 }
  0x34   :  { %147 = vbcast.lane.b32.xlu1 %v7105_v23, 264  ;;  %143 = vbcast.lane.b32.xlu0 %v7105_v23, 256 }
  0x38   :  { %158 = vbcast.lane.b32.xlu1 %v7110_v24, 264  ;;  %154 = vbcast.lane.b32.xlu0 %v7110_v24, 256 }
  0x3c   :  { %169 = vbcast.lane.b32.xlu1 %v7115_v25, 264  ;;  %165 = vbcast.lane.b32.xlu0 %v7115_v25, 256 }
  0x40   :  { %180 = vbcast.lane.b32.xlu1 %v7120_v26, 264  ;;  %176 = vbcast.lane.b32.xlu0 %v7120_v26, 256 }
  0x44   :  { %191 = vbcast.lane.b32.xlu1 %v7125_v27, 264  ;;  %187 = vbcast.lane.b32.xlu0 %v7125_v27, 256 }
  0x48   :  { %202 = vbcast.lane.b32.xlu1 %v7133_v29, 264  ;;  %198 = vbcast.lane.b32.xlu0 %v7133_v29, 256 }
  0x4c   :  { %213 = vbcast.lane.b32.xlu1 %v7138_v30, 264  ;;  %209 = vbcast.lane.b32.xlu0 %v7138_v30, 256 }
  0x50   :  { %224 = vbcast.lane.b32.xlu1 %v7143_v31, 264  ;;  %220 = vbcast.lane.b32.xlu0 %v7143_v31, 256 }
  0x54   :  { %235 = vbcast.lane.b32.xlu1 %v7148_v32, 264  ;;  %231 = vbcast.lane.b32.xlu0 %v7148_v32, 256 }
  0x58   :  { %246 = vbcast.lane.b32.xlu1 %v7153_v33, 264  ;;  %242 = vbcast.lane.b32.xlu0 %v7153_v33, 256  ;;  %v7302_v33 = vrot.slane %v13_v52, %v7069_v15 }
  0x5a   :  { %12341 = vst [vmem:[#allocation53_spill] sm:$0xff] %v7302_v33 }
  0x5c   :  { %257 = vbcast.lane.b32.xlu1 %v7158_v34, 264  ;;  %253 = vbcast.lane.b32.xlu0 %v7158_v34, 256 }
  0x60   :  { %268 = vbcast.lane.b32.xlu1 %v7163_v35, 264  ;;  %264 = vbcast.lane.b32.xlu0 %v7163_v35, 256 }
  0x64   :  { %279 = vbcast.lane.b32.xlu1 %v7168_v36, 264  ;;  %275 = vbcast.lane.b32.xlu0 %v7168_v36, 256 }
  0x68   :  { %290 = vbcast.lane.b32.xlu1 %v7176_v38, 264  ;;  %286 = vbcast.lane.b32.xlu0 %v7176_v38, 256 }
  0x6c   :  { %301 = vbcast.lane.b32.xlu1 %v7181_v39, 264  ;;  %297 = vbcast.lane.b32.xlu0 %v7181_v39, 256 }
  0x70   :  { %312 = vbcast.lane.b32.xlu1 %v7186_v40, 264  ;;  %308 = vbcast.lane.b32.xlu0 %v7186_v40, 256 }
  0x74   :  { %323 = vbcast.lane.b32.xlu1 %v7191_v41, 264  ;;  %319 = vbcast.lane.b32.xlu0 %v7191_v41, 256  ;;  %v7288_v41 = vrot.slane %v13_v52, %v7061_v13 }
  0x76   :  { %12338 = vst [vmem:[#allocation50_spill] sm:$0xff] %v7288_v41 }
  0x78   :  { %334 = vbcast.lane.b32.xlu1 %v7196_v42, 264  ;;  %330 = vbcast.lane.b32.xlu0 %v7196_v42, 256 }
  0x7a   :  { %v7203_v44 = vpop.permute.xlu1 %33  ;;  %v7205_v45 = vpop.permute.xlu0 %22 }
  0x7c   :  { %345 = vbcast.lane.b32.xlu1 %v7201_v43, 264  ;;  %341 = vbcast.lane.b32.xlu0 %v7201_v43, 256 }
  0x7e   :  { %v7212_v49 = vpop.permute.xlu1 %37  ;;  %v7214_v50 = vpop.permute.xlu0 %26 }
  0x7f   :  { %12324 = vst [vmem:[#allocation36_spill] sm:$0xff] %v7212_v49  ;;  %12325 = vst [vmem:[#allocation37_spill] sm:$0xff] %v7214_v50 }
  0x80   :  { %356 = vbcast.lane.b32.xlu1 %v7210_v46, 264  ;;  %352 = vbcast.lane.b32.xlu0 %v7210_v46, 256 }
  0x82   :  { %v7224_v54 = vpop.permute.xlu1 %48  ;;  %v7226_v55 = vpop.permute.xlu0 %44 }
  0x83   :  { %12327 = vst [vmem:[#allocation39_spill] sm:$0xff] %v7224_v54  ;;  %v721_v58 = vcombine.low %v7205_v45, %v7226_v55 }
  0x84   :  { %367 = vbcast.lane.b32.xlu1 %v7219_v51, 264  ;;  %363 = vbcast.lane.b32.xlu0 %v7219_v51, 256 }
  0x85   :  { %v729_v0 = vrot.slane %v721_v58, %v7234_v57  ;;  %v6986_v58 = vmov 1934713408  }
  0x86   :  { %v7238_v59 = vpop.permute.xlu1 %59  ;;  %v7240_v60 = vpop.permute.xlu0 %55 }
  0x87   :  { %12329 = vst [vmem:[#allocation41_spill] sm:$0xff] %v7238_v59  ;;  %v737_v61 = vcombine.low %v7203_v44, %v7240_v60 }
  0x88   :  { %378 = vbcast.lane.b32.xlu1 %v7231_v56, 264  ;;  %374 = vbcast.lane.b32.xlu0 %v7231_v56, 256 }
  0x89   :  { %v745_v63 = vrot.slane %v737_v61, %v7234_v57  ;;  %v788_v61 = vunpack.c.l.s4 %v6986_v58 }
  0x8a   :  { %v7251_v2 = vpop.permute.xlu1 %70  ;;  %v7253_v19 = vpop.permute.xlu0 %66 }
  0x8b   :  { %12331 = vst [vmem:[#allocation43_spill] sm:$0xff] %v7251_v2  ;;  %v786_v28 = vcombine.high %v729_v0, %v745_v63  ;;  %v789_v46 = vunpack.c.0.s8 %v788_v61 }
  0x8c   :  { %389 = vbcast.lane.b32.xlu1 %v7247_v62, 264  ;;  %385 = vbcast.lane.b32.xlu0 %v7247_v62, 256  ;;  %v7275_v62 = vrot.slane %v13_v52, %v7053_v11 }
  0x8d   :  { %v7293_v61 = vsub.s32 %v789_v46, %v7017_v1 }
  0x8e   :  { %v7260_v47 = vpop.permute.xlu1 %81  ;;  %v7262_v48 = vpop.permute.xlu0 %77  ;;  %12336 = vst [vmem:[#allocation48_spill] sm:$0xff] %v7275_v62 }
  0x8f   :  { %12333 = vst [vmem:[#allocation45_spill] sm:$0xff] %v7260_v47 }
  0x90   :  { %400 = vbcast.lane.b32.xlu1 %v7257_v37, 264  ;;  %396 = vbcast.lane.b32.xlu0 %v7257_v37, 256 }
  0x92   :  { %v7269_v56 = vpop.permute.xlu1 %92  ;;  %v7271_v51 = vpop.permute.xlu0 %88 }
  0x93   :  { %12335 = vst [vmem:[#allocation47_spill] sm:$0xff] %v7269_v56  ;;  %v753_v43 = vcombine.low %v7253_v19, %v7271_v51 }
  0x94   :  { %411 = vbcast.lane.b32.xlu1 %v7266_v53, 264  ;;  %407 = vbcast.lane.b32.xlu0 %v7266_v53, 256  ;;  %v785_v53 = vcombine.low %v729_v0, %v745_v63  ;;  %v7316_v63 = vrot.slane %v786_v28, %v7293_v61 }
  0x95   :  { %v761_v39 = vrot.slane %v753_v43, %v7234_v57 }
  0x96   :  { %v7280_v42 = vpop.permute.xlu1 %103  ;;  %v7282_v37 = vpop.permute.xlu0 %99  ;;  %v7310_v46 = vrot.slane %v785_v53, %v7293_v61 }
  0x97   :  { %12337 = vst [vmem:[#allocation49_spill] sm:$0xff] %v7280_v42  ;;  %v769_v58 = vcombine.low %v7262_v48, %v7282_v37 }
  0x98   :  { %422 = vbcast.lane.b32.xlu1 %v7275_v62, 264  ;;  %418 = vbcast.lane.b32.xlu0 %v7275_v62, 256  ;;  %12343 = vst [vmem:[#allocation55_spill] sm:$0xff] %v7310_v46 }
  0x99   :  { %v777_v40 = vrot.slane %v769_v58, %v7234_v57 }
  0x9a   :  { %v7296_v38 = vpop.permute.xlu1 %114  ;;  %v7298_v36 = vpop.permute.xlu0 %110 }
  0x9b   :  { %12339 = vst [vmem:[#allocation51_spill] sm:$0xff] %v7296_v38  ;;  %12340 = vst [vmem:[#allocation52_spill] sm:$0xff] %v7298_v36  ;;  %v817_v35 = vcombine.low %v761_v39, %v777_v40  ;;  %v818_v34 = vcombine.high %v761_v39, %v777_v40  ;;  %v7323_v40 = vrot.slane %v13_v52, %v7077_v17 }
  0x9c   :  { %433 = vbcast.lane.b32.xlu1 %v7288_v41, 264  ;;  %429 = vbcast.lane.b32.xlu0 %v7288_v41, 256 }
  0x9d   :  { %v7313_v43 = vrot.slane %v817_v35, %v7293_v61  ;;  %v7319_v39 = vrot.slane %v818_v34, %v7293_v61  ;;  %12345 = vst [vmem:[#allocation57_spill] sm:$0xff] %v7323_v40  ;;  %v14_v34 = vld [vmem:[%s11962_s0 + $0x28] sm:$0xff] }
  0x9e   :  { %v7305_v58 = vpop.permute.xlu1 %125  ;;  %v7307_v1 = vpop.permute.xlu0 %121  ;;  %v7341_v52 = vrot.slane %v14_v34, %v7026_v4  ;;  %v7354_v62 = vrot.slane %v14_v34, %v7023_v3  ;;  %v7365_v27 = vrot.slane %v14_v34, %v7037_v7  ;;  %v7381_v25 = vrot.slane %v14_v34, %v7053_v11 }
  0x9f   :  { %12342 = vst [vmem:[#allocation54_spill] sm:$0xff] %v7305_v58  ;;  %12344 = vst [vmem:[#allocation56_spill] sm:$0xff] %v7313_v43  ;;  %v7403_v12 = vrot.slane %v14_v34, %v7069_v15 }
  0xa0   :  { %444 = vbcast.lane.b32.xlu1 %v7302_v33, 264  ;;  %440 = vbcast.lane.b32.xlu0 %v7302_v33, 256  ;;  %12348 = vst [vmem:[#allocation60_spill] sm:$0xff] %v7341_v52  ;;  %12350 = vst [vmem:[#allocation62_spill] sm:$0xff] %v7354_v62 }
  0xa1   :  { %12353 = vst [vmem:[#allocation65_spill] sm:$0xff] %v7365_v27  ;;  %12358 = vst [vmem:[#allocation70_spill] sm:$0xff] %v7381_v25 }
  0xa2   :  { %v7335_v28 = vpop.permute.xlu1 %136  ;;  %v7337_v41 = vpop.permute.xlu0 %132  ;;  %12362 = vst [vmem:[#allocation74_spill] sm:$0xff] %v7403_v12 }
  0xa3   :  { %12346 = vst [vmem:[#allocation58_spill] sm:$0xff] %v7335_v28  ;;  %12347 = vst [vmem:[#allocation59_spill] sm:$0xff] %v7337_v41  ;;  %v857_v35 = vcombine.low %v7298_v36, %v7337_v41 }
  0xa4   :  { %455 = vbcast.lane.b32.xlu1 %v7323_v40, 264  ;;  %451 = vbcast.lane.b32.xlu0 %v7323_v40, 256 }
  0xa5   :  { %v865_v40 = vrot.slane %v857_v35, %v7234_v57 }
  0xa6   :  { %v7346_v53 = vpop.permute.xlu1 %147  ;;  %v7348_v0 = vpop.permute.xlu0 %143 }
  0xa7   :  { %12349 = vst [vmem:[#allocation61_spill] sm:$0xff] %v7346_v53  ;;  %v873_v33 = vcombine.low %v7307_v1, %v7348_v0 }
  0xa8   :  { %466 = vbcast.lane.b32.xlu1 %v7341_v52, 264  ;;  %462 = vbcast.lane.b32.xlu0 %v7341_v52, 256 }
  0xa9   :  { %v881_v32 = vrot.slane %v873_v33, %v7234_v57  ;;  %v7372_v33 = vrot.slane %v14_v34, %v7045_v9 }
  0xaa   :  { %v7359_v31 = vpop.permute.xlu0 %154  ;;  %v7361_v30 = vpop.permute.xlu1 %158 }
  0xab   :  { %12351 = vst [vmem:[#allocation63_spill] sm:$0xff] %v7359_v31  ;;  %12352 = vst [vmem:[#allocation64_spill] sm:$0xff] %v7361_v30  ;;  %v922_v29 = vcombine.high %v865_v40, %v881_v32 }
  0xac   :  { %477 = vbcast.lane.b32.xlu1 %v7354_v62, 264  ;;  %473 = vbcast.lane.b32.xlu0 %v7354_v62, 256  ;;  %12355 = vst [vmem:[#allocation67_spill] sm:$0xff] %v7372_v33 }
  0xae   :  { %v7368_v26 = vpop.permute.xlu0 %165  ;;  %v7374_v35 = vpop.permute.xlu1 %169 }
  0xaf   :  { %12354 = vst [vmem:[#allocation66_spill] sm:$0xff] %v7368_v26  ;;  %12356 = vst [vmem:[#allocation68_spill] sm:$0xff] %v7374_v35 }
  0xb0   :  { %488 = vbcast.lane.b32.xlu1 %v7365_v27, 264  ;;  %484 = vbcast.lane.b32.xlu0 %v7365_v27, 256  ;;  %v7394_v27 = vrot.slane %v14_v34, %v7061_v13 }
  0xb2   :  { %v7377_v52 = vpop.permute.xlu0 %176  ;;  %v7388_v23 = vpop.permute.xlu1 %180  ;;  %12361 = vst [vmem:[#allocation73_spill] sm:$0xff] %v7394_v27 }
  0xb3   :  { %12357 = vst [vmem:[#allocation69_spill] sm:$0xff] %v7377_v52  ;;  %v889_v62 = vcombine.low %v7359_v31, %v7377_v52  ;;  %12360 = vst [vmem:[#allocation72_spill] sm:$0xff] %v7388_v23 }
  0xb4   :  { %499 = vbcast.lane.b32.xlu1 %v7372_v33, 264  ;;  %495 = vbcast.lane.b32.xlu0 %v7372_v33, 256  ;;  %v921_v33 = vcombine.low %v865_v40, %v881_v32 }
  0xb5   :  { %v897_v20 = vrot.slane %v889_v62, %v7234_v57  ;;  %v7417_v62 = vrot.slane %v922_v29, %v7293_v61 }
  0xb6   :  { %v7386_v24 = vpop.permute.xlu0 %187  ;;  %v7405_v10 = vpop.permute.xlu1 %191 }
  0xb7   :  { %12359 = vst [vmem:[#allocation71_spill] sm:$0xff] %v7386_v24  ;;  %v905_v22 = vcombine.low %v7368_v26, %v7386_v24  ;;  %12363 = vst [vmem:[#allocation75_spill] sm:$0xff] %v7405_v10 }
  0xb8   :  { %510 = vbcast.lane.b32.xlu1 %v7381_v25, 264  ;;  %506 = vbcast.lane.b32.xlu0 %v7381_v25, 256 }
  0xb9   :  { %v913_v21 = vrot.slane %v905_v22, %v7234_v57  ;;  %v7411_v22 = vrot.slane %v921_v33, %v7293_v61 }
  0xba   :  { %v7399_v18 = vpop.permute.xlu0 %198 }
  0xbb   :  { %v953_v16 = vcombine.low %v897_v20, %v913_v21  ;;  %v954_v14 = vcombine.high %v897_v20, %v913_v21  ;;  %12364 = vst [vmem:[#allocation76_spill] sm:$0xff] %v7411_v22  ;;  %v7424_v21 = vrot.slane %v14_v34, %v7077_v17 }
  0xbc   :  { %521 = vbcast.lane.b32.xlu1 %v7394_v27, 264  ;;  %517 = vbcast.lane.b32.xlu0 %v7394_v27, 256  ;;  %v7438_v27 = vpop.permute.xlu1 %202 }
  0xbd   :  { %v7414_v32 = vrot.slane %v953_v16, %v7293_v61  ;;  %v7420_v20 = vrot.slane %v954_v14, %v7293_v61  ;;  %12366 = vst [vmem:[#allocation78_spill] sm:$0xff] %v7424_v21  ;;  %v15_v14 = vld [vmem:[%s11962_s0 + $0x30] sm:$0xff]  ;;  %12367 = vst [vmem:[#allocation79_spill] sm:$0xff] %v7438_v27 }
  0xbe   :  { %v7408_v8 = vpop.permute.xlu0 %209  ;;  %v7442_v34 = vrot.slane %v15_v14, %v7026_v4  ;;  %v7464_v10 = vrot.slane %v15_v14, %v7037_v7  ;;  %v7504_v54 = vrot.slane %v15_v14, %v7069_v15 }
  0xbf   :  { %12365 = vst [vmem:[#allocation77_spill] sm:$0xff] %v7414_v32 }
  0xc0   :  { %532 = vbcast.lane.b32.xlu1 %v7403_v12, 264  ;;  %528 = vbcast.lane.b32.xlu0 %v7403_v12, 256  ;;  %12368 = vst [vmem:[#allocation80_spill] sm:$0xff] %v7442_v34  ;;  %v7453_v12 = vrot.slane %v15_v14, %v7023_v3  ;;  %v7455_v25 = vpop.permute.xlu1 %213  ;;  %12371 = vst [vmem:[#allocation83_spill] sm:$0xff] %v7464_v10 }
  0xc1   :  { %12370 = vst [vmem:[#allocation82_spill] sm:$0xff] %v7455_v25  ;;  %12379 = vst [vmem:[#allocation91_spill] sm:$0xff] %v7504_v54 }
  0xc2   :  { %v7436_v29 = vpop.permute.xlu0 %220  ;;  %12369 = vst [vmem:[#allocation81_spill] sm:$0xff] %v7453_v12 }
  0xc3   :  { %v993_v40 = vcombine.low %v7399_v18, %v7436_v29 }
  0xc4   :  { %543 = vbcast.lane.b32.xlu1 %v7424_v21, 264  ;;  %539 = vbcast.lane.b32.xlu0 %v7424_v21, 256  ;;  %v7469_v23 = vpop.permute.xlu1 %224 }
  0xc5   :  { %v1001_v21 = vrot.slane %v993_v40, %v7234_v57  ;;  %12372 = vst [vmem:[#allocation84_spill] sm:$0xff] %v7469_v23 }
  0xc6   :  { %v7447_v16 = vpop.permute.xlu0 %231 }
  0xc7   :  { %v1009_v33 = vcombine.low %v7408_v8, %v7447_v16 }
  0xc8   :  { %554 = vbcast.lane.b32.xlu1 %v7442_v34, 264  ;;  %550 = vbcast.lane.b32.xlu0 %v7442_v34, 256  ;;  %v7480_v34 = vrot.slane %v15_v14, %v7053_v11  ;;  %v7482_v58 = vpop.permute.xlu1 %235 }
  0xc9   :  { %v1017_v5 = vrot.slane %v1009_v33, %v7234_v57  ;;  %v7473_v33 = vrot.slane %v15_v14, %v7045_v9  ;;  %12375 = vst [vmem:[#allocation87_spill] sm:$0xff] %v7482_v58 }
  0xca   :  { %v7460_v6 = vpop.permute.xlu0 %242  ;;  %12374 = vst [vmem:[#allocation86_spill] sm:$0xff] %v7480_v34 }
  0xcb   :  { %v1058_v35 = vcombine.high %v1001_v21, %v1017_v5  ;;  %12373 = vst [vmem:[#allocation85_spill] sm:$0xff] %v7473_v33  ;;  %v1057_v25 = vcombine.low %v1001_v21, %v1017_v5  ;;  %v7523_v21 = vrot.slane %v15_v14, %v7077_v17 }
  0xcc   :  { %565 = vbcast.lane.b32.xlu1 %v7453_v12, 264  ;;  %561 = vbcast.lane.b32.xlu0 %v7453_v12, 256  ;;  %v7500_v27 = vpop.permute.xlu1 %246 }
  0xcd   :  { %12378 = vst [vmem:[#allocation90_spill] sm:$0xff] %v7500_v27  ;;  %12383 = vst [vmem:[#allocation95_spill] sm:$0xff] %v7523_v21 }
  0xce   :  { %v7467_v30 = vpop.permute.xlu0 %253 }
  0xd0   :  { %576 = vbcast.lane.b32.xlu1 %v7464_v10, 264  ;;  %572 = vbcast.lane.b32.xlu0 %v7464_v10, 256  ;;  %v7493_v10 = vrot.slane %v15_v14, %v7061_v13 }
  0xd2   :  { %v7476_v40 = vpop.permute.xlu0 %264  ;;  %12376 = vst [vmem:[#allocation88_spill] sm:$0xff] %v7493_v10 }
  0xd3   :  { %v1025_v12 = vcombine.low %v7460_v6, %v7476_v40 }
  0xd4   :  { %587 = vbcast.lane.b32.xlu1 %v7473_v33, 264  ;;  %583 = vbcast.lane.b32.xlu0 %v7473_v33, 256 }
  0xd5   :  { %v1033_v33 = vrot.slane %v1025_v12, %v7234_v57  ;;  %v7516_v12 = vrot.slane %v1058_v35, %v7293_v61 }
  0xd6   :  { %v7487_v53 = vpop.permute.xlu0 %275 }
  0xd7   :  { %v1041_v38 = vcombine.low %v7467_v30, %v7487_v53 }
  0xd8   :  { %598 = vbcast.lane.b32.xlu1 %v7480_v34, 264  ;;  %594 = vbcast.lane.b32.xlu0 %v7480_v34, 256 }
  0xd9   :  { %v1049_v28 = vrot.slane %v1041_v38, %v7234_v57  ;;  %v7510_v38 = vrot.slane %v1057_v25, %v7293_v61 }
  0xda   :  { %v7498_v58 = vpop.permute.xlu0 %286 }
  0xdb   :  { %12377 = vst [vmem:[#allocation89_spill] sm:$0xff] %v7498_v58  ;;  %v1089_v23 = vcombine.low %v1033_v33, %v1049_v28  ;;  %v1090_v50 = vcombine.high %v1033_v33, %v1049_v28  ;;  %12381 = vst [vmem:[#allocation93_spill] sm:$0xff] %v7510_v38 }
  0xdc   :  { %609 = vbcast.lane.b32.xlu1 %v7493_v10, 264  ;;  %605 = vbcast.lane.b32.xlu0 %v7493_v10, 256  ;;  %v7531_v10 = vpop.permute.xlu1 %257 }
  0xdd   :  { %v7513_v5 = vrot.slane %v1089_v23, %v7293_v61  ;;  %v7519_v28 = vrot.slane %v1090_v50, %v7293_v61  ;;  %12384 = vst [vmem:[#allocation96_spill] sm:$0xff] %v7531_v10  ;;  %v16_v50 = vld [vmem:[%s11962_s0 + $0x38] sm:$0xff]  ;;  %s6987_s0 = smov 2  }
  0xde   :  { %v7507_v47 = vpop.permute.xlu0 %297  ;;  %v7541_v14 = vrot.slane %v16_v50, %v7026_v4  ;;  %v7554_v34 = vrot.slane %v16_v50, %v7023_v3 }
  0xdf   :  { %12380 = vst [vmem:[#allocation92_spill] sm:$0xff] %v7507_v47  ;;  %12382 = vst [vmem:[#allocation94_spill] sm:$0xff] %v7513_v5 }
  0xe0   :  { %620 = vbcast.lane.b32.xlu1 %v7504_v54, 264  ;;  %616 = vbcast.lane.b32.xlu0 %v7504_v54, 256  ;;  %12386 = vst [vmem:[#allocation98_spill] sm:$0xff] %v7541_v14  ;;  %v7548_v33 = vpop.permute.xlu1 %268  ;;  %12389 = vst [vmem:[#allocation101_spill] sm:$0xff] %v7554_v34 }
  0xe1   :  { %12388 = vst [vmem:[#allocation100_spill] sm:$0xff] %v7548_v33  ;;  %v7563_v33 = vrot.slane %v16_v50, %v7037_v7  ;;  %v7581_v7 = vrot.slane %v16_v50, %v7053_v11 }
  0xe2   :  { %v7537_v35 = vpop.permute.xlu0 %308 }
  0xe3   :  { %12385 = vst [vmem:[#allocation97_spill] sm:$0xff] %v7537_v35  ;;  %v1129_v23 = vcombine.low %v7498_v58, %v7537_v35  ;;  %12391 = vst [vmem:[#allocation103_spill] sm:$0xff] %v7563_v33  ;;  %v7603_v58 = vrot.slane %v16_v50, %v7069_v15  ;;  %v7624_v15 = vrot.slane %v16_v50, %v7077_v17 }
  0xe4   :  { %631 = vbcast.lane.b32.xlu1 %v7523_v21, 264  ;;  %627 = vbcast.lane.b32.xlu0 %v7523_v21, 256  ;;  %v7565_v42 = vpop.permute.xlu1 %279  ;;  %12397 = vst [vmem:[#allocation109_spill] sm:$0xff] %v7581_v7 }
  0xe5   :  { %v1137_v21 = vrot.slane %v1129_v23, %v7234_v57  ;;  %12392 = vst [vmem:[#allocation104_spill] sm:$0xff] %v7565_v42  ;;  %12401 = vst [vmem:[#allocation113_spill] sm:$0xff] %v7603_v58 }
  0xe6   :  { %v7546_v25 = vpop.permute.xlu0 %319  ;;  %12405 = vst [vmem:[#allocation117_spill] sm:$0xff] %v7624_v15 }
  0xe7   :  { %12387 = vst [vmem:[#allocation99_spill] sm:$0xff] %v7546_v25  ;;  %v1145_v54 = vcombine.low %v7507_v47, %v7546_v25 }
  0xe8   :  { %642 = vbcast.lane.b32.xlu1 %v7541_v14, 264  ;;  %638 = vbcast.lane.b32.xlu0 %v7541_v14, 256  ;;  %v7577_v14 = vpop.permute.xlu1 %290 }
  0xe9   :  { %v1153_v4 = vrot.slane %v1145_v54, %v7234_v57  ;;  %v7572_v54 = vrot.slane %v16_v50, %v7045_v9  ;;  %12396 = vst [vmem:[#allocation108_spill] sm:$0xff] %v7577_v14 }
  0xea   :  { %v7559_v10 = vpop.permute.xlu0 %330 }
  0xeb   :  { %12390 = vst [vmem:[#allocation102_spill] sm:$0xff] %v7559_v10  ;;  %v1194_v27 = vcombine.high %v1137_v21, %v1153_v4  ;;  %12394 = vst [vmem:[#allocation106_spill] sm:$0xff] %v7572_v54 }
  0xec   :  { %653 = vbcast.lane.b32.xlu1 %v7554_v34, 264  ;;  %649 = vbcast.lane.b32.xlu0 %v7554_v34, 256  ;;  %v7594_v14 = vpop.permute.xlu1 %301 }
  0xed   :  { %12400 = vst [vmem:[#allocation112_spill] sm:$0xff] %v7594_v14 }
  0xee   :  { %v7568_v3 = vpop.permute.xlu0 %341 }
  0xef   :  { %12393 = vst [vmem:[#allocation105_spill] sm:$0xff] %v7568_v3 }
  0xf0   :  { %664 = vbcast.lane.b32.xlu1 %v7563_v33, 264  ;;  %660 = vbcast.lane.b32.xlu0 %v7563_v33, 256  ;;  %v7592_v33 = vrot.slane %v16_v50, %v7061_v13  ;;  %v986_v50 = vcombine.high %v7411_v22, %v7414_v32 }
  0xf2   :  { %v7575_v23 = vpop.permute.xlu0 %352  ;;  %12399 = vst [vmem:[#allocation111_spill] sm:$0xff] %v7592_v33 }
  0xf3   :  { %12395 = vst [vmem:[#allocation107_spill] sm:$0xff] %v7575_v23  ;;  %v1161_v34 = vcombine.low %v7559_v10, %v7575_v23 }
  0xf4   :  { %675 = vbcast.lane.b32.xlu1 %v7572_v54, 264  ;;  %671 = vbcast.lane.b32.xlu0 %v7572_v54, 256  ;;  %v1193_v54 = vcombine.low %v1137_v21, %v1153_v4  ;;  %v7613_v21 = vrot.slane %v1194_v27, %v7293_v61  ;;  %v850_v27 = vcombine.high %v7310_v46, %v7313_v43 }
  0xf5   :  { %v1169_v2 = vrot.slane %v1161_v34, %v7234_v57  ;;  %v1122_v43 = vcombine.high %v7510_v38, %v7513_v5 }
  0xf6   :  { %v7586_v42 = vpop.permute.xlu0 %363  ;;  %v7607_v13 = vrot.slane %v1193_v54, %v7293_v61 }
  0xf7   :  { %12398 = vst [vmem:[#allocation110_spill] sm:$0xff] %v7586_v42  ;;  %v1177_v9 = vcombine.low %v7568_v3, %v7586_v42 }
  0xf8   :  { %686 = vbcast.lane.b32.xlu1 %v7581_v7, 264  ;;  %682 = vbcast.lane.b32.xlu0 %v7581_v7, 256  ;;  %12402 = vst [vmem:[#allocation114_spill] sm:$0xff] %v7607_v13 }
  0xf9   :  { %v1185_v11 = vrot.slane %v1177_v9, %v7234_v57 }
  0xfa   :  { %v7599_v56 = vpop.permute.xlu0 %374 }
  0xfb   :  { %v1225_v49 = vcombine.low %v1169_v2, %v1185_v11  ;;  %v1226_v59 = vcombine.high %v1169_v2, %v1185_v11  ;;  %v7618_v2 = vpop.permute.xlu1 %312 }
  0xfc   :  { %697 = vbcast.lane.b32.xlu1 %v7592_v33, 264  ;;  %693 = vbcast.lane.b32.xlu0 %v7592_v33, 256  ;;  %12404 = vst [vmem:[#allocation116_spill] sm:$0xff] %v7618_v2 }
  0xfd   :  { %v7610_v9 = vrot.slane %v1225_v49, %v7293_v61  ;;  %v7616_v34 = vrot.slane %v1226_v59, %v7293_v61 }
  0xfe   :  { %v7620_v4 = vpop.permute.xlu0 %385 }
  0xff   :  { %12403 = vst [vmem:[#allocation115_spill] sm:$0xff] %v7610_v9  ;;  %v7636_v11 = vpop.permute.xlu1 %323  ;;  %v1258_v32 = vcombine.high %v7607_v13, %v7610_v9 }
 0x100   :  { %708 = vbcast.lane.b32.xlu1 %v7603_v58, 264  ;;  %704 = vbcast.lane.b32.xlu0 %v7603_v58, 256  ;;  %12406 = vst [vmem:[#allocation118_spill] sm:$0xff] %v7636_v11 }
 0x102   :  { %v7633_v59 = vpop.permute.xlu0 %396 }
 0x103   :  { %v1265_v17 = vcombine.low %v7599_v56, %v7633_v59  ;;  %v7655_v22 = vpop.permute.xlu1 %334 }
 0x104   :  { %719 = vbcast.lane.b32.xlu1 %v7624_v15, 264  ;;  %715 = vbcast.lane.b32.xlu0 %v7624_v15, 256  ;;  %12407 = vst [vmem:[#allocation119_spill] sm:$0xff] %v7655_v22 }
 0x105   :  { %v1273_v15 = vrot.slane %v1265_v17, %v7234_v57 }
 0x106   :  { %v7643_v54 = vpop.permute.xlu0 %407 }
 0x107   :  { %v1281_v49 = vcombine.low %v7620_v4, %v7643_v54  ;;  %v7665_v17 = vpop.permute.xlu1 %345 }
 0x108   :  { %2907 = vrot.lane.b32.xlu1 %v986_v50, %s6987_s0  ;;  %2905 = vrot.lane.b32.xlu0 %v850_v27, %s6987_s0  ;;  %12408 = vst [vmem:[#allocation120_spill] sm:$0xff] %v7665_v17 }
 0x109   :  { %v1289_v58 = vrot.slane %v1281_v49, %v7234_v57 }
 0x10a   :  { %v7657_v33 = vpop.permute.xlu0 %418 }
 0x10b   :  { %v1330_v46 = vcombine.high %v1273_v15, %v1289_v58  ;;  %v7671_v9 = vpop.permute.xlu1 %356  ;;  %v1329_v38 = vcombine.low %v1273_v15, %v1289_v58 }
 0x10c   :  { %2911 = vrot.lane.b32.xlu1 %v1258_v32, %s6987_s0  ;;  %2909 = vrot.lane.b32.xlu0 %v1122_v43, %s6987_s0  ;;  %12409 = vst [vmem:[#allocation121_spill] sm:$0xff] %v7671_v9 }
 0x10d   :  { %v7684_v11 = vrot.slane %v1329_v38, %v7293_v61  ;;  %v7690_v2 = vrot.slane %v1330_v46, %v7293_v61 }
 0x10e   :  { %v7663_v27 = vpop.permute.xlu0 %429 }
 0x10f   :  { %v7681_v14 = vpop.permute.xlu1 %367  ;;  %12412 = vst [vmem:[#allocation124_spill] sm:$0xff] %v7684_v11 }
 0x110   :  { %12411 = vst [vmem:[#allocation123_spill] sm:$0xff] %v7681_v14 }
 0x112   :  { %v7667_v49 = vpop.permute.xlu0 %440 }
 0x113   :  { %v1297_v50 = vcombine.low %v7657_v33, %v7667_v49  ;;  %v7706_v46 = vpop.permute.xlu1 %378 }
 0x114   :  { %12415 = vst [vmem:[#allocation127_spill] sm:$0xff] %v7706_v46 }
 0x115   :  { %v1305_v32 = vrot.slane %v1297_v50, %v7234_v57 }
 0x116   :  { %v7673_v13 = vpop.permute.xlu0 %451 }
 0x117   :  { %v1313_v5 = vcombine.low %v7663_v27, %v7673_v13  ;;  %v7716_v14 = vpop.permute.xlu1 %389 }
 0x118   :  { %12418 = vst [vmem:[#allocation130_spill] sm:$0xff] %v7716_v14 }
 0x119   :  { %v1321_v43 = vrot.slane %v1313_v5, %v7234_v57 }
 0x11a   :  { %v7679_v7 = vpop.permute.xlu0 %462 }
 0x11b   :  { %12410 = vst [vmem:[#allocation122_spill] sm:$0xff] %v7679_v7  ;;  %v1361_v17 = vcombine.low %v1305_v32, %v1321_v43  ;;  %v1362_v22 = vcombine.high %v1305_v32, %v1321_v43 }
 0x11d   :  { %v7687_v9 = vrot.slane %v1361_v17, %v7293_v61  ;;  %v7693_v58 = vrot.slane %v1362_v22, %v7293_v61 }
 0x11e   :  { %v7695_v15 = vpop.permute.xlu0 %473 }
 0x11f   :  { %12413 = vst [vmem:[#allocation125_spill] sm:$0xff] %v7687_v9  ;;  %12414 = vst [vmem:[#allocation126_spill] sm:$0xff] %v7695_v15  ;;  %v1394_v5 = vcombine.high %v7684_v11, %v7687_v9  ;;  %v7722_v11 = vpop.permute.xlu1 %400 }
 0x120   :  { %12420 = vst [vmem:[#allocation132_spill] sm:$0xff] %v7722_v11 }
 0x121   :  { %2913 = vrot.lane.b32.xlu0 %v1394_v5, %s6987_s0 }
 0x122   :  { %v7708_v22 = vpop.permute.xlu0 %484 }
 0x123   :  { %12416 = vst [vmem:[#allocation128_spill] sm:$0xff] %v7708_v22  ;;  %v1401_v32 = vcombine.low %v7679_v7, %v7708_v22  ;;  %v7728_v7 = vpop.permute.xlu1 %411 }
 0x124   :  { %12423 = vst [vmem:[#allocation135_spill] sm:$0xff] %v7728_v7 }
 0x125   :  { %v1409_v38 = vrot.slane %v1401_v32, %v7234_v57 }
 0x126   :  { %v7712_v43 = vpop.permute.xlu0 %495 }
 0x127   :  { %12417 = vst [vmem:[#allocation129_spill] sm:$0xff] %v7712_v43  ;;  %v1417_v50 = vcombine.low %v7695_v15, %v7712_v43  ;;  %v7738_v11 = vpop.permute.xlu1 %422 }
 0x128   :  { %12425 = vst [vmem:[#allocation137_spill] sm:$0xff] %v7738_v11 }
 0x129   :  { %v1425_v17 = vrot.slane %v1417_v50, %v7234_v57 }
 0x12a   :  { %v7720_v9 = vpop.permute.xlu0 %506 }
 0x12b   :  { %12419 = vst [vmem:[#allocation131_spill] sm:$0xff] %v7720_v9  ;;  %v1466_v5 = vcombine.high %v1409_v38, %v1425_v17  ;;  %v1465_v50 = vcombine.low %v1409_v38, %v1425_v17 }
 0x12d   :  { %v7743_v7 = vrot.slane %v1465_v50, %v7293_v61 }
 0x12e   :  { %v7724_v46 = vpop.permute.xlu0 %517 }
 0x12f   :  { %12421 = vst [vmem:[#allocation133_spill] sm:$0xff] %v7724_v46  ;;  %12426 = vst [vmem:[#allocation138_spill] sm:$0xff] %v7743_v7 }
 0x132   :  { %v7726_v35 = vpop.permute.xlu0 %528 }
 0x133   :  { %12422 = vst [vmem:[#allocation134_spill] sm:$0xff] %v7726_v35  ;;  %v1433_v22 = vcombine.low %v7720_v9, %v7726_v35  ;;  %v7749_v35 = vrot.slane %v1466_v5, %v7293_v61 }
 0x135   :  { %v1441_v14 = vrot.slane %v1433_v22, %v7234_v57 }
 0x136   :  { %v7732_v15 = vpop.permute.xlu0 %539 }
 0x137   :  { %12424 = vst [vmem:[#allocation136_spill] sm:$0xff] %v7732_v15  ;;  %v1449_v32 = vcombine.low %v7724_v46, %v7732_v15 }
 0x139   :  { %v1457_v43 = vrot.slane %v1449_v32, %v7234_v57  ;;  %v7762_v32 = vpop.permute.xlu1 %433 }
 0x13a   :  { %v7740_v3 = vpop.permute.xlu0 %550  ;;  %12428 = vst [vmem:[#allocation140_spill] sm:$0xff] %v7762_v32 }
 0x13b   :  { %v1497_v42 = vcombine.low %v1441_v14, %v1457_v43  ;;  %v1498_v10 = vcombine.high %v1441_v14, %v1457_v43 }
 0x13d   :  { %v7746_v9 = vrot.slane %v1497_v42, %v7293_v61  ;;  %v7752_v38 = vrot.slane %v1498_v10, %v7293_v61  ;;  %v7769_v5 = vpop.permute.xlu1 %444 }
 0x13e   :  { %v7754_v17 = vpop.permute.xlu0 %561  ;;  %12429 = vst [vmem:[#allocation141_spill] sm:$0xff] %v7769_v5 }
 0x13f   :  { %12427 = vst [vmem:[#allocation139_spill] sm:$0xff] %v7746_v9  ;;  %v1530_v22 = vcombine.high %v7743_v7, %v7746_v9 }
 0x141   :  { %2915 = vrot.lane.b32.xlu1 %v1530_v22, %s6987_s0  ;;  %v7775_v46 = vpop.permute.xlu1 %455 }
 0x142   :  { %v7767_v10 = vpop.permute.xlu0 %572  ;;  %12430 = vst [vmem:[#allocation142_spill] sm:$0xff] %v7775_v46 }
 0x143   :  { %v1537_v22 = vcombine.low %v7740_v3, %v7767_v10 }
 0x145   :  { %v7781_v32 = vpop.permute.xlu1 %466  ;;  %v1545_v46 = vrot.slane %v1537_v22, %v7234_v57 }
 0x146   :  { %v7771_v50 = vpop.permute.xlu0 %583  ;;  %12431 = vst [vmem:[#allocation143_spill] sm:$0xff] %v7781_v32 }
 0x147   :  { %v1553_v43 = vcombine.low %v7754_v17, %v7771_v50 }
 0x149   :  { %v1561_v9 = vrot.slane %v1553_v43, %v7234_v57  ;;  %v7795_v23 = vpop.permute.xlu1 %477 }
 0x14a   :  { %v7773_v11 = vpop.permute.xlu0 %594  ;;  %12432 = vst [vmem:[#allocation144_spill] sm:$0xff] %v7795_v23 }
 0x14b   :  { %v1601_v32 = vcombine.low %v1545_v46, %v1561_v9  ;;  %v1602_v41 = vcombine.high %v1545_v46, %v1561_v9 }
 0x14d   :  { %v7802_v52 = vrot.slane %v1601_v32, %v7293_v61  ;;  %v7807_v22 = vpop.permute.xlu1 %488  ;;  %v12439_v32 = vcombine.low %v7316_v63, %v7319_v39 }
 0x14e   :  { %v7777_v14 = vpop.permute.xlu0 %605  ;;  %12436 = vst [vmem:[#allocation148_spill] sm:$0xff] %v7807_v22 }
 0x14f   :  { %12434 = vst [vmem:[#allocation146_spill] sm:$0xff] %v7802_v52 }
 0x151   :  { %v7818_v36 = vpop.permute.xlu1 %499 }
 0x152   :  { %v7783_v42 = vpop.permute.xlu0 %616  ;;  %12438 = vst [vmem:[#allocation150_spill] sm:$0xff] %v7818_v36  ;;  %v12442_v36 = vcombine.low %v7690_v2, %v7693_v58 }
 0x153   :  { %v1569_v7 = vcombine.low %v7773_v11, %v7783_v42 }
 0x155   :  { %v1577_v47 = vrot.slane %v1569_v7, %v7234_v57  ;;  %v12440_v7 = vcombine.low %v7516_v12, %v7519_v28 }
 0x156   :  { %v7790_v5 = vpop.permute.xlu0 %627 }
 0x157   :  { %v1585_v15 = vcombine.low %v7777_v14, %v7790_v5 }
 0x159   :  { %v1593_v25 = vrot.slane %v1585_v15, %v7234_v57 }
 0x15a   :  { %v7799_v31 = vpop.permute.xlu0 %638 }
 0x15b   :  { %12433 = vst [vmem:[#allocation145_spill] sm:$0xff] %v7799_v31  ;;  %v1633_v43 = vcombine.low %v1577_v47, %v1593_v25  ;;  %v1634_v22 = vcombine.high %v1577_v47, %v1593_v25 }
 0x15d   :  { %v7805_v26 = vrot.slane %v1633_v43, %v7293_v61 }
 0x15e   :  { %v7809_v24 = vpop.permute.xlu0 %649 }
 0x15f   :  { %12435 = vst [vmem:[#allocation147_spill] sm:$0xff] %v7805_v26  ;;  %12437 = vst [vmem:[#allocation149_spill] sm:$0xff] %v7809_v24  ;;  %v1666_v23 = vcombine.high %v7802_v52, %v7805_v26  ;;  %v1648_v52 = vrot.slane %v1634_v22, %v7293_v61  ;;  %v770_v22 = vcombine.high %v7262_v48, %v7282_v37 }
 0x160   :  { %v12444_v37 = vcombine.high %v7316_v63, %v7319_v39  ;;  %v722_v48 = vcombine.high %v7205_v45, %v7226_v55  ;;  %v1026_v63 = vcombine.high %v7460_v6, %v7476_v40  ;;  %v1314_v6 = vcombine.high %v7663_v27, %v7673_v13 }
 0x161   :  { %2917 = vrot.lane.b32.xlu0 %v1666_v23, %s6987_s0  ;;  %v7830_v23 = vpop.permute.xlu1 %510  ;;  %v1298_v13 = vcombine.high %v7657_v33, %v7667_v49  ;;  %v12448_v27 = vcombine.high %v7690_v2, %v7693_v58  ;;  %v1586_v2 = vcombine.high %v7777_v14, %v7790_v5 }
 0x162   :  { %v7816_v15 = vpop.permute.xlu0 %660  ;;  %12441 = vst [vmem:[#allocation151_spill] sm:$0xff] %v7830_v23  ;;  %v7948_v33 = vrot.slane %v1314_v6, %v7234_v57 }
 0x163   :  { %v1673_v25 = vcombine.low %v7799_v31, %v7816_v15 }
 0x165   :  { %2937 = vrot.lane.b32.xlu0 %v12439_v32, %s6988_s22  ;;  %v1616_v32 = vrot.slane %v1602_v41, %v7293_v61 }
 0x166   :  { %v7824_v43 = vpop.permute.xlu0 %671  ;;  %v12481_v14 = vld [vmem:[#allocation149_spill] sm:$0xff] }
 0x167   :  { %v1689_v9 = vcombine.low %v7809_v24, %v7824_v43  ;;  %v1667_v46 = vcombine.low %v1616_v32, %v1648_v52  ;;  %v738_v24 = vcombine.high %v7203_v44, %v7240_v60  ;;  %v1668_v49 = vcombine.high %v1616_v32, %v1648_v52 }
 0x168   :  { %v1570_v52 = vcombine.high %v7773_v11, %v7783_v42  ;;  %v7981_v11 = vrot.slane %v1586_v2, %v7234_v57 }
 0x169   :  { %2941 = vrot.lane.b32.xlu0 %v12440_v7, %s6988_s22  ;;  %v7846_v7 = vpop.permute.xlu1 %521  ;;  %v7857_v41 = vrot.slane %v1689_v9, %v7234_v57  ;;  %v1042_v9 = vcombine.high %v7467_v30, %v7487_v53  ;;  %v7888_v45 = vrot.slane %v738_v24, %v7234_v57  ;;  %v1010_v30 = vcombine.high %v7408_v8, %v7447_v16 }
 0x16a   :  { %v7832_v26 = vpop.permute.xlu0 %682  ;;  %12443 = vst [vmem:[#allocation152_spill] sm:$0xff] %v7846_v7  ;;  %v7903_v53 = vrot.slane %v722_v48, %v7234_v57  ;;  %v7991_v6 = vrot.slane %v1570_v52, %v7234_v57  ;;  %v874_v52 = vcombine.high %v7307_v1, %v7348_v0  ;;  %v12460_v0 = vld [vmem:[#allocation69_spill] sm:$0xff] }
 0x16b   :  { %v7910_v8 = vrot.slane %v1042_v9, %v7234_v57 }
 0x16d   :  { %2945 = vrot.lane.b32.xlu0 %v12442_v36, %s6988_s22  ;;  %v7854_v36 = vrot.slane %v1673_v25, %v7234_v57  ;;  %v7872_v25 = vrot.slane %v770_v22, %v7234_v57  ;;  %v7876_v7 = vpop.permute.xlu1 %532  ;;  %v994_v22 = vcombine.high %v7399_v18, %v7436_v29  ;;  %v1282_v18 = vcombine.high %v7620_v4, %v7643_v54 }
 0x16e   :  { %v7840_v47 = vpop.permute.xlu0 %693  ;;  %12445 = vst [vmem:[#allocation153_spill] sm:$0xff] %v7876_v7  ;;  %v1266_v4 = vcombine.high %v7599_v56, %v7633_v59  ;;  %v1554_v56 = vcombine.high %v7754_v17, %v7771_v50 }
 0x16f   :  { %v7940_v48 = vrot.slane %v994_v22, %v7234_v57 }
 0x170   :  { %v7972_v5 = vrot.slane %v1266_v4, %v7234_v57 }
 0x171   :  { %2949 = vrot.lane.b32.xlu0 %v1667_v46, %s6988_s22  ;;  %v754_v46 = vcombine.high %v7253_v19, %v7271_v51  ;;  %v1737_v51 = vcombine.low %v7854_v36, %v7857_v41  ;;  %v7928_v29 = vpop.permute.xlu1 %543 }
 0x172   :  { %v7851_v23 = vpop.permute.xlu0 %704 }
 0x173   :  { %v1705_v31 = vcombine.low %v7832_v26, %v7851_v23  ;;  %v7891_v55 = vrot.slane %v754_v46, %v7234_v57  ;;  %v7916_v40 = vrot.slane %v1737_v51, %v7293_v61  ;;  %v7924_v46 = vrot.slane %v1026_v63, %v7234_v57 }
 0x174   :  { %v1538_v63 = vcombine.high %v7740_v3, %v7767_v10  ;;  %v12451_v10 = vcombine.low %v7417_v62, %v7420_v20 }
 0x175   :  { %2969 = vrot.lane.b32.xlu0 %v12444_v37, %s6989_s23  ;;  %v7883_v60 = vrot.slane %v1705_v31, %v7234_v57  ;;  %v12446_v31 = vcombine.high %v7516_v12, %v7519_v28  ;;  %v833_v24 = vcombine.low %v7891_v55, %v7872_v25  ;;  %12447 = vst [vmem:[#allocation154_spill] sm:$0xff] %v7916_v40  ;;  %v7974_v32 = vpop.permute.xlu1 %554 }
 0x176   :  { %v7878_v44 = vpop.permute.xlu0 %715  ;;  %v801_v12 = vcombine.low %v7903_v53, %v7888_v45  ;;  %v7921_v28 = vrot.slane %v1010_v30, %v7234_v57  ;;  %v1105_v9 = vcombine.low %v7924_v46, %v7910_v8  ;;  %v7963_v30 = vrot.slane %v1298_v13, %v7234_v57  ;;  %12450 = vst [vmem:[#allocation156_spill] sm:$0xff] %v7974_v32 }
 0x177   :  { %v1721_v19 = vcombine.low %v7840_v47, %v7878_v44  ;;  %v841_v54 = vrot.slane %v833_v24, %v7293_v61  ;;  %v7987_v24 = vrot.slane %v1554_v56, %v7234_v57 }
 0x178   :  { %v1073_v51 = vcombine.low %v7940_v48, %v7921_v28  ;;  %v809_v59 = vrot.slane %v801_v12, %v7293_v61  ;;  %v1377_v50 = vcombine.low %v7963_v30, %v7948_v33  ;;  %v1113_v42 = vrot.slane %v1105_v9, %v7293_v61 }
 0x179   :  { %v1729_v39 = vrot.slane %v1721_v19, %v7234_v57  ;;  %2973 = vrot.lane.b32.xlu0 %v12446_v31, %s6989_s23  ;;  %v7957_v19 = vrot.slane %v1282_v18, %v7234_v57  ;;  %v8002_v12 = vrot.slane %v1538_v63, %v7234_v57  ;;  %v1649_v18 = vcombine.low %v7991_v6, %v7981_v11  ;;  %v12456_v63 = vld [vmem:[#allocation59_spill] sm:$0xff] }
 0x17a   :  { %v853_v17 = vcombine.low %v809_v59, %v841_v54  ;;  %v1081_v22 = vrot.slane %v1073_v51, %v7293_v61 }
 0x17b   :  { %v1769_v16 = vcombine.low %v7883_v60, %v1729_v39  ;;  %v1345_v31 = vcombine.low %v7972_v5, %v7957_v19  ;;  %v1770_v3 = vcombine.high %v7883_v60, %v1729_v39  ;;  %v1617_v60 = vcombine.low %v8002_v12, %v7987_v24 }
 0x17c   :  { %v1125_v13 = vcombine.low %v1081_v22, %v1113_v42  ;;  %v12453_v39 = vcombine.low %v7613_v21, %v7616_v34 }
 0x17d   :  { %2977 = vrot.lane.b32.xlu0 %v12448_v27, %s6989_s23  ;;  %v7937_v37 = vrot.slane %v1769_v16, %v7293_v61  ;;  %v1738_v16 = vcombine.high %v7854_v36, %v7857_v41  ;;  %v1385_v27 = vrot.slane %v1377_v50, %v7293_v61  ;;  %v8007_v36 = vpop.permute.xlu1 %565  ;;  %v1353_v41 = vrot.slane %v1345_v31, %v7293_v61  ;;  %v12457_v31 = vld [vmem:[#allocation52_spill] sm:$0xff] }
 0x17e   :  { %12452 = vst [vmem:[#allocation157_spill] sm:$0xff] %v8007_v36  ;;  %v8021_v4 = vrot.slane %v1770_v3, %v7293_v61  ;;  %v8032_v51 = vrot.slane %v1617_v60, %v7293_v61  ;;  %v8047_v3 = vrot.slane %v874_v52, %v7234_v57  ;;  %v854_v60 = vcombine.high %v809_v59, %v841_v54 }
 0x17f   :  { %12449 = vst [vmem:[#allocation155_spill] sm:$0xff] %v7937_v37  ;;  %v1802_v58 = vcombine.high %v7916_v40, %v7937_v37  ;;  %v8018_v9 = vrot.slane %v1738_v16, %v7293_v61  ;;  %v1397_v2 = vcombine.low %v1353_v41, %v1385_v27  ;;  %v858_v16 = vcombine.high %v12457_v31, %v12456_v63  ;;  %v12464_v63 = vld [vmem:[#allocation99_spill] sm:$0xff]  ;;  %v12465_v31 = vld [vmem:[#allocation92_spill] sm:$0xff] }
 0x180   :  { %v12463_v54 = vcombine.high %v7417_v62, %v7420_v20  ;;  %v12470_v62 = vcombine.high %v7613_v21, %v7616_v34  ;;  %v1722_v37 = vcombine.high %v7840_v47, %v7878_v44  ;;  %v1074_v44 = vcombine.high %v7940_v48, %v7921_v28 }
 0x181   :  { %2981 = vrot.lane.b32.xlu0 %v1668_v49, %s6989_s23  ;;  %2919 = vrot.lane.b32.xlu1 %v1802_v58, %s6987_s0  ;;  %v8024_v49 = vrot.slane %v1649_v18, %v7293_v61  ;;  %v12454_v58 = vcombine.low %v7749_v35, %v7752_v38  ;;  %v1803_v56 = vcombine.low %v8018_v9, %v8021_v4  ;;  %v12459_v18 = vld [vmem:[#allocation66_spill] sm:$0xff] }
 0x182   :  { %v8052_v1 = vrot.slane %v858_v16, %v7234_v57  ;;  %v12467_v16 = vld [vmem:[#allocation102_spill] sm:$0xff] }
 0x183   :  { %v1669_v50 = vcombine.low %v8032_v51, %v8024_v49 }
 0x184   :  { %v937_v59 = vcombine.low %v8052_v1, %v8047_v3 }
 0x185   :  { %3001 = vrot.lane.b32.xlu0 %v853_v17, %s6990_s24  ;;  %2939 = vrot.lane.b32.xlu1 %v12451_v10, %s6988_s22  ;;  %v8038_v17 = vpop.permute.xlu1 %576  ;;  %v12458_v10 = vld [vmem:[#allocation71_spill] sm:$0xff] }
 0x186   :  { %12455 = vst [vmem:[#allocation158_spill] sm:$0xff] %v8038_v17  ;;  %v8102_v21 = vrot.slane %v937_v59, %v7293_v61 }
 0x189   :  { %3005 = vrot.lane.b32.xlu0 %v1125_v13, %s6990_s24  ;;  %2943 = vrot.lane.b32.xlu1 %v12453_v39, %s6988_s22  ;;  %v906_v13 = vcombine.high %v12459_v18, %v12458_v10  ;;  %v12461_v39 = vld [vmem:[#allocation63_spill] sm:$0xff]  ;;  %v12469_v10 = vld [vmem:[#allocation105_spill] sm:$0xff] }
 0x18b   :  { %v8070_v52 = vrot.slane %v906_v13, %v7234_v57 }
 0x18d   :  { %3009 = vrot.lane.b32.xlu0 %v1397_v2, %s6990_s24  ;;  %2947 = vrot.lane.b32.xlu1 %v12454_v58, %s6988_s22  ;;  %v890_v2 = vcombine.high %v12461_v39, %v12460_v0  ;;  %v8056_v58 = vpop.permute.xlu1 %587 }
 0x18e   :  { %12462 = vst [vmem:[#allocation59_spill] sm:$0xff] %v8056_v58 }
 0x18f   :  { %v8079_v0 = vrot.slane %v890_v2, %v7234_v57 }
 0x191   :  { %3013 = vrot.lane.b32.xlu0 %v1669_v50, %s6990_s24  ;;  %2951 = vrot.lane.b32.xlu1 %v1803_v56, %s6988_s22  ;;  %v802_v50 = vcombine.high %v7903_v53, %v7888_v45  ;;  %v834_v56 = vcombine.high %v7891_v55, %v7872_v25  ;;  %v1146_v45 = vcombine.high %v12465_v31, %v12464_v63  ;;  %v12466_v53 = vld [vmem:[#allocation107_spill] sm:$0xff]  ;;  %v12468_v55 = vld [vmem:[#allocation110_spill] sm:$0xff]  ;;  %v8099_v63 = vpop.permute.xlu1 %598  ;;  %v12475_v31 = vld [vmem:[#allocation133_spill] sm:$0xff] }
 0x192   :  { %v1162_v25 = vcombine.high %v12467_v16, %v12466_v53  ;;  %v1178_v18 = vcombine.high %v12469_v10, %v12468_v55  ;;  %v969_v39 = vcombine.low %v8079_v0, %v8070_v52  ;;  %12473 = vst [vmem:[#allocation52_spill] sm:$0xff] %v8099_v63  ;;  %v1398_v16 = vcombine.high %v1353_v41, %v1385_v27  ;;  %v12476_v55 = vld [vmem:[#allocation129_spill] sm:$0xff]  ;;  %v12477_v10 = vld [vmem:[#allocation126_spill] sm:$0xff] }
 0x193   :  { %v8087_v20 = vrot.slane %v802_v50, %v7293_v61  ;;  %v8090_v13 = vrot.slane %v834_v56, %v7293_v61  ;;  %v12474_v56 = vld [vmem:[#allocation136_spill] sm:$0xff]  ;;  %v12482_v27 = vcombine.high %v7749_v35, %v7752_v38  ;;  %v1804_v41 = vcombine.high %v8018_v9, %v8021_v4 }
 0x194   :  { %v8105_v34 = vrot.slane %v1162_v25, %v7234_v57  ;;  %v8108_v50 = vrot.slane %v1178_v18, %v7234_v57  ;;  %v1450_v53 = vcombine.high %v12475_v31, %v12474_v56  ;;  %v1690_v25 = vcombine.high %v12481_v14, %v7824_v43 }
 0x195   :  { %3033 = vrot.lane.b32.xlu0 %v854_v60, %s6991_s25  ;;  %2971 = vrot.lane.b32.xlu1 %v12463_v54, %s6989_s23  ;;  %v1126_v60 = vcombine.high %v1081_v22, %v1113_v42  ;;  %v12471_v42 = vld [vmem:[#allocation97_spill] sm:$0xff]  ;;  %v8097_v54 = vrot.slane %v1146_v45, %v7234_v57  ;;  %v12478_v45 = vld [vmem:[#allocation134_spill] sm:$0xff]  ;;  %v1706_v18 = vcombine.high %v7832_v26, %v7851_v23  ;;  %v12483_v26 = vld [vmem:[#allocation128_spill] sm:$0xff] }
 0x196   :  { %v12472_v22 = vld [vmem:[#allocation89_spill] sm:$0xff]  ;;  %v12484_v23 = vld [vmem:[#allocation122_spill] sm:$0xff]  ;;  %v8139_v47 = vrot.slane %v969_v39, %v7293_v61  ;;  %v1241_v35 = vcombine.low %v8105_v34, %v8108_v50  ;;  %v8146_v38 = vrot.slane %v1450_v53, %v7234_v57  ;;  %v8158_v39 = vpop.permute.xlu1 %609  ;;  %v8164_v48 = vrot.slane %v1690_v25, %v7234_v57 }
 0x197   :  { %v1130_v2 = vcombine.high %v12472_v22, %v12471_v42  ;;  %v12480_v22 = vld [vmem:[#allocation145_spill] sm:$0xff]  ;;  %v1402_v14 = vcombine.high %v12484_v23, %v12483_v26  ;;  %12485 = vst [vmem:[#allocation71_spill] sm:$0xff] %v8158_v39  ;;  %v855_v56 = vcombine.low %v8087_v20, %v8090_v13  ;;  %v1378_v53 = vcombine.high %v7963_v30, %v7948_v33 }
 0x198   :  { %v1674_v59 = vcombine.high %v12480_v22, %v7816_v15  ;;  %v1106_v15 = vcombine.high %v7924_v46, %v7910_v8  ;;  %v1670_v8 = vcombine.high %v8032_v51, %v8024_v49  ;;  %v8170_v49 = vrot.slane %v1722_v37, %v7234_v57 }
 0x199   :  { %3037 = vrot.lane.b32.xlu0 %v1126_v60, %s6991_s25  ;;  %2975 = vrot.lane.b32.xlu1 %v12470_v62, %s6989_s23  ;;  %v1418_v60 = vcombine.high %v12477_v10, %v12476_v55  ;;  %v12479_v62 = vld [vmem:[#allocation131_spill] sm:$0xff]  ;;  %v8134_v43 = vrot.slane %v1130_v2, %v7234_v57  ;;  %v8167_v2 = vrot.slane %v1706_v18, %v7234_v57 }
 0x19a   :  { %v1434_v42 = vcombine.high %v12479_v62, %v12478_v45  ;;  %v8161_v28 = vrot.slane %v1674_v59, %v7234_v57  ;;  %v8175_v51 = vrot.slane %v1402_v14, %v7234_v57  ;;  %v8180_v31 = vrot.slane %v1106_v15, %v7293_v61 }
 0x19b   :  { %v1209_v46 = vcombine.low %v8134_v43, %v8097_v54  ;;  %v8153_v9 = vrot.slane %v1418_v60, %v7234_v57  ;;  %v8189_v55 = vrot.slane %v1241_v35, %v7293_v61  ;;  %v1346_v10 = vcombine.high %v7972_v5, %v7957_v19  ;;  %v12489_v35 = vld [vmem:[#allocation36_spill] sm:$0xff] }
 0x19c   :  { %v8156_v4 = vrot.slane %v1434_v42, %v7234_v57  ;;  %v1088_v45 = vrot.slane %v1074_v44, %v7293_v61  ;;  %v1753_v33 = vcombine.low %v8161_v28, %v8164_v48  ;;  %v1785_v30 = vcombine.low %v8167_v2, %v8170_v49  ;;  %v8203_v42 = vpop.permute.xlu1 %620  ;;  %v12488_v44 = vld [vmem:[#allocation41_spill] sm:$0xff] }
 0x19d   :  { %3041 = vrot.lane.b32.xlu0 %v1398_v16, %s6991_s25  ;;  %2979 = vrot.lane.b32.xlu1 %v12482_v27, %s6989_s23  ;;  %v989_v16 = vcombine.low %v8102_v21, %v8139_v47  ;;  %v1481_v60 = vcombine.low %v8175_v51, %v8153_v9  ;;  %v1217_v62 = vrot.slane %v1209_v46, %v7293_v61  ;;  %v12490_v46 = vld [vmem:[#allocation47_spill] sm:$0xff] }
 0x19e   :  { %v1513_v37 = vcombine.low %v8156_v4, %v8146_v38  ;;  %12486 = vst [vmem:[#allocation66_spill] sm:$0xff] %v8203_v42  ;;  %v1127_v19 = vcombine.low %v1088_v45, %v8180_v31  ;;  %v1650_v5 = vcombine.high %v7991_v6, %v7981_v11  ;;  %v8210_v59 = vrot.slane %v1378_v53, %v7293_v61 }
 0x19f   :  { %v1261_v22 = vcombine.low %v1217_v62, %v8189_v55  ;;  %v8216_v18 = vrot.slane %v1346_v10, %v7293_v61  ;;  %v8219_v27 = vrot.slane %v1481_v60, %v7293_v61  ;;  %v8226_v11 = vrot.slane %v1753_v33, %v7293_v61  ;;  %v12494_v60 = vld [vmem:[#allocation39_spill] sm:$0xff]  ;;  %v12495_v33 = vld [vmem:[#allocation37_spill] sm:$0xff] }
 0x1a0   :  { %v8213_v25 = vrot.slane %v1513_v37, %v7293_v61  ;;  %v8229_v6 = vrot.slane %v1785_v30, %v7293_v61  ;;  %v8236_v23 = vrot.slane %v1650_v5, %v7293_v61  ;;  %v12492_v37 = vld [vmem:[#allocation49_spill] sm:$0xff]  ;;  %v1809_v30 = vcombine.low %v12495_v33, %v12494_v60  ;;  %v12498_v60 = vld [vmem:[#allocation87_spill] sm:$0xff] }
 0x1a1   :  { %3045 = vrot.lane.b32.xlu0 %v1670_v8, %s6991_s25  ;;  %2983 = vrot.lane.b32.xlu1 %v1804_v41, %s6989_s23  ;;  %v1618_v41 = vcombine.high %v8002_v12, %v7987_v24  ;;  %v1399_v15 = vcombine.low %v8216_v18, %v8210_v59  ;;  %v8238_v24 = vpop.permute.xlu1 %631  ;;  %v1825_v8 = vcombine.low %v12489_v35, %v12488_v44  ;;  %v12503_v35 = vld [vmem:[#allocation96_spill] sm:$0xff] }
 0x1a2   :  { %v1533_v26 = vcombine.low %v8219_v27, %v8213_v25  ;;  %12487 = vst [vmem:[#allocation69_spill] sm:$0xff] %v8238_v24  ;;  %v1805_v14 = vcombine.low %v8226_v11, %v8229_v6  ;;  %v856_v40 = vcombine.high %v8087_v20, %v8090_v13 }
 0x1a3   :  { %v8243_v12 = vrot.slane %v1618_v41, %v7293_v61  ;;  %v8260_v5 = vrot.slane %v1825_v8, %v7234_v57  ;;  %v12497_v8 = vld [vmem:[#allocation79_spill] sm:$0xff] }
 0x1a5   :  { %3065 = vrot.lane.b32.xlu0 %v855_v56, %s6992_s26  ;;  %3003 = vrot.lane.b32.xlu1 %v989_v16, %s6990_s24  ;;  %v12491_v56 = vld [vmem:[#allocation43_spill] sm:$0xff]  ;;  %v12493_v16 = vld [vmem:[#allocation45_spill] sm:$0xff] }
 0x1a6   :  { %v1841_v53 = vcombine.low %v12491_v56, %v12490_v46  ;;  %v1857_v10 = vcombine.low %v12493_v16, %v12492_v37  ;;  %v12500_v37 = vld [vmem:[#allocation100_spill] sm:$0xff] }
 0x1a7   :  { %v12502_v46 = vld [vmem:[#allocation104_spill] sm:$0xff] }
 0x1a8   :  { %v8266_v41 = vrot.slane %v1857_v10, %v7234_v57  ;;  %v12501_v10 = vld [vmem:[#allocation90_spill] sm:$0xff]  ;;  %v2129_v44 = vcombine.low %v12503_v35, %v12502_v46  ;;  %v1262_v35 = vcombine.high %v1217_v62, %v8189_v55  ;;  %v12509_v62 = vld [vmem:[#allocation141_spill] sm:$0xff] }
 0x1a9   :  { %3069 = vrot.lane.b32.xlu0 %v1127_v19, %s6992_s26  ;;  %3007 = vrot.lane.b32.xlu1 %v1261_v22, %s6990_s24  ;;  %v1671_v19 = vcombine.low %v8243_v12, %v8236_v23  ;;  %v8263_v22 = vrot.slane %v1841_v53, %v7234_v57  ;;  %v12499_v53 = vld [vmem:[#allocation82_spill] sm:$0xff]  ;;  %v2113_v56 = vcombine.low %v12501_v10, %v12500_v37  ;;  %v12512_v37 = vld [vmem:[#allocation140_spill] sm:$0xff] }
 0x1aa   :  { %v2097_v16 = vcombine.low %v12499_v53, %v12498_v60  ;;  %v8307_v10 = vrot.slane %v2129_v44, %v7234_v57  ;;  %v1400_v44 = vcombine.high %v8216_v18, %v8210_v59  ;;  %v1534_v60 = vcombine.high %v8219_v27, %v8213_v25 }
 0x1ab   :  { %v1905_v13 = vcombine.low %v8263_v22, %v8266_v41  ;;  %v8304_v46 = vrot.slane %v2113_v56, %v7234_v57  ;;  %v12511_v56 = vld [vmem:[#allocation142_spill] sm:$0xff]  ;;  %v1242_v25 = vcombine.high %v8105_v34, %v8108_v50  ;;  %v2641_v34 = vcombine.low %v8007_v36, %v8056_v58 }
 0x1ac   :  { %v2401_v53 = vcombine.low %v12512_v37, %v12511_v56 }
 0x1ad   :  { %3073 = vrot.lane.b32.xlu0 %v1399_v15, %s6992_s26  ;;  %3011 = vrot.lane.b32.xlu1 %v1533_v26, %s6990_s24  ;;  %v8268_v15 = vpop.permute.xlu1 %642  ;;  %v8271_v26 = vrot.slane %v1809_v30, %v7234_v57  ;;  %v1128_v30 = vcombine.high %v1088_v45, %v8180_v31  ;;  %v12507_v31 = vld [vmem:[#allocation135_spill] sm:$0xff]  ;;  %v12508_v45 = vld [vmem:[#allocation130_spill] sm:$0xff] }
 0x1ae   :  { %v2369_v55 = vcombine.low %v12508_v45, %v12507_v31  ;;  %v8329_v45 = vrot.slane %v1905_v13, %v7293_v61  ;;  %v8355_v13 = vrot.slane %v2401_v53, %v7234_v57  ;;  %v1806_v53 = vcombine.high %v8226_v11, %v8229_v6 }
 0x1af   :  { %v1873_v20 = vcombine.low %v8271_v26, %v8260_v5  ;;  %v8392_v6 = vrot.slane %v1242_v25, %v7293_v61 }
 0x1b0   :  { %v8347_v27 = vrot.slane %v2369_v55, %v7234_v57  ;;  %v1210_v55 = vcombine.high %v8134_v43, %v8097_v54  ;;  %v1514_v43 = vcombine.high %v8156_v4, %v8146_v38  ;;  %v8413_v4 = vpop.permute.xlu0 %2905 }
 0x1b1   :  { %3077 = vrot.lane.b32.xlu0 %v1671_v19, %s6992_s26  ;;  %3015 = vrot.lane.b32.xlu1 %v1805_v14, %s6990_s24  ;;  %v990_v14 = vcombine.high %v8102_v21, %v8139_v47  ;;  %v12496_v19 = vld [vmem:[#allocation84_spill] sm:$0xff]  ;;  %v938_v21 = vcombine.high %v8052_v1, %v8047_v3  ;;  %v970_v47 = vcombine.high %v8079_v0, %v8070_v52  ;;  %v8309_v3 = vpop.permute.xlu1 %653  ;;  %v12506_v52 = vld [vmem:[#allocation127_spill] sm:$0xff] }
 0x1b2   :  { %v2081_v33 = vcombine.low %v12497_v8, %v12496_v19  ;;  %12504 = vst [vmem:[#allocation63_spill] sm:$0xff] %v8309_v3  ;;  %v12505_v1 = vld [vmem:[#allocation132_spill] sm:$0xff]  ;;  %v8411_v38 = vrot.slane %v1210_v55, %v7293_v61  ;;  %12514 = vst [vmem:[#allocation92_spill] sm:$0xff] %v8413_v4  ;;  %v1754_v55 = vcombine.high %v8161_v28, %v8164_v48 }
 0x1b3   :  { %v2353_v0 = vcombine.low %v12506_v52, %v12505_v1  ;;  %v8326_v52 = vrot.slane %v1873_v20, %v7293_v61  ;;  %v8336_v37 = vrot.slane %v938_v21, %v7293_v61  ;;  %v8339_v59 = vrot.slane %v970_v47, %v7293_v61 }
 0x1b4   :  { %v2625_v21 = vcombine.low %v7974_v32, %v8038_v17  ;;  %v2657_v47 = vcombine.low %v8099_v63, %v8203_v42  ;;  %v8449_v4 = vpop.permute.xlu0 %2909  ;;  %v12519_v63 = vld [vmem:[#allocation61_spill] sm:$0xff]  ;;  %v12520_v42 = vld [vmem:[#allocation54_spill] sm:$0xff]  ;;  %v12524_v32 = vld [vmem:[#allocation75_spill] sm:$0xff] }
 0x1b5   :  { %3097 = vrot.lane.b32.xlu0 %v856_v40, %s6993_s27  ;;  %3035 = vrot.lane.b32.xlu1 %v990_v14, %s6991_s25  ;;  %v8298_v40 = vrot.slane %v2081_v33, %v7234_v57  ;;  %v8301_v14 = vrot.slane %v2097_v16, %v7234_v57  ;;  %v12510_v16 = vld [vmem:[#allocation137_spill] sm:$0xff]  ;;  %v8344_v18 = vrot.slane %v2353_v0, %v7234_v57  ;;  %v8361_v50 = vpop.permute.xlu1 %664 }
 0x1b6   :  { %v2385_v33 = vcombine.low %v12510_v16, %v12509_v62  ;;  %v1672_v0 = vcombine.high %v8243_v12, %v8236_v23  ;;  %v8395_v12 = vrot.slane %v2625_v21, %v7234_v57  ;;  %v1263_v21 = vcombine.low %v8411_v38, %v8392_v6  ;;  %12516 = vst [vmem:[#allocation102_spill] sm:$0xff] %v8449_v4  ;;  %v12523_v4 = vld [vmem:[#allocation64_spill] sm:$0xff] }
 0x1b7   :  { %v2417_v11 = vcombine.low %v8344_v18, %v8347_v27  ;;  %v1961_v36 = vcombine.low %v12520_v42, %v12519_v63  ;;  %v12530_v42 = vld [vmem:[#allocation118_spill] sm:$0xff] }
 0x1b8   :  { %v8352_v20 = vrot.slane %v2385_v33, %v7234_v57  ;;  %v1937_v33 = vcombine.low %v8326_v52, %v8329_v45 }
 0x1b9   :  { %3101 = vrot.lane.b32.xlu0 %v1128_v30, %s6993_s27  ;;  %3039 = vrot.lane.b32.xlu1 %v1262_v35, %s6991_s25  ;;  %v2145_v35 = vcombine.low %v8298_v40, %v8301_v14  ;;  %v2177_v30 = vcombine.low %v8304_v46, %v8307_v10 }
 0x1ba   :  { %v2449_v54 = vcombine.low %v8352_v20, %v8355_v13 }
 0x1bb   :  { %v8383_v23 = vrot.slane %v2177_v30, %v7293_v61  ;;  %v8401_v30 = vrot.slane %v2657_v47, %v7234_v57 }
 0x1bd   :  { %3105 = vrot.lane.b32.xlu0 %v1400_v44, %s6993_s27  ;;  %3043 = vrot.lane.b32.xlu1 %v1534_v60, %s6991_s25  ;;  %v2673_v60 = vcombine.low %v8158_v39, %v8238_v24  ;;  %v991_v44 = vcombine.low %v8336_v37, %v8339_v59  ;;  %v8380_v39 = vrot.slane %v2145_v35, %v7293_v61  ;;  %v8408_v24 = vpop.permute.xlu1 %675 }
 0x1be   :  { %v8398_v35 = vrot.slane %v2641_v34, %v7234_v57  ;;  %12513 = vst [vmem:[#allocation99_spill] sm:$0xff] %v8408_v24  ;;  %v8428_v34 = vrot.slane %v1514_v43, %v7293_v61 }
 0x1bf   :  { %v2209_v25 = vcombine.low %v8380_v39, %v8383_v23 }
 0x1c0   :  { %v2689_v47 = vcombine.low %v8395_v12, %v8398_v35 }
 0x1c1   :  { %3109 = vrot.lane.b32.xlu0 %v1672_v0, %s6993_s27  ;;  %3047 = vrot.lane.b32.xlu1 %v1806_v53, %s6991_s25  ;;  %v8404_v0 = vrot.slane %v2673_v60, %v7234_v57  ;;  %v1482_v53 = vcombine.high %v8175_v51, %v8153_v9  ;;  %v8422_v9 = vrot.slane %v2417_v11, %v7293_v61  ;;  %v8443_v11 = vpop.permute.xlu1 %686 }
 0x1c2   :  { %v8425_v51 = vrot.slane %v2449_v54, %v7293_v61  ;;  %12515 = vst [vmem:[#allocation107_spill] sm:$0xff] %v8443_v11  ;;  %v8452_v28 = vrot.slane %v2689_v47, %v7293_v61  ;;  %v8469_v47 = vpop.permute.xlu0 %2913 }
 0x1c3   :  { %v2721_v60 = vcombine.low %v8401_v30, %v8404_v0  ;;  %12521 = vst [vmem:[#allocation110_spill] sm:$0xff] %v8469_v47 }
 0x1c4   :  { %v2481_v54 = vcombine.low %v8422_v9, %v8425_v51 }
 0x1c5   :  { %3129 = vrot.lane.b32.xlu0 %v1937_v33, %s6994_s28  ;;  %3067 = vrot.lane.b32.xlu1 %v991_v44, %s6992_s26  ;;  %v1786_v33 = vcombine.high %v8167_v2, %v8170_v49  ;;  %v8439_v44 = vrot.slane %v1482_v53, %v7293_v61  ;;  %v8455_v48 = vrot.slane %v2721_v60, %v7293_v61  ;;  %v12517_v53 = vld [vmem:[#allocation58_spill] sm:$0xff]  ;;  %v8479_v17 = vpop.permute.xlu1 %697 }
 0x1c6   :  { %v8458_v2 = vrot.slane %v1754_v55, %v7293_v61  ;;  %12526 = vst [vmem:[#allocation105_spill] sm:$0xff] %v8479_v17 }
 0x1c7   :  { %v1535_v43 = vcombine.low %v8439_v44, %v8428_v34  ;;  %v8461_v49 = vrot.slane %v1786_v33, %v7293_v61  ;;  %v2753_v60 = vcombine.low %v8452_v28, %v8455_v48  ;;  %v12522_v33 = vld [vmem:[#allocation72_spill] sm:$0xff] }
 0x1c8   :  { %v1977_v58 = vcombine.low %v12523_v4, %v12522_v33  ;;  %v1938_v4 = vcombine.high %v8326_v52, %v8329_v45  ;;  %v12531_v52 = vld [vmem:[#allocation112_spill] sm:$0xff] }
 0x1c9   :  { %3133 = vrot.lane.b32.xlu0 %v2209_v25, %s6994_s28  ;;  %3071 = vrot.lane.b32.xlu1 %v1263_v21, %s6992_s26  ;;  %v12518_v25 = vld [vmem:[#allocation51_spill] sm:$0xff]  ;;  %v1807_v55 = vcombine.low %v8458_v2, %v8461_v49  ;;  %v2233_v45 = vcombine.low %v12531_v52, %v12530_v42  ;;  %v8515_v63 = vpop.permute.xlu1 %708  ;;  %v1264_v52 = vcombine.high %v8411_v38, %v8392_v6  ;;  %v12540_v38 = vld [vmem:[#allocation150_spill] sm:$0xff] }
 0x1ca   :  { %v1945_v21 = vcombine.low %v12518_v25, %v12517_v53  ;;  %v12525_v25 = vld [vmem:[#allocation68_spill] sm:$0xff]  ;;  %12536 = vst [vmem:[#allocation89_spill] sm:$0xff] %v8515_v63 }
 0x1cb   :  { %v1993_v53 = vcombine.low %v12525_v25, %v12524_v32  ;;  %v992_v25 = vcombine.high %v8336_v37, %v8339_v59  ;;  %v1906_v32 = vcombine.high %v8263_v22, %v8266_v41  ;;  %v12532_v37 = vld [vmem:[#allocation121_spill] sm:$0xff]  ;;  %v12534_v41 = vld [vmem:[#allocation123_spill] sm:$0xff]  ;;  %v12535_v59 = vld [vmem:[#allocation120_spill] sm:$0xff] }
 0x1cd   :  { %3137 = vrot.lane.b32.xlu0 %v2481_v54, %s6994_s28  ;;  %3075 = vrot.lane.b32.xlu1 %v1535_v43, %s6992_s26  ;;  %v8482_v54 = vrot.slane %v1945_v21, %v7234_v57  ;;  %v8485_v43 = vrot.slane %v1961_v36, %v7234_v57  ;;  %v8498_v21 = vrot.slane %v1977_v58, %v7234_v57  ;;  %v12533_v58 = vld [vmem:[#allocation119_spill] sm:$0xff] }
 0x1ce   :  { %v8501_v36 = vrot.slane %v1993_v53, %v7234_v57  ;;  %v2249_v22 = vcombine.low %v12533_v58, %v12532_v37  ;;  %v2265_v53 = vcombine.low %v12535_v59, %v12534_v41  ;;  %v8528_v58 = vrot.slane %v1906_v32, %v7293_v61  ;;  %v12538_v32 = vld [vmem:[#allocation148_spill] sm:$0xff]  ;;  %v12542_v41 = vld [vmem:[#allocation151_spill] sm:$0xff] }
 0x1d1   :  { %3141 = vrot.lane.b32.xlu0 %v2753_v60, %s6994_s28  ;;  %3079 = vrot.lane.b32.xlu1 %v1807_v55, %s6992_s26  ;;  %v2009_v60 = vcombine.low %v8482_v54, %v8485_v43  ;;  %v12528_v55 = vld [vmem:[#allocation116_spill] sm:$0xff] }
 0x1d3   :  { %v8489_v47 = vpop.permute.xlu0 %2917 }
 0x1d4   :  { %12527 = vst [vmem:[#allocation97_spill] sm:$0xff] %v8489_v47  ;;  %v12529_v47 = vld [vmem:[#allocation108_spill] sm:$0xff] }
 0x1d5   :  { %v2217_v33 = vcombine.low %v12529_v47, %v12528_v55  ;;  %3161 = vrot.lane.b32.xlu0 %v1938_v4, %s6995_s29  ;;  %3099 = vrot.lane.b32.xlu1 %v992_v25, %s6993_s27  ;;  %v2210_v47 = vcombine.high %v8380_v39, %v8383_v23  ;;  %v1874_v4 = vcombine.high %v8271_v26, %v8260_v5  ;;  %v12539_v23 = vld [vmem:[#allocation143_spill] sm:$0xff] }
 0x1d6   :  { %v2041_v25 = vcombine.low %v8498_v21, %v8501_v36  ;;  %v8539_v39 = vrot.slane %v2009_v60, %v7293_v61  ;;  %v8542_v5 = vrot.slane %v2249_v22, %v7234_v57  ;;  %v8545_v26 = vrot.slane %v2265_v53, %v7234_v57 }
 0x1d7   :  { %v8517_v56 = vpop.permute.xlu0 %2937  ;;  %v8531_v59 = vrot.slane %v2217_v33, %v7234_v57  ;;  %v2489_v6 = vcombine.low %v12539_v23, %v12538_v32  ;;  %v12541_v33 = vld [vmem:[#allocation144_spill] sm:$0xff]  ;;  %v2482_v22 = vcombine.high %v8422_v9, %v8425_v51  ;;  %v1536_v53 = vcombine.high %v8439_v44, %v8428_v34 }
 0x1d8   :  { %12537 = vst [vmem:[#allocation136_spill] sm:$0xff] %v8517_v56  ;;  %v8534_v56 = vrot.slane %v2233_v45, %v7234_v57  ;;  %v2505_v45 = vcombine.low %v12541_v33, %v12540_v38  ;;  %v2146_v23 = vcombine.high %v8298_v40, %v8301_v14  ;;  %v2178_v33 = vcombine.high %v8304_v46, %v8307_v10 }
 0x1d9   :  { %3165 = vrot.lane.b32.xlu0 %v2210_v47, %s6995_s29  ;;  %3103 = vrot.lane.b32.xlu1 %v1264_v52, %s6993_s27  ;;  %v2521_v47 = vcombine.low %v12542_v41, %v7876_v7  ;;  %v12543_v52 = vld [vmem:[#allocation152_spill] sm:$0xff]  ;;  %v2761_v41 = vcombine.low %v8268_v15, %v8361_v50  ;;  %v8567_v7 = vpop.permute.xlu1 %719  ;;  %v2777_v9 = vcombine.low %v8309_v3, %v8408_v24 }
 0x1da   :  { %v2537_v37 = vcombine.low %v12543_v52, %v7928_v29  ;;  %12545 = vst [vmem:[#allocation129_spill] sm:$0xff] %v8567_v7  ;;  %v8570_v52 = vrot.slane %v2041_v25, %v7293_v61  ;;  %v2793_v51 = vcombine.low %v8443_v11, %v8515_v63  ;;  %v2809_v40 = vcombine.low %v8479_v17, %v8567_v7  ;;  %v12556_v17 = vld [vmem:[#allocation49_spill] sm:$0xff]  ;;  %v12558_v11 = vld [vmem:[#allocation39_spill] sm:$0xff]  ;;  %v12569_v24 = vld [vmem:[#allocation96_spill] sm:$0xff] }
 0x1db   :  { %v8555_v60 = vpop.permute.xlu0 %2941  ;;  %v2281_v46 = vcombine.low %v8531_v59, %v8534_v56  ;;  %v2313_v10 = vcombine.low %v8542_v5, %v8545_v26  ;;  %v8585_v14 = vrot.slane %v2489_v6, %v7234_v57  ;;  %v8588_v34 = vrot.slane %v2505_v45, %v7234_v57  ;;  %v12557_v7 = vld [vmem:[#allocation45_spill] sm:$0xff] }
 0x1dc   :  { %12544 = vst [vmem:[#allocation133_spill] sm:$0xff] %v8555_v60  ;;  %v8591_v44 = vrot.slane %v2521_v47, %v7234_v57  ;;  %v8594_v25 = vrot.slane %v2537_v37, %v7234_v57  ;;  %v1808_v60 = vcombine.high %v8458_v2, %v8461_v49  ;;  %v8603_v6 = vrot.slane %v2761_v41, %v7234_v57  ;;  %v12559_v63 = vld [vmem:[#allocation37_spill] sm:$0xff] }
 0x1dd   :  { %3169 = vrot.lane.b32.xlu0 %v2482_v22, %s6995_s29  ;;  %3107 = vrot.lane.b32.xlu1 %v1536_v53, %s6993_s27  ;;  %v2754_v53 = vcombine.high %v8452_v28, %v8455_v48  ;;  %v8606_v45 = vrot.slane %v1874_v4, %v7293_v61  ;;  %v8609_v47 = vrot.slane %v2146_v23, %v7293_v61 }
 0x1de   :  { %v8612_v37 = vrot.slane %v2178_v33, %v7293_v61  ;;  %v8618_v28 = vrot.slane %v2793_v51, %v7234_v57  ;;  %v8621_v48 = vrot.slane %v2809_v40, %v7234_v57  ;;  %v2418_v2 = vcombine.high %v8344_v18, %v8347_v27 }
 0x1df   :  { %v8596_v22 = vpop.permute.xlu0 %2945  ;;  %v2450_v49 = vcombine.high %v8352_v20, %v8355_v13  ;;  %v8630_v41 = vrot.slane %v2281_v46, %v7293_v61  ;;  %v8633_v4 = vrot.slane %v2313_v10, %v7293_v61  ;;  %v2553_v23 = vcombine.low %v8585_v14, %v8588_v34 }
 0x1e0   :  { %12546 = vst [vmem:[#allocation126_spill] sm:$0xff] %v8596_v22  ;;  %v8615_v22 = vrot.slane %v2777_v9, %v7234_v57  ;;  %v2585_v33 = vcombine.low %v8591_v44, %v8594_v25  ;;  %v1939_v18 = vcombine.low %v8606_v45, %v8528_v58  ;;  %v2073_v27 = vcombine.low %v8539_v39, %v8570_v52 }
 0x1e1   :  { %3173 = vrot.lane.b32.xlu0 %v2754_v53, %s6995_s29  ;;  %3111 = vrot.lane.b32.xlu1 %v1808_v60, %s6993_s27  ;;  %v2857_v13 = vcombine.low %v8618_v28, %v8621_v48  ;;  %v8649_v60 = vpop.permute.xlu1 %2907  ;;  %v2211_v51 = vcombine.low %v8609_v47, %v8612_v37  ;;  %v2345_v40 = vcombine.low %v8630_v41, %v8633_v4 }
 0x1e2   :  { %v2825_v20 = vcombine.low %v8603_v6, %v8615_v22  ;;  %12548 = vst [vmem:[#allocation131_spill] sm:$0xff] %v8649_v60  ;;  %v8658_v46 = vrot.slane %v2418_v2, %v7293_v61  ;;  %v8661_v10 = vrot.slane %v2450_v49, %v7293_v61  ;;  %v2690_v53 = vcombine.high %v8395_v12, %v8398_v35 }
 0x1e3   :  { %v8639_v9 = vpop.permute.xlu0 %2949  ;;  %v8681_v12 = vrot.slane %v2857_v13, %v7293_v61  ;;  %v12552_v13 = vld [vmem:[#allocation41_spill] sm:$0xff] }
 0x1e4   :  { %12547 = vst [vmem:[#allocation134_spill] sm:$0xff] %v8639_v9  ;;  %v8673_v9 = vrot.slane %v2585_v33, %v7293_v61  ;;  %v8678_v2 = vrot.slane %v2825_v20, %v7293_v61 }
 0x1e5   :  { %3193 = vrot.lane.b32.xlu0 %v1939_v18, %s6996_s30  ;;  %3131 = vrot.lane.b32.xlu1 %v2073_v27, %s6994_s28  ;;  %v2722_v18 = vcombine.high %v8401_v30, %v8404_v0  ;;  %v8670_v27 = vrot.slane %v2553_v23, %v7293_v61  ;;  %v8683_v35 = vpop.permute.xlu1 %2911  ;;  %v2483_v0 = vcombine.low %v8658_v46, %v8661_v10 }
 0x1e6   :  { %12550 = vst [vmem:[#allocation149_spill] sm:$0xff] %v8683_v35  ;;  %v8692_v23 = vrot.slane %v2690_v53, %v7293_v61  ;;  %v2889_v20 = vcombine.low %v8678_v2, %v8681_v12  ;;  %v12554_v35 = vld [vmem:[#allocation47_spill] sm:$0xff]  ;;  %v1858_v53 = vcombine.high %v12557_v7, %v12556_v17 }
 0x1e7   :  { %v8667_v60 = vpop.permute.xlu0 %2969  ;;  %v2617_v49 = vcombine.low %v8670_v27, %v8673_v9  ;;  %v8695_v33 = vrot.slane %v2722_v18, %v7293_v61  ;;  %v1810_v18 = vcombine.high %v12559_v63, %v12558_v11 }
 0x1e8   :  { %12549 = vst [vmem:[#allocation145_spill] sm:$0xff] %v8667_v60  ;;  %v8724_v7 = vrot.slane %v1858_v53, %v7234_v57 }
 0x1e9   :  { %3197 = vrot.lane.b32.xlu0 %v2211_v51, %s6996_s30  ;;  %3135 = vrot.lane.b32.xlu1 %v2345_v40, %s6994_s28  ;;  %v12553_v51 = vld [vmem:[#allocation36_spill] sm:$0xff]  ;;  %v8709_v3 = vpop.permute.xlu1 %2915  ;;  %v8727_v17 = vrot.slane %v1810_v18, %v7234_v57 }
 0x1ea   :  { %v1826_v40 = vcombine.high %v12553_v51, %v12552_v13  ;;  %12560 = vst [vmem:[#allocation122_spill] sm:$0xff] %v8709_v3  ;;  %v12564_v51 = vld [vmem:[#allocation87_spill] sm:$0xff]  ;;  %v12567_v3 = vld [vmem:[#allocation90_spill] sm:$0xff] }
 0x1eb   :  { %v8685_v30 = vpop.permute.xlu0 %2973 }
 0x1ec   :  { %12551 = vst [vmem:[#allocation128_spill] sm:$0xff] %v8685_v30  ;;  %v12555_v30 = vld [vmem:[#allocation43_spill] sm:$0xff]  ;;  %v8718_v13 = vrot.slane %v1826_v40, %v7234_v57  ;;  %v12565_v40 = vld [vmem:[#allocation82_spill] sm:$0xff] }
 0x1ed   :  { %3201 = vrot.lane.b32.xlu0 %v2483_v0, %s6996_s30  ;;  %3139 = vrot.lane.b32.xlu1 %v2617_v49, %s6994_s28  ;;  %v1842_v60 = vcombine.high %v12555_v30, %v12554_v35  ;;  %v2755_v49 = vcombine.low %v8692_v23, %v8695_v33  ;;  %v1940_v30 = vcombine.high %v8606_v45, %v8528_v58 }
 0x1ee   :  { %v2098_v53 = vcombine.high %v12565_v40, %v12564_v51  ;;  %v1889_v58 = vcombine.low %v8727_v17, %v8718_v13  ;;  %v2346_v45 = vcombine.high %v8630_v41, %v8633_v4  ;;  %v2386_v41 = vcombine.high %v12510_v16, %v12509_v62  ;;  %v12574_v4 = vld [vmem:[#allocation142_spill] sm:$0xff] }
 0x1ef   :  { %v8711_v0 = vpop.permute.xlu0 %2977  ;;  %v8721_v35 = vrot.slane %v1842_v60, %v7234_v57  ;;  %v2082_v60 = vcombine.high %v12497_v8, %v12496_v19  ;;  %v2010_v8 = vcombine.high %v8482_v54, %v8485_v43 }
 0x1f0   :  { %12561 = vst [vmem:[#allocation84_spill] sm:$0xff] %v8711_v0  ;;  %v12568_v0 = vld [vmem:[#allocation104_spill] sm:$0xff]  ;;  %v8786_v51 = vrot.slane %v1889_v58, %v7293_v61 }
 0x1f1   :  { %3205 = vrot.lane.b32.xlu0 %v2755_v49, %s6996_s30  ;;  %3143 = vrot.lane.b32.xlu1 %v2889_v20, %s6994_s28  ;;  %v2074_v20 = vcombine.high %v8539_v39, %v8570_v52  ;;  %v12566_v49 = vld [vmem:[#allocation100_spill] sm:$0xff]  ;;  %v1921_v19 = vcombine.low %v8721_v35, %v8724_v7  ;;  %v2212_v52 = vcombine.high %v8609_v47, %v8612_v37  ;;  %v12573_v47 = vld [vmem:[#allocation130_spill] sm:$0xff] }
 0x1f2   :  { %v2114_v18 = vcombine.high %v12567_v3, %v12566_v49  ;;  %v2042_v3 = vcombine.high %v8498_v21, %v8501_v36  ;;  %v12572_v21 = vld [vmem:[#allocation127_spill] sm:$0xff]  ;;  %v2370_v37 = vcombine.high %v12573_v47, %v12507_v31  ;;  %v8800_v62 = vrot.slane %v2010_v8, %v7293_v61  ;;  %v12584_v47 = vld [vmem:[#allocation69_spill] sm:$0xff] }
 0x1f3   :  { %v8729_v63 = vpop.permute.xlu1 %2919  ;;  %v8731_v11 = vpop.permute.xlu0 %2981  ;;  %v2354_v36 = vcombine.high %v12572_v21, %v12505_v1  ;;  %v2484_v1 = vcombine.high %v8658_v46, %v8661_v10  ;;  %v8797_v31 = vrot.slane %v1921_v19, %v7293_v61  ;;  %v12580_v8 = vld [vmem:[#allocation59_spill] sm:$0xff]  ;;  %v12583_v21 = vld [vmem:[#allocation52_spill] sm:$0xff] }
 0x1f4   :  { %12562 = vst [vmem:[#allocation79_spill] sm:$0xff] %v8729_v63  ;;  %12563 = vst [vmem:[#allocation132_spill] sm:$0xff] %v8731_v11  ;;  %v2130_v63 = vcombine.high %v12569_v24, %v12568_v0  ;;  %v8764_v0 = vrot.slane %v2082_v60, %v7234_v57  ;;  %v8770_v54 = vrot.slane %v2114_v18, %v7234_v57 }
 0x1f5   :  { %3225 = vrot.lane.b32.xlu0 %v1940_v30, %s6997_s2  ;;  %3163 = vrot.lane.b32.xlu1 %v2074_v20, %s6995_s29  ;;  %v8767_v30 = vrot.slane %v2098_v53, %v7234_v57  ;;  %v12575_v20 = vld [vmem:[#allocation140_spill] sm:$0xff]  ;;  %v2618_v53 = vcombine.high %v8670_v27, %v8673_v9  ;;  %v2282_v18 = vcombine.high %v8531_v59, %v8534_v56 }
 0x1f6   :  { %v8773_v43 = vrot.slane %v2130_v63, %v7234_v57  ;;  %v2402_v60 = vcombine.high %v12575_v20, %v12574_v4  ;;  %v8809_v46 = vrot.slane %v2042_v3, %v7293_v61  ;;  %v2314_v9 = vcombine.high %v8542_v5, %v8545_v26  ;;  %v12578_v5 = vld [vmem:[#allocation158_spill] sm:$0xff]  ;;  %v12579_v26 = vld [vmem:[#allocation156_spill] sm:$0xff]  ;;  %v12581_v3 = vld [vmem:[#allocation157_spill] sm:$0xff] }
 0x1f7   :  { %v8755_v39 = vpop.permute.xlu1 %2939  ;;  %v8757_v24 = vpop.permute.xlu0 %3001  ;;  %v2161_v16 = vcombine.low %v8764_v0, %v8767_v30  ;;  %v8814_v10 = vrot.slane %v2354_v36, %v7234_v57  ;;  %v2890_v27 = vcombine.high %v8678_v2, %v8681_v12  ;;  %v8821_v58 = vrot.slane %v2370_v37, %v7234_v57  ;;  %v12585_v2 = vld [vmem:[#allocation71_spill] sm:$0xff] }
 0x1f8   :  { %12570 = vst [vmem:[#allocation135_spill] sm:$0xff] %v8755_v39  ;;  %12571 = vst [vmem:[#allocation141_spill] sm:$0xff] %v8757_v24  ;;  %v2193_v49 = vcombine.low %v8770_v54, %v8773_v43  ;;  %v8824_v56 = vrot.slane %v2386_v41, %v7234_v57  ;;  %v8827_v59 = vrot.slane %v2402_v60, %v7234_v57 }
 0x1f9   :  { %3229 = vrot.lane.b32.xlu0 %v2212_v52, %s6997_s2  ;;  %3167 = vrot.lane.b32.xlu1 %v2346_v45, %s6995_s29  ;;  %v2626_v19 = vcombine.high %v12579_v26, %v12578_v5  ;;  %v2642_v52 = vcombine.high %v12581_v3, %v12580_v8  ;;  %v12582_v45 = vld [vmem:[#allocation66_spill] sm:$0xff]  ;;  %v2674_v12 = vcombine.high %v12585_v2, %v12584_v47 }
 0x1fa   :  { %v2658_v36 = vcombine.high %v12583_v21, %v12582_v45  ;;  %v2756_v41 = vcombine.high %v8692_v23, %v8695_v33  ;;  %v1941_v20 = vcombine.low %v8786_v51, %v8797_v31  ;;  %v2075_v60 = vcombine.low %v8800_v62, %v8809_v46 }
 0x1fb   :  { %v8788_v63 = vpop.permute.xlu1 %2943  ;;  %v8790_v40 = vpop.permute.xlu0 %3005  ;;  %v8856_v5 = vrot.slane %v2282_v18, %v7293_v61  ;;  %v8859_v23 = vrot.slane %v2314_v9, %v7293_v61  ;;  %v2433_v33 = vcombine.low %v8814_v10, %v8821_v58  ;;  %v2554_v26 = vcombine.high %v8585_v14, %v8588_v34 }
 0x1fc   :  { %12576 = vst [vmem:[#allocation137_spill] sm:$0xff] %v8788_v63  ;;  %12577 = vst [vmem:[#allocation116_spill] sm:$0xff] %v8790_v40  ;;  %v8873_v18 = vrot.slane %v2642_v52, %v7234_v57  ;;  %v8876_v9 = vrot.slane %v2658_v36, %v7234_v57  ;;  %v8879_v8 = vrot.slane %v2674_v12, %v7234_v57  ;;  %v12788_v40 = vld [vmem:[#allocation85_spill] sm:$0xff] }
 0x1fd   :  { %3233 = vrot.lane.b32.xlu0 %v2484_v1, %s6997_s2  ;;  %3171 = vrot.lane.b32.xlu1 %v2618_v53, %s6995_s29  ;;  %v8848_v1 = vrot.slane %v2161_v16, %v7293_v61  ;;  %v8853_v53 = vrot.slane %v2193_v49, %v7293_v61  ;;  %v2465_v16 = vcombine.low %v8824_v56, %v8827_v59 }
 0x1fe   :  { %v8870_v49 = vrot.slane %v2626_v19, %v7234_v57  ;;  %v2826_v14 = vcombine.high %v8603_v6, %v8615_v22  ;;  %v2858_v34 = vcombine.high %v8618_v28, %v8621_v48  ;;  %v8896_v19 = vrot.slane %v2433_v33, %v7293_v61 }
 0x1ff   :  { %v8837_v37 = vpop.permute.xlu1 %2947  ;;  %v8839_v4 = vpop.permute.xlu0 %3009  ;;  %v8899_v52 = vrot.slane %v2465_v16, %v7293_v61  ;;  %v2737_v6 = vcombine.low %v8876_v9, %v8879_v8  ;;  %v8910_v21 = vrot.slane %v2554_v26, %v7293_v61 }
 0x200   :  { %12586 = vst [vmem:[#allocation118_spill] sm:$0xff] %v8837_v37  ;;  %12587 = vst [vmem:[#allocation148_spill] sm:$0xff] %v8839_v4  ;;  %v2705_v22 = vcombine.low %v8870_v49, %v8873_v18  ;;  %v8918_v47 = vrot.slane %v2826_v14, %v7293_v61  ;;  %v8921_v2 = vrot.slane %v2858_v34, %v7293_v61  ;;  %v12595_v14 = vld [vmem:[#allocation51_spill] sm:$0xff]  ;;  %v12598_v37 = vld [vmem:[#allocation72_spill] sm:$0xff] }
 0x201   :  { %3237 = vrot.lane.b32.xlu0 %v2756_v41, %s6997_s2  ;;  %3175 = vrot.lane.b32.xlu1 %v2890_v27, %s6995_s29  ;;  %v2586_v27 = vcombine.high %v8591_v44, %v8594_v25  ;;  %v2213_v44 = vcombine.low %v8848_v1, %v8853_v53  ;;  %v2347_v25 = vcombine.low %v8856_v5, %v8859_v23 }
 0x202   :  { %v8932_v33 = vrot.slane %v2705_v22, %v7293_v61  ;;  %v8935_v16 = vrot.slane %v2737_v6, %v7293_v61  ;;  %v2891_v26 = vcombine.low %v8918_v47, %v8921_v2 }
 0x203   :  { %v8881_v3 = vpop.permute.xlu1 %2951  ;;  %v8883_v45 = vpop.permute.xlu0 %3013  ;;  %v8913_v36 = vrot.slane %v2586_v27, %v7293_v61  ;;  %v12594_v27 = vld [vmem:[#allocation58_spill] sm:$0xff] }
 0x204   :  { %12588 = vst [vmem:[#allocation150_spill] sm:$0xff] %v8881_v3  ;;  %12589 = vst [vmem:[#allocation41_spill] sm:$0xff] %v8883_v45  ;;  %v1946_v34 = vcombine.high %v12595_v14, %v12594_v27  ;;  %v1942_v27 = vcombine.high %v8786_v51, %v8797_v31  ;;  %v12606_v51 = vld [vmem:[#allocation108_spill] sm:$0xff] }
 0x205   :  { %3257 = vrot.lane.b32.xlu0 %v1941_v20, %s6998_s3  ;;  %3195 = vrot.lane.b32.xlu1 %v2075_v60, %s6996_s30  ;;  %v2485_v20 = vcombine.low %v8896_v19, %v8899_v52  ;;  %v2619_v60 = vcombine.low %v8910_v21, %v8913_v36  ;;  %v2218_v31 = vcombine.high %v12606_v51, %v12528_v55  ;;  %v12617_v51 = vld [vmem:[#allocation151_spill] sm:$0xff] }
 0x206   :  { %v8960_v14 = vrot.slane %v1946_v34, %v7234_v57  ;;  %v12607_v34 = vld [vmem:[#allocation112_spill] sm:$0xff]  ;;  %v1922_v55 = vcombine.high %v8721_v35, %v8724_v7 }
 0x207   :  { %v8905_v28 = vpop.permute.xlu1 %2971  ;;  %v8907_v48 = vpop.permute.xlu0 %3033 }
 0x208   :  { %12590 = vst [vmem:[#allocation36_spill] sm:$0xff] %v8905_v28  ;;  %12591 = vst [vmem:[#allocation47_spill] sm:$0xff] %v8907_v48  ;;  %v12603_v28 = vld [vmem:[#allocation68_spill] sm:$0xff]  ;;  %v12784_v48 = vld [vmem:[#allocation81_spill] sm:$0xff] }
 0x209   :  { %3261 = vrot.lane.b32.xlu0 %v2213_v44, %s6998_s3  ;;  %3199 = vrot.lane.b32.xlu1 %v2347_v25, %s6996_s30  ;;  %v12596_v44 = vld [vmem:[#allocation61_spill] sm:$0xff]  ;;  %v12597_v25 = vld [vmem:[#allocation54_spill] sm:$0xff] }
 0x20a   :  { %v1962_v3 = vcombine.high %v12597_v25, %v12596_v44 }
 0x20b   :  { %v8923_v12 = vpop.permute.xlu1 %2975  ;;  %v8925_v41 = vpop.permute.xlu0 %3037 }
 0x20c   :  { %12592 = vst [vmem:[#allocation43_spill] sm:$0xff] %v8923_v12  ;;  %12593 = vst [vmem:[#allocation49_spill] sm:$0xff] %v8925_v41  ;;  %v12599_v12 = vld [vmem:[#allocation64_spill] sm:$0xff] }
 0x20d   :  { %3265 = vrot.lane.b32.xlu0 %v2485_v20, %s6998_s3  ;;  %3203 = vrot.lane.b32.xlu1 %v2619_v60, %s6996_s30  ;;  %v1978_v22 = vcombine.high %v12599_v12, %v12598_v37  ;;  %v2757_v20 = vcombine.low %v8932_v33, %v8935_v16  ;;  %v12602_v60 = vld [vmem:[#allocation75_spill] sm:$0xff]  ;;  %v8963_v37 = vrot.slane %v1962_v3, %v7234_v57 }
 0x20e   :  { %v1994_v39 = vcombine.high %v12603_v28, %v12602_v60  ;;  %v2076_v28 = vcombine.high %v8800_v62, %v8809_v46  ;;  %v2234_v3 = vcombine.high %v12607_v34, %v12530_v42  ;;  %v12609_v60 = vld [vmem:[#allocation119_spill] sm:$0xff]  ;;  %v12618_v34 = vld [vmem:[#allocation152_spill] sm:$0xff] }
 0x20f   :  { %v8947_v63 = vpop.permute.xlu1 %2979  ;;  %v8949_v6 = vpop.permute.xlu0 %3041  ;;  %v8966_v12 = vrot.slane %v1978_v22, %v7234_v57  ;;  %v2025_v42 = vcombine.low %v8960_v14, %v8963_v37 }
 0x210   :  { %12600 = vst [vmem:[#allocation45_spill] sm:$0xff] %v8947_v63  ;;  %12601 = vst [vmem:[#allocation39_spill] sm:$0xff] %v8949_v6  ;;  %v12610_v63 = vld [vmem:[#allocation123_spill] sm:$0xff]  ;;  %v12611_v6 = vld [vmem:[#allocation120_spill] sm:$0xff]  ;;  %v9007_v35 = vrot.slane %v2234_v3, %v7234_v57  ;;  %v2538_v3 = vcombine.high %v12618_v34, %v7928_v29  ;;  %v2162_v29 = vcombine.high %v8764_v0, %v8767_v30 }
 0x211   :  { %3269 = vrot.lane.b32.xlu0 %v2757_v20, %s6998_s3  ;;  %3207 = vrot.lane.b32.xlu1 %v2891_v26, %s6996_s30  ;;  %v8975_v26 = vrot.slane %v1994_v39, %v7234_v57  ;;  %v12608_v20 = vld [vmem:[#allocation121_spill] sm:$0xff]  ;;  %v1890_v39 = vcombine.high %v8727_v17, %v8718_v13  ;;  %v9004_v13 = vrot.slane %v2218_v31, %v7234_v57 }
 0x212   :  { %v2250_v22 = vcombine.high %v12609_v60, %v12608_v20  ;;  %v9065_v30 = vrot.slane %v2538_v3, %v7234_v57  ;;  %v2892_v3 = vcombine.high %v8918_v47, %v8921_v2  ;;  %v2434_v47 = vcombine.high %v8814_v10, %v8821_v58 }
 0x213   :  { %v8968_v44 = vpop.permute.xlu1 %2983  ;;  %v8970_v25 = vpop.permute.xlu0 %3045  ;;  %v9026_v20 = vrot.slane %v1890_v39, %v7293_v61  ;;  %v2194_v39 = vcombine.high %v8770_v54, %v8773_v43  ;;  %v2762_v54 = vcombine.high %v8268_v15, %v8361_v50  ;;  %v2758_v43 = vcombine.high %v8932_v33, %v8935_v16 }
 0x214   :  { %12604 = vst [vmem:[#allocation37_spill] sm:$0xff] %v8968_v44  ;;  %12605 = vst [vmem:[#allocation87_spill] sm:$0xff] %v8970_v25  ;;  %v2266_v44 = vcombine.high %v12611_v6, %v12610_v63  ;;  %v2348_v63 = vcombine.high %v8856_v5, %v8859_v23  ;;  %v2214_v6 = vcombine.high %v8848_v1, %v8853_v53  ;;  %v12614_v5 = vld [vmem:[#allocation143_spill] sm:$0xff]  ;;  %v12615_v1 = vld [vmem:[#allocation144_spill] sm:$0xff] }
 0x215   :  { %3227 = vrot.lane.b32.xlu1 %v2076_v28, %s6997_s2  ;;  %3289 = vrot.lane.b32.xlu0 %v1942_v27, %s6999_s4  ;;  %v2057_v27 = vcombine.low %v8966_v12, %v8975_v26  ;;  %v9010_v7 = vrot.slane %v2250_v22, %v7234_v57  ;;  %v2490_v23 = vcombine.high %v12614_v5, %v12538_v32  ;;  %v12616_v28 = vld [vmem:[#allocation153_spill] sm:$0xff] }
 0x216   :  { %v9013_v17 = vrot.slane %v2266_v44, %v7234_v57  ;;  %v2506_v53 = vcombine.high %v12615_v1, %v12540_v38  ;;  %v2522_v31 = vcombine.high %v12617_v51, %v12616_v28  ;;  %v2620_v32 = vcombine.high %v8910_v21, %v8913_v36  ;;  %v12623_v5 = vld [vmem:[#allocation89_spill] sm:$0xff] }
 0x217   :  { %v8993_v62 = vpop.permute.xlu1 %3003  ;;  %v8995_v46 = vpop.permute.xlu0 %3065  ;;  %v2486_v38 = vcombine.high %v8896_v19, %v8899_v52  ;;  %v9037_v22 = vrot.slane %v2025_v42, %v7293_v61  ;;  %v9049_v21 = vrot.slane %v2057_v27, %v7293_v61  ;;  %v9054_v52 = vrot.slane %v2490_v23, %v7234_v57  ;;  %v12622_v42 = vld [vmem:[#allocation63_spill] sm:$0xff]  ;;  %v12626_v28 = vld [vmem:[#allocation105_spill] sm:$0xff] }
 0x218   :  { %12612 = vst [vmem:[#allocation82_spill] sm:$0xff] %v8993_v62  ;;  %12613 = vst [vmem:[#allocation100_spill] sm:$0xff] %v8995_v46  ;;  %v2329_v19 = vcombine.low %v9010_v7, %v9013_v17  ;;  %v9057_v36 = vrot.slane %v2506_v53, %v7234_v57  ;;  %v9062_v0 = vrot.slane %v2522_v31, %v7234_v57  ;;  %v12624_v23 = vld [vmem:[#allocation107_spill] sm:$0xff]  ;;  %v12625_v53 = vld [vmem:[#allocation129_spill] sm:$0xff] }
 0x219   :  { %3231 = vrot.lane.b32.xlu1 %v2348_v63, %s6997_s2  ;;  %3293 = vrot.lane.b32.xlu0 %v2214_v6, %s6999_s4  ;;  %v9040_v63 = vrot.slane %v1922_v55, %v7293_v61  ;;  %v2297_v6 = vcombine.low %v9004_v13, %v9007_v35  ;;  %v12621_v55 = vld [vmem:[#allocation99_spill] sm:$0xff]  ;;  %v2794_v1 = vcombine.high %v12624_v23, %v12623_v5 }
 0x21a   :  { %v2778_v27 = vcombine.high %v12622_v42, %v12621_v55  ;;  %v2810_v51 = vcombine.high %v12626_v28, %v12625_v53  ;;  %v2077_v15 = vcombine.low %v9037_v22, %v9049_v21  ;;  %v2176_v33 = vrot.slane %v2162_v29, %v7293_v61 }
 0x21b   :  { %v9028_v44 = vpop.permute.xlu1 %3007  ;;  %v9030_v60 = vpop.permute.xlu0 %3069  ;;  %v1943_v50 = vcombine.low %v9026_v20, %v9040_v63  ;;  %v2305_v16 = vrot.slane %v2297_v6, %v7293_v61  ;;  %v2466_v2 = vcombine.high %v8824_v56, %v8827_v59  ;;  %v2569_v55 = vcombine.low %v9054_v52, %v9057_v36 }
 0x21c   :  { %12619 = vst [vmem:[#allocation90_spill] sm:$0xff] %v9028_v44  ;;  %12620 = vst [vmem:[#allocation104_spill] sm:$0xff] %v9030_v60  ;;  %v2601_v29 = vcombine.low %v9062_v0, %v9065_v30  ;;  %v9105_v6 = vrot.slane %v2778_v27, %v7234_v57  ;;  %v9111_v10 = vrot.slane %v2810_v51, %v7234_v57  ;;  %v12782_v60 = vld [vmem:[#allocation80_spill] sm:$0xff] }
 0x21d   :  { %3235 = vrot.lane.b32.xlu1 %v2620_v32, %s6997_s2  ;;  %3297 = vrot.lane.b32.xlu0 %v2486_v38, %s6999_s4  ;;  %v2337_v32 = vrot.slane %v2329_v19, %v7293_v61  ;;  %v2208_v38 = vrot.slane %v2194_v39, %v7293_v61  ;;  %v9108_v39 = vrot.slane %v2794_v1, %v7234_v57 }
 0x21e   :  { %v2609_v42 = vrot.slane %v2601_v29, %v7293_v61  ;;  %v2448_v27 = vrot.slane %v2434_v47, %v7293_v61  ;;  %v2480_v5 = vrot.slane %v2466_v2, %v7293_v61  ;;  %v2706_v23 = vcombine.high %v8870_v49, %v8873_v18 }
 0x21f   :  { %v9077_v31 = vpop.permute.xlu1 %3011  ;;  %v9079_v34 = vpop.permute.xlu0 %3073  ;;  %v2349_v59 = vcombine.low %v2305_v16, %v2337_v32  ;;  %v2215_v19 = vcombine.low %v2176_v33, %v2208_v38  ;;  %v2738_v1 = vcombine.high %v8876_v9, %v8879_v8  ;;  %v2873_v28 = vcombine.low %v9108_v39, %v9111_v10 }
 0x220   :  { %12627 = vst [vmem:[#allocation96_spill] sm:$0xff] %v9077_v31  ;;  %12628 = vst [vmem:[#allocation127_spill] sm:$0xff] %v9079_v34  ;;  %v2720_v47 = vrot.slane %v2706_v23, %v7293_v61  ;;  %v2078_v23 = vcombine.high %v9037_v22, %v9049_v21  ;;  %v2026_v22 = vcombine.high %v8960_v14, %v8963_v37 }
 0x221   :  { %3239 = vrot.lane.b32.xlu1 %v2892_v3, %s6997_s2  ;;  %3301 = vrot.lane.b32.xlu0 %v2758_v43, %s6999_s4  ;;  %v9102_v43 = vrot.slane %v2762_v54, %v7234_v57  ;;  %v2577_v54 = vrot.slane %v2569_v55, %v7293_v61  ;;  %v2881_v8 = vrot.slane %v2873_v28, %v7293_v61 }
 0x222   :  { %v2752_v2 = vrot.slane %v2738_v1, %v7293_v61  ;;  %v1944_v1 = vcombine.high %v9026_v20, %v9040_v63  ;;  %v2058_v20 = vcombine.high %v8966_v12, %v8975_v26 }
 0x223   :  { %v9113_v58 = vpop.permute.xlu1 %3015  ;;  %v9115_v56 = vpop.permute.xlu0 %3077  ;;  %v2841_v53 = vcombine.low %v9102_v43, %v9105_v6 }
 0x224   :  { %12629 = vst [vmem:[#allocation130_spill] sm:$0xff] %v9113_v58  ;;  %12630 = vst [vmem:[#allocation142_spill] sm:$0xff] %v9115_v56  ;;  %v2760_v26 = vcombine.high %v2720_v47, %v2752_v2 }
 0x225   :  { %3259 = vrot.lane.b32.xlu1 %v2077_v15, %s6998_s3  ;;  %3321 = vrot.lane.b32.xlu0 %v1943_v50, %s7000_s5  ;;  %v2621_v15 = vcombine.low %v2577_v54, %v2609_v42  ;;  %v2487_v50 = vcombine.low %v2448_v27, %v2480_v5  ;;  %v2849_v9 = vrot.slane %v2841_v53, %v7293_v61 }
 0x227   :  { %v9131_v51 = vpop.permute.xlu1 %3035  ;;  %v9133_v3 = vpop.permute.xlu0 %3097  ;;  %v2894_v12 = vcombine.high %v2849_v9, %v2881_v8 }
 0x228   :  { %12631 = vst [vmem:[#allocation140_spill] sm:$0xff] %v9131_v51  ;;  %12632 = vst [vmem:[#allocation158_spill] sm:$0xff] %v9133_v3  ;;  %v12774_v3 = vld [vmem:[#allocation73_spill] sm:$0xff] }
 0x229   :  { %3263 = vrot.lane.b32.xlu1 %v2349_v59, %s6998_s3  ;;  %3325 = vrot.lane.b32.xlu0 %v2215_v19, %s7000_s5  ;;  %v2893_v59 = vcombine.low %v2849_v9, %v2881_v8  ;;  %v2759_v19 = vcombine.low %v2720_v47, %v2752_v2  ;;  %v2842_v8 = vcombine.high %v9102_v43, %v9105_v6  ;;  %v12650_v2 = vld [vmem:[#allocation5_spill] sm:$0xff] }
 0x22a   :  { %v2874_v47 = vcombine.high %v9108_v39, %v9111_v10  ;;  %v12653_v10 = vld [vmem:[#allocation7_spill] sm:$0xff] }
 0x22b   :  { %v9137_v49 = vpop.permute.xlu1 %3039  ;;  %v9139_v18 = vpop.permute.xlu0 %3101  ;;  %v2856_v6 = vrot.slane %v2842_v8, %v7293_v61 }
 0x22c   :  { %12633 = vst [vmem:[#allocation156_spill] sm:$0xff] %v9137_v49  ;;  %12634 = vst [vmem:[#allocation59_spill] sm:$0xff] %v9139_v18  ;;  %v2888_v39 = vrot.slane %v2874_v47, %v7293_v61 }
 0x22d   :  { %3267 = vrot.lane.b32.xlu1 %v2621_v15, %s6998_s3  ;;  %3329 = vrot.lane.b32.xlu0 %v2487_v50, %s7000_s5 }
 0x22f   :  { %v9147_v55 = vpop.permute.xlu1 %3043  ;;  %v9149_v29 = vpop.permute.xlu0 %3105 }
 0x230   :  { %12635 = vst [vmem:[#allocation157_spill] sm:$0xff] %v9147_v55  ;;  %12636 = vst [vmem:[#allocation66_spill] sm:$0xff] %v9149_v29 }
 0x231   :  { %3271 = vrot.lane.b32.xlu1 %v2893_v59, %s6998_s3  ;;  %3333 = vrot.lane.b32.xlu0 %v2759_v19, %s7000_s5  ;;  %v2350_v59 = vcombine.high %v2305_v16, %v2337_v32  ;;  %v2216_v19 = vcombine.high %v2176_v33, %v2208_v38  ;;  %v2298_v33 = vcombine.high %v9004_v13, %v9007_v35 }
 0x232   :  { %v2330_v16 = vcombine.high %v9010_v7, %v9013_v17  ;;  %v2040_v32 = vrot.slane %v2026_v22, %v7293_v61  ;;  %v2072_v38 = vrot.slane %v2058_v20, %v7293_v61  ;;  %v2570_v35 = vcombine.high %v9054_v52, %v9057_v36 }
 0x233   :  { %v9153_v53 = vpop.permute.xlu1 %3047  ;;  %v9155_v28 = vpop.permute.xlu0 %3109  ;;  %v2602_v7 = vcombine.high %v9062_v0, %v9065_v30 }
 0x234   :  { %12637 = vst [vmem:[#allocation52_spill] sm:$0xff] %v9153_v53  ;;  %12638 = vst [vmem:[#allocation69_spill] sm:$0xff] %v9155_v28  ;;  %v2344_v13 = vrot.slane %v2330_v16, %v7293_v61  ;;  %v2584_v0 = vrot.slane %v2570_v35, %v7293_v61 }
 0x235   :  { %3291 = vrot.lane.b32.xlu1 %v2078_v23, %s6999_s4  ;;  %3353 = vrot.lane.b32.xlu0 %v1944_v1, %s7001_s6  ;;  %v2622_v23 = vcombine.high %v2577_v54, %v2609_v42  ;;  %v2488_v1 = vcombine.high %v2448_v27, %v2480_v5  ;;  %v2312_v54 = vrot.slane %v2298_v33, %v7293_v61  ;;  %v12647_v5 = vld [vmem:[#allocation6_spill] sm:$0xff] }
 0x236   :  { %v2079_v27 = vcombine.low %v2040_v32, %v2072_v38  ;;  %v2616_v30 = vrot.slane %v2602_v7, %v7293_v61 }
 0x237   :  { %v9163_v15 = vpop.permute.xlu1 %3067  ;;  %v9165_v50 = vpop.permute.xlu0 %3129  ;;  %v2351_v9 = vcombine.low %v2312_v54, %v2344_v13 }
 0x238   :  { %12639 = vst [vmem:[#allocation71_spill] sm:$0xff] %v9163_v15  ;;  %12640 = vst [vmem:[#allocation58_spill] sm:$0xff] %v9165_v50  ;;  %v2623_v43 = vcombine.low %v2584_v0, %v2616_v30 }
 0x239   :  { %3295 = vrot.lane.b32.xlu1 %v2350_v59, %s6999_s4  ;;  %3357 = vrot.lane.b32.xlu0 %v2216_v19, %s7001_s6 }
 0x23b   :  { %v9173_v63 = vpop.permute.xlu1 %3071  ;;  %v9175_v21 = vpop.permute.xlu0 %3133 }
 0x23c   :  { %12641 = vst [vmem:[#allocation51_spill] sm:$0xff] %v9173_v63  ;;  %12642 = vst [vmem:[#allocation61_spill] sm:$0xff] %v9175_v21 }
 0x23d   :  { %3299 = vrot.lane.b32.xlu1 %v2622_v23, %s6999_s4  ;;  %3361 = vrot.lane.b32.xlu0 %v2488_v1, %s7001_s6  ;;  %v2895_v23 = vcombine.low %v2856_v6, %v2888_v39  ;;  %v12656_v1 = vld [vmem:[#allocation8_spill] sm:$0xff] }
 0x23f   :  { %v9183_v14 = vpop.permute.xlu1 %3075  ;;  %v9185_v37 = vpop.permute.xlu0 %3137 }
 0x240   :  { %12643 = vst [vmem:[#allocation54_spill] sm:$0xff] %v9183_v14  ;;  %12644 = vst [vmem:[#allocation72_spill] sm:$0xff] %v9185_v37  ;;  %v12692_v14 = vld [vmem:[#allocation20_spill] sm:$0xff]  ;;  %v12772_v37 = vld [vmem:[#allocation70_spill] sm:$0xff] }
 0x241   :  { %3303 = vrot.lane.b32.xlu1 %v2894_v12, %s6999_s4  ;;  %3365 = vrot.lane.b32.xlu0 %v2760_v26, %s7001_s6  ;;  %v2080_v12 = vcombine.high %v2040_v32, %v2072_v38  ;;  %v12659_v26 = vld [vmem:[#allocation9_spill] sm:$0xff]  ;;  %v12665_v32 = vld [vmem:[#allocation11_spill] sm:$0xff] }
 0x243   :  { %v9197_v17 = vpop.permute.xlu1 %3079  ;;  %v9199_v42 = vpop.permute.xlu0 %3141 }
 0x244   :  { %12645 = vst [vmem:[#allocation64_spill] sm:$0xff] %v9197_v17  ;;  %12646 = vst [vmem:[#allocation75_spill] sm:$0xff] %v9199_v42  ;;  %v12680_v17 = vld [vmem:[#allocation16_spill] sm:$0xff] }
 0x245   :  { %3323 = vrot.lane.b32.xlu1 %v2079_v27, %s7000_s5  ;;  %3514 = vbcast.lane.b32.xlu0 %v12647_v5, 272  ;;  %v2352_v27 = vcombine.high %v2312_v54, %v2344_v13  ;;  %v12668_v54 = vld [vmem:[#allocation12_spill] sm:$0xff] }
 0x247   :  { %v9207_v52 = vpop.permute.xlu1 %3099  ;;  %v9209_v36 = vpop.permute.xlu0 %3161 }
 0x248   :  { %12648 = vst [vmem:[#allocation68_spill] sm:$0xff] %v9207_v52  ;;  %12649 = vst [vmem:[#allocation108_spill] sm:$0xff] %v9209_v36 }
 0x249   :  { %3327 = vrot.lane.b32.xlu1 %v2351_v9, %s7000_s5  ;;  %3522 = vbcast.lane.b32.xlu0 %v12650_v2, 272  ;;  %v12662_v9 = vld [vmem:[#allocation10_spill] sm:$0xff] }
 0x24b   :  { %v9215_v59 = vpop.permute.xlu1 %3103  ;;  %v9217_v19 = vpop.permute.xlu0 %3165 }
 0x24c   :  { %12651 = vst [vmem:[#allocation112_spill] sm:$0xff] %v9215_v59  ;;  %12652 = vst [vmem:[#allocation121_spill] sm:$0xff] %v9217_v19 }
 0x24d   :  { %3331 = vrot.lane.b32.xlu1 %v2623_v43, %s7000_s5  ;;  %3530 = vbcast.lane.b32.xlu0 %v12653_v10, 272  ;;  %v2624_v43 = vcombine.high %v2584_v0, %v2616_v30  ;;  %v12671_v0 = vld [vmem:[#allocation13_spill] sm:$0xff] }
 0x24f   :  { %v9223_v22 = vpop.permute.xlu1 %3107  ;;  %v9225_v20 = vpop.permute.xlu0 %3169 }
 0x250   :  { %12654 = vst [vmem:[#allocation119_spill] sm:$0xff] %v9223_v22  ;;  %12655 = vst [vmem:[#allocation123_spill] sm:$0xff] %v9225_v20  ;;  %v12770_v20 = vld [vmem:[#allocation67_spill] sm:$0xff] }
 0x251   :  { %3335 = vrot.lane.b32.xlu1 %v2895_v23, %s7000_s5  ;;  %3538 = vbcast.lane.b32.xlu0 %v12656_v1, 272 }
 0x253   :  { %v9229_v33 = vpop.permute.xlu1 %3111  ;;  %v9231_v16 = vpop.permute.xlu0 %3173 }
 0x254   :  { %12657 = vst [vmem:[#allocation120_spill] sm:$0xff] %v9229_v33  ;;  %12658 = vst [vmem:[#allocation143_spill] sm:$0xff] %v9231_v16  ;;  %v12674_v33 = vld [vmem:[#allocation14_spill] sm:$0xff] }
 0x255   :  { %3355 = vrot.lane.b32.xlu1 %v2080_v12, %s7001_s6  ;;  %3546 = vbcast.lane.b32.xlu0 %v12659_v26, 272  ;;  %v2896_v12 = vcombine.high %v2856_v6, %v2888_v39 }
 0x257   :  { %v9235_v35 = vpop.permute.xlu1 %3131  ;;  %v9237_v7 = vpop.permute.xlu0 %3193 }
 0x258   :  { %12660 = vst [vmem:[#allocation144_spill] sm:$0xff] %v9235_v35  ;;  %12661 = vst [vmem:[#allocation153_spill] sm:$0xff] %v9237_v7 }
 0x259   :  { %3359 = vrot.lane.b32.xlu1 %v2352_v27, %s7001_s6  ;;  %3554 = vbcast.lane.b32.xlu0 %v12662_v9, 272 }
 0x25b   :  { %v9241_v8 = vpop.permute.xlu1 %3135  ;;  %v9243_v47 = vpop.permute.xlu0 %3197 }
 0x25c   :  { %12663 = vst [vmem:[#allocation151_spill] sm:$0xff] %v9241_v8  ;;  %12664 = vst [vmem:[#allocation152_spill] sm:$0xff] %v9243_v47  ;;  %v12764_v47 = vld [vmem:[#allocation62_spill] sm:$0xff] }
 0x25d   :  { %3363 = vrot.lane.b32.xlu1 %v2624_v43, %s7001_s6  ;;  %3562 = vbcast.lane.b32.xlu0 %v12665_v32, 272 }
 0x25f   :  { %v9247_v38 = vpop.permute.xlu1 %3139  ;;  %v9249_v23 = vpop.permute.xlu0 %3201 }
 0x260   :  { %12666 = vst [vmem:[#allocation99_spill] sm:$0xff] %v9247_v38  ;;  %12667 = vst [vmem:[#allocation63_spill] sm:$0xff] %v9249_v23  ;;  %v12683_v38 = vld [vmem:[#allocation17_spill] sm:$0xff] }
 0x261   :  { %3367 = vrot.lane.b32.xlu1 %v2896_v12, %s7001_s6  ;;  %3570 = vbcast.lane.b32.xlu0 %v12668_v54, 272  ;;  %v12677_v12 = vld [vmem:[#allocation15_spill] sm:$0xff] }
 0x263   :  { %v9253_v13 = vpop.permute.xlu1 %3143  ;;  %v9255_v27 = vpop.permute.xlu0 %3205 }
 0x264   :  { %12669 = vst [vmem:[#allocation89_spill] sm:$0xff] %v9253_v13  ;;  %12670 = vst [vmem:[#allocation107_spill] sm:$0xff] %v9255_v27 }
 0x265   :  { %3518 = vbcast.lane.b32.xlu1 %v12647_v5, 280  ;;  %3578 = vbcast.lane.b32.xlu0 %v12671_v0, 272 }
 0x267   :  { %v9259_v30 = vpop.permute.xlu1 %3163  ;;  %v9261_v43 = vpop.permute.xlu0 %3225 }
 0x268   :  { %12672 = vst [vmem:[#allocation129_spill] sm:$0xff] %v9259_v30  ;;  %12673 = vst [vmem:[#allocation105_spill] sm:$0xff] %v9261_v43 }
 0x269   :  { %3526 = vbcast.lane.b32.xlu1 %v12650_v2, 280  ;;  %3586 = vbcast.lane.b32.xlu0 %v12674_v33, 272 }
 0x26b   :  { %v9265_v6 = vpop.permute.xlu1 %3167  ;;  %v9267_v39 = vpop.permute.xlu0 %3229 }
 0x26c   :  { %12675 = vst [vmem:[#allocation6_spill] sm:$0xff] %v9265_v6  ;;  %12676 = vst [vmem:[#allocation5_spill] sm:$0xff] %v9267_v39 }
 0x26d   :  { %3534 = vbcast.lane.b32.xlu1 %v12653_v10, 280  ;;  %3594 = vbcast.lane.b32.xlu0 %v12677_v12, 272 }
 0x26f   :  { %v9271_v13 = vpop.permute.xlu1 %3171  ;;  %v9273_v5 = vpop.permute.xlu0 %3233 }
 0x270   :  { %12678 = vst [vmem:[#allocation7_spill] sm:$0xff] %v9271_v13  ;;  %12679 = vst [vmem:[#allocation8_spill] sm:$0xff] %v9273_v5  ;;  %v12686_v13 = vld [vmem:[#allocation18_spill] sm:$0xff] }
 0x271   :  { %3542 = vbcast.lane.b32.xlu1 %v12656_v1, 280  ;;  %3602 = vbcast.lane.b32.xlu0 %v12680_v17, 272 }
 0x273   :  { %v9277_v53 = vpop.permute.xlu1 %3175  ;;  %v9279_v2 = vpop.permute.xlu0 %3237 }
 0x274   :  { %12681 = vst [vmem:[#allocation9_spill] sm:$0xff] %v9277_v53  ;;  %12682 = vst [vmem:[#allocation10_spill] sm:$0xff] %v9279_v2  ;;  %v12689_v53 = vld [vmem:[#allocation19_spill] sm:$0xff] }
 0x275   :  { %3550 = vbcast.lane.b32.xlu1 %v12659_v26, 280  ;;  %3610 = vbcast.lane.b32.xlu0 %v12683_v38, 272 }
 0x277   :  { %v9283_v58 = vpop.permute.xlu1 %3195  ;;  %v9285_v10 = vpop.permute.xlu0 %3257 }
 0x278   :  { %12684 = vst [vmem:[#allocation11_spill] sm:$0xff] %v9283_v58  ;;  %12685 = vst [vmem:[#allocation12_spill] sm:$0xff] %v9285_v10 }
 0x279   :  { %3558 = vbcast.lane.b32.xlu1 %v12662_v9, 280  ;;  %3618 = vbcast.lane.b32.xlu0 %v12686_v13, 272 }
 0x27b   :  { %v9289_v22 = vpop.permute.xlu1 %3199  ;;  %v9291_v1 = vpop.permute.xlu0 %3261 }
 0x27c   :  { %12687 = vst [vmem:[#allocation13_spill] sm:$0xff] %v9289_v22  ;;  %12688 = vst [vmem:[#allocation14_spill] sm:$0xff] %v9291_v1  ;;  %v12695_v22 = vld [vmem:[#allocation21_spill] sm:$0xff]  ;;  %v12750_v1 = vld [vmem:[#allocation50_spill] sm:$0xff] }
 0x27d   :  { %3566 = vbcast.lane.b32.xlu1 %v12665_v32, 280  ;;  %3626 = vbcast.lane.b32.xlu0 %v12689_v53, 272 }
 0x27f   :  { %v9295_v6 = vpop.permute.xlu1 %3203  ;;  %v9297_v26 = vpop.permute.xlu0 %3265 }
 0x280   :  { %12690 = vst [vmem:[#allocation15_spill] sm:$0xff] %v9295_v6  ;;  %12691 = vst [vmem:[#allocation16_spill] sm:$0xff] %v9297_v26  ;;  %v12698_v6 = vld [vmem:[#allocation22_spill] sm:$0xff] }
 0x281   :  { %3574 = vbcast.lane.b32.xlu1 %v12668_v54, 280  ;;  %3634 = vbcast.lane.b32.xlu0 %v12692_v14, 272 }
 0x283   :  { %v9301_v8 = vpop.permute.xlu1 %3207  ;;  %v9303_v9 = vpop.permute.xlu0 %3269 }
 0x284   :  { %12693 = vst [vmem:[#allocation17_spill] sm:$0xff] %v9301_v8  ;;  %12694 = vst [vmem:[#allocation18_spill] sm:$0xff] %v9303_v9  ;;  %v12701_v8 = vld [vmem:[#allocation23_spill] sm:$0xff]  ;;  %v12739_v9 = vld [vmem:[#allocation40_spill] sm:$0xff] }
 0x285   :  { %3582 = vbcast.lane.b32.xlu1 %v12671_v0, 280  ;;  %3642 = vbcast.lane.b32.xlu0 %v12695_v22, 272 }
 0x287   :  { %v9307_v55 = vpop.permute.xlu1 %3227  ;;  %v9309_v32 = vpop.permute.xlu0 %3289 }
 0x288   :  { %12696 = vst [vmem:[#allocation19_spill] sm:$0xff] %v9307_v55  ;;  %12697 = vst [vmem:[#allocation20_spill] sm:$0xff] %v9309_v32  ;;  %v12704_v55 = vld [vmem:[#allocation24_spill] sm:$0xff] }
 0x289   :  { %3590 = vbcast.lane.b32.xlu1 %v12674_v33, 280  ;;  %3650 = vbcast.lane.b32.xlu0 %v12698_v6, 272 }
 0x28b   :  { %v9313_v59 = vpop.permute.xlu1 %3231  ;;  %v9315_v54 = vpop.permute.xlu0 %3293 }
 0x28c   :  { %12699 = vst [vmem:[#allocation21_spill] sm:$0xff] %v9313_v59  ;;  %12700 = vst [vmem:[#allocation22_spill] sm:$0xff] %v9315_v54  ;;  %v12707_v59 = vld [vmem:[#allocation25_spill] sm:$0xff] }
 0x28d   :  { %3598 = vbcast.lane.b32.xlu1 %v12677_v12, 280  ;;  %3658 = vbcast.lane.b32.xlu0 %v12701_v8, 272 }
 0x28f   :  { %v9319_v58 = vpop.permute.xlu1 %3235  ;;  %v9321_v0 = vpop.permute.xlu0 %3297 }
 0x290   :  { %12702 = vst [vmem:[#allocation23_spill] sm:$0xff] %v9319_v58  ;;  %12703 = vst [vmem:[#allocation159_spill] sm:$0xff] %v9321_v0  ;;  %v12710_v58 = vld [vmem:[#allocation26_spill] sm:$0xff] }
 0x291   :  { %3606 = vbcast.lane.b32.xlu1 %v12680_v17, 280  ;;  %3666 = vbcast.lane.b32.xlu0 %v12704_v55, 272 }
 0x293   :  { %v9325_v63 = vpop.permute.xlu1 %3239  ;;  %v9327_v33 = vpop.permute.xlu0 %3301 }
 0x294   :  { %12705 = vst [vmem:[#allocation24_spill] sm:$0xff] %v9325_v63  ;;  %12706 = vst [vmem:[#allocation160_spill] sm:$0xff] %v9327_v33  ;;  %v12713_v63 = vld [vmem:[#allocation27_spill] sm:$0xff] }
 0x295   :  { %3614 = vbcast.lane.b32.xlu1 %v12683_v38, 280  ;;  %3674 = vbcast.lane.b32.xlu0 %v12707_v59, 272 }
 0x297   :  { %v9331_v31 = vpop.permute.xlu1 %3259  ;;  %v9333_v12 = vpop.permute.xlu0 %3321 }
 0x298   :  { %12708 = vst [vmem:[#allocation25_spill] sm:$0xff] %v9331_v31  ;;  %12709 = vst [vmem:[#allocation161_spill] sm:$0xff] %v9333_v12  ;;  %v12716_v31 = vld [vmem:[#allocation28_spill] sm:$0xff] }
 0x299   :  { %3622 = vbcast.lane.b32.xlu1 %v12686_v13, 280  ;;  %3682 = vbcast.lane.b32.xlu0 %v12710_v58, 272 }
 0x29b   :  { %v9337_v30 = vpop.permute.xlu1 %3263  ;;  %v9339_v17 = vpop.permute.xlu0 %3325 }
 0x29c   :  { %12711 = vst [vmem:[#allocation26_spill] sm:$0xff] %v9337_v30  ;;  %12712 = vst [vmem:[#allocation162_spill] sm:$0xff] %v9339_v17  ;;  %v12719_v30 = vld [vmem:[#allocation29_spill] sm:$0xff] }
 0x29d   :  { %3630 = vbcast.lane.b32.xlu1 %v12689_v53, 280  ;;  %3690 = vbcast.lane.b32.xlu0 %v12713_v63, 272 }
 0x29f   :  { %v9343_v49 = vpop.permute.xlu1 %3267  ;;  %v9345_v38 = vpop.permute.xlu0 %3329 }
 0x2a0   :  { %12714 = vst [vmem:[#allocation27_spill] sm:$0xff] %v9343_v49  ;;  %12715 = vst [vmem:[#allocation163_spill] sm:$0xff] %v9345_v38  ;;  %v12722_v49 = vld [vmem:[#allocation30_spill] sm:$0xff] }
 0x2a1   :  { %3638 = vbcast.lane.b32.xlu1 %v12692_v14, 280  ;;  %3698 = vbcast.lane.b32.xlu0 %v12716_v31, 272 }
 0x2a3   :  { %v9349_v35 = vpop.permute.xlu1 %3271  ;;  %v9351_v13 = vpop.permute.xlu0 %3333 }
 0x2a4   :  { %12717 = vst [vmem:[#allocation28_spill] sm:$0xff] %v9349_v35  ;;  %12718 = vst [vmem:[#allocation164_spill] sm:$0xff] %v9351_v13  ;;  %v12725_v35 = vld [vmem:[#allocation31_spill] sm:$0xff] }
 0x2a5   :  { %3646 = vbcast.lane.b32.xlu1 %v12695_v22, 280  ;;  %3706 = vbcast.lane.b32.xlu0 %v12719_v30, 272 }
 0x2a7   :  { %v9355_v44 = vpop.permute.xlu1 %3291  ;;  %v9357_v53 = vpop.permute.xlu0 %3353 }
 0x2a8   :  { %12720 = vst [vmem:[#allocation29_spill] sm:$0xff] %v9355_v44  ;;  %12721 = vst [vmem:[#allocation165_spill] sm:$0xff] %v9357_v53  ;;  %v12728_v44 = vld [vmem:[#allocation32_spill] sm:$0xff] }
 0x2a9   :  { %3654 = vbcast.lane.b32.xlu1 %v12698_v6, 280  ;;  %3714 = vbcast.lane.b32.xlu0 %v12722_v49, 272  ;;  %v12747_v53 = vld [vmem:[#allocation48_spill] sm:$0xff] }
 0x2ab   :  { %v9361_v52 = vpop.permute.xlu1 %3295  ;;  %v9363_v14 = vpop.permute.xlu0 %3357 }
 0x2ac   :  { %12723 = vst [vmem:[#allocation30_spill] sm:$0xff] %v9361_v52  ;;  %12724 = vst [vmem:[#allocation166_spill] sm:$0xff] %v9363_v14  ;;  %v12731_v52 = vld [vmem:[#allocation33_spill] sm:$0xff] }
 0x2ad   :  { %3662 = vbcast.lane.b32.xlu1 %v12701_v8, 280  ;;  %3722 = vbcast.lane.b32.xlu0 %v12725_v35, 272 }
 0x2af   :  { %v9367_v15 = vpop.permute.xlu1 %3299  ;;  %v9369_v22 = vpop.permute.xlu0 %3361 }
 0x2b0   :  { %12726 = vst [vmem:[#allocation31_spill] sm:$0xff] %v9367_v15  ;;  %12727 = vst [vmem:[#allocation167_spill] sm:$0xff] %v9369_v22  ;;  %v12733_v15 = vld [vmem:[#allocation34_spill] sm:$0xff] }
 0x2b1   :  { %3670 = vbcast.lane.b32.xlu1 %v12704_v55, 280  ;;  %3730 = vbcast.lane.b32.xlu0 %v12728_v44, 272 }
 0x2b3   :  { %v9373_v51 = vpop.permute.xlu1 %3303  ;;  %v9375_v6 = vpop.permute.xlu0 %3365 }
 0x2b4   :  { %12729 = vst [vmem:[#allocation32_spill] sm:$0xff] %v9373_v51  ;;  %12730 = vst [vmem:[#allocation168_spill] sm:$0xff] %v9375_v6  ;;  %v12735_v51 = vld [vmem:[#allocation35_spill] sm:$0xff] }
 0x2b5   :  { %3678 = vbcast.lane.b32.xlu1 %v12707_v59, 280  ;;  %3738 = vbcast.lane.b32.xlu0 %v12731_v52, 272 }
 0x2b7   :  { %v9379_v62 = vpop.permute.xlu1 %3323  ;;  %v9381_v8 = vpop.permute.xlu0 %3514 }
 0x2b8   :  { %12732 = vst [vmem:[#allocation33_spill] sm:$0xff] %v9379_v62  ;;  %v12737_v62 = vld [vmem:[#allocation38_spill] sm:$0xff] }
 0x2b9   :  { %3686 = vbcast.lane.b32.xlu1 %v12710_v58, 280  ;;  %3746 = vbcast.lane.b32.xlu0 %v12733_v15, 272 }
 0x2bb   :  { %v9385_v13 = vpop.permute.xlu1 %3327  ;;  %v9387_v55 = vpop.permute.xlu0 %3522 }
 0x2bc   :  { %12734 = vst [vmem:[#allocation34_spill] sm:$0xff] %v9385_v13 }
 0x2bd   :  { %3694 = vbcast.lane.b32.xlu1 %v12713_v63, 280  ;;  %3754 = vbcast.lane.b32.xlu0 %v12735_v51, 272 }
 0x2bf   :  { %v9391_v6 = vpop.permute.xlu1 %3331  ;;  %v9393_v59 = vpop.permute.xlu0 %3530 }
 0x2c0   :  { %12736 = vst [vmem:[#allocation35_spill] sm:$0xff] %v9391_v6  ;;  %v4024_v58 = vcombine.low %v9381_v8, %v9393_v59 }
 0x2c1   :  { %3702 = vbcast.lane.b32.xlu1 %v12716_v31, 280  ;;  %3762 = vbcast.lane.b32.xlu0 %v12737_v62, 272 }
 0x2c2   :  { %v4032_v6 = vrot.slane %v4024_v58, %v7234_v57 }
 0x2c3   :  { %v9399_v33 = vpop.permute.xlu1 %3335  ;;  %v9401_v13 = vpop.permute.xlu0 %3538 }
 0x2c4   :  { %12738 = vst [vmem:[#allocation38_spill] sm:$0xff] %v9399_v33  ;;  %v4040_v63 = vcombine.low %v9387_v55, %v9401_v13  ;;  %v12741_v33 = vld [vmem:[#allocation42_spill] sm:$0xff] }
 0x2c5   :  { %3710 = vbcast.lane.b32.xlu1 %v12719_v30, 280  ;;  %3770 = vbcast.lane.b32.xlu0 %v12739_v9, 272  ;;  %v12743_v30 = vld [vmem:[#allocation44_spill] sm:$0xff] }
 0x2c6   :  { %v4048_v31 = vrot.slane %v4040_v63, %v7234_v57 }
 0x2c7   :  { %v9409_v22 = vpop.permute.xlu1 %3355  ;;  %v9411_v38 = vpop.permute.xlu0 %3546 }
 0x2c8   :  { %12740 = vst [vmem:[#allocation40_spill] sm:$0xff] %v9409_v22  ;;  %v4089_v0 = vcombine.high %v4032_v6, %v4048_v31  ;;  %v12745_v22 = vld [vmem:[#allocation46_spill] sm:$0xff] }
 0x2c9   :  { %3718 = vbcast.lane.b32.xlu1 %v12722_v49, 280  ;;  %3778 = vbcast.lane.b32.xlu0 %v12741_v33, 272 }
 0x2cb   :  { %v9415_v2 = vpop.permute.xlu1 %3359  ;;  %v9417_v14 = vpop.permute.xlu0 %3554 }
 0x2cc   :  { %12742 = vst [vmem:[#allocation42_spill] sm:$0xff] %v9415_v2 }
 0x2cd   :  { %3726 = vbcast.lane.b32.xlu1 %v12725_v35, 280  ;;  %3786 = vbcast.lane.b32.xlu0 %v12743_v30, 272 }
 0x2cf   :  { %v9421_v58 = vpop.permute.xlu1 %3363  ;;  %v9423_v63 = vpop.permute.xlu0 %3562 }
 0x2d0   :  { %12744 = vst [vmem:[#allocation44_spill] sm:$0xff] %v9421_v58  ;;  %v4056_v49 = vcombine.low %v9411_v38, %v9423_v63  ;;  %v4088_v58 = vcombine.low %v4032_v6, %v4048_v31  ;;  %v9452_v6 = vrot.slane %v4089_v0, %v7293_v61  ;;  %v12755_v0 = vld [vmem:[#allocation53_spill] sm:$0xff] }
 0x2d1   :  { %3734 = vbcast.lane.b32.xlu1 %v12728_v44, 280  ;;  %3794 = vbcast.lane.b32.xlu0 %v12745_v22, 272 }
 0x2d2   :  { %v4064_v12 = vrot.slane %v4056_v49, %v7234_v57  ;;  %v9446_v10 = vrot.slane %v4088_v58, %v7293_v61 }
 0x2d3   :  { %v9429_v17 = vpop.permute.xlu1 %3367  ;;  %v9431_v2 = vpop.permute.xlu0 %3570 }
 0x2d4   :  { %12746 = vst [vmem:[#allocation46_spill] sm:$0xff] %v9429_v17  ;;  %v4072_v35 = vcombine.low %v9417_v14, %v9431_v2  ;;  %12751 = vst [vmem:[#allocation50_spill] sm:$0xff] %v9446_v10 }
 0x2d5   :  { %3742 = vbcast.lane.b32.xlu1 %v12731_v52, 280  ;;  %3802 = vbcast.lane.b32.xlu0 %v12747_v53, 272 }
 0x2d6   :  { %v4080_v44 = vrot.slane %v4072_v35, %v7234_v57 }
 0x2d7   :  { %v9439_v54 = vpop.permute.xlu1 %3518  ;;  %v9441_v32 = vpop.permute.xlu0 %3578 }
 0x2d8   :  { %12748 = vst [vmem:[#allocation48_spill] sm:$0xff] %v9439_v54  ;;  %12749 = vst [vmem:[#allocation169_spill] sm:$0xff] %v9441_v32  ;;  %v4120_v26 = vcombine.low %v4064_v12, %v4080_v44  ;;  %v4121_v17 = vcombine.high %v4064_v12, %v4080_v44  ;;  %v12758_v44 = vld [vmem:[#allocation57_spill] sm:$0xff] }
 0x2d9   :  { %3750 = vbcast.lane.b32.xlu1 %v12733_v15, 280  ;;  %3810 = vbcast.lane.b32.xlu0 %v12750_v1, 272  ;;  %v12816_v54 = vld [vmem:[#allocation109_spill] sm:$0xff] }
 0x2da   :  { %v9449_v52 = vrot.slane %v4120_v26, %v7293_v61  ;;  %v9455_v31 = vrot.slane %v4121_v17, %v7293_v61  ;;  %v12761_v26 = vld [vmem:[#allocation60_spill] sm:$0xff] }
 0x2db   :  { %v9457_v49 = vpop.permute.xlu1 %3526  ;;  %v9459_v35 = vpop.permute.xlu0 %3586 }
 0x2dc   :  { %12752 = vst [vmem:[#allocation170_spill] sm:$0xff] %v9449_v52  ;;  %12753 = vst [vmem:[#allocation171_spill] sm:$0xff] %v9457_v49 }
 0x2dd   :  { %12754 = vst [vmem:[#allocation172_spill] sm:$0xff] %v9459_v35  ;;  %3758 = vbcast.lane.b32.xlu1 %v12735_v51, 280  ;;  %3818 = vbcast.lane.b32.xlu0 %v12755_v0, 272 }
 0x2df   :  { %v9469_v58 = vpop.permute.xlu1 %3534  ;;  %v9471_v17 = vpop.permute.xlu0 %3594 }
 0x2e0   :  { %12756 = vst [vmem:[#allocation53_spill] sm:$0xff] %v9469_v58  ;;  %12757 = vst [vmem:[#allocation173_spill] sm:$0xff] %v9471_v17  ;;  %v4160_v15 = vcombine.low %v9441_v32, %v9471_v17 }
 0x2e1   :  { %3766 = vbcast.lane.b32.xlu1 %v12737_v62, 280  ;;  %3826 = vbcast.lane.b32.xlu0 %v12758_v44, 272 }
 0x2e2   :  { %v4168_v62 = vrot.slane %v4160_v15, %v7234_v57 }
 0x2e3   :  { %v9477_v5 = vpop.permute.xlu1 %3542  ;;  %v9479_v12 = vpop.permute.xlu0 %3602 }
 0x2e4   :  { %12759 = vst [vmem:[#allocation57_spill] sm:$0xff] %v9477_v5  ;;  %12760 = vst [vmem:[#allocation174_spill] sm:$0xff] %v9479_v12  ;;  %v4176_v51 = vcombine.low %v9459_v35, %v9479_v12 }
 0x2e5   :  { %3774 = vbcast.lane.b32.xlu1 %v12739_v9, 280  ;;  %3834 = vbcast.lane.b32.xlu0 %v12761_v26, 272  ;;  %v12767_v9 = vld [vmem:[#allocation65_spill] sm:$0xff] }
 0x2e6   :  { %v4184_v39 = vrot.slane %v4176_v51, %v7234_v57 }
 0x2e7   :  { %v9487_v43 = vpop.permute.xlu1 %3550  ;;  %v9489_v27 = vpop.permute.xlu0 %3610 }
 0x2e8   :  { %12762 = vst [vmem:[#allocation60_spill] sm:$0xff] %v9487_v43  ;;  %12763 = vst [vmem:[#allocation175_spill] sm:$0xff] %v9489_v27  ;;  %v4225_v23 = vcombine.high %v4168_v62, %v4184_v39  ;;  %v4224_v21 = vcombine.low %v4168_v62, %v4184_v39 }
 0x2e9   :  { %3782 = vbcast.lane.b32.xlu1 %v12741_v33, 280  ;;  %3842 = vbcast.lane.b32.xlu0 %v12764_v47, 272 }
 0x2ea   :  { %v9534_v62 = vrot.slane %v4225_v23, %v7293_v61 }
 0x2eb   :  { %v9493_v7 = vpop.permute.xlu1 %3558  ;;  %v9495_v16 = vpop.permute.xlu0 %3618 }
 0x2ec   :  { %12765 = vst [vmem:[#allocation62_spill] sm:$0xff] %v9493_v7  ;;  %12766 = vst [vmem:[#allocation176_spill] sm:$0xff] %v9495_v16 }
 0x2ed   :  { %3790 = vbcast.lane.b32.xlu1 %v12743_v30, 280  ;;  %3850 = vbcast.lane.b32.xlu0 %v12767_v9, 272 }
 0x2ef   :  { %v9499_v51 = vpop.permute.xlu1 %3566  ;;  %v9501_v15 = vpop.permute.xlu0 %3626 }
 0x2f0   :  { %12768 = vst [vmem:[#allocation65_spill] sm:$0xff] %v9499_v51  ;;  %12769 = vst [vmem:[#allocation177_spill] sm:$0xff] %v9501_v15  ;;  %v4192_v33 = vcombine.low %v9489_v27, %v9501_v15 }
 0x2f1   :  { %3798 = vbcast.lane.b32.xlu1 %v12745_v22, 280  ;;  %3858 = vbcast.lane.b32.xlu0 %v12770_v20, 272 }
 0x2f2   :  { %v4200_v22 = vrot.slane %v4192_v33, %v7234_v57 }
 0x2f3   :  { %v9507_v19 = vpop.permute.xlu1 %3574  ;;  %v9509_v36 = vpop.permute.xlu0 %3634 }
 0x2f4   :  { %12771 = vst [vmem:[#allocation67_spill] sm:$0xff] %v9507_v19  ;;  %v4208_v30 = vcombine.low %v9495_v16, %v9509_v36 }
 0x2f5   :  { %3806 = vbcast.lane.b32.xlu1 %v12747_v53, 280  ;;  %3866 = vbcast.lane.b32.xlu0 %v12772_v37, 272 }
 0x2f6   :  { %v4216_v42 = vrot.slane %v4208_v30, %v7234_v57  ;;  %v9528_v30 = vrot.slane %v4224_v21, %v7293_v61 }
 0x2f7   :  { %v9517_v50 = vpop.permute.xlu1 %3582  ;;  %v9519_v28 = vpop.permute.xlu0 %3642 }
 0x2f8   :  { %12773 = vst [vmem:[#allocation70_spill] sm:$0xff] %v9517_v50  ;;  %v4256_v29 = vcombine.low %v4200_v22, %v4216_v42  ;;  %v4257_v18 = vcombine.high %v4200_v22, %v4216_v42  ;;  %12776 = vst [vmem:[#allocation178_spill] sm:$0xff] %v9528_v30  ;;  %v12778_v22 = vld [vmem:[#allocation74_spill] sm:$0xff] }
 0x2f9   :  { %3814 = vbcast.lane.b32.xlu1 %v12750_v1, 280  ;;  %3874 = vbcast.lane.b32.xlu0 %v12774_v3, 272 }
 0x2fa   :  { %v9531_v39 = vrot.slane %v4256_v29, %v7293_v61  ;;  %v9537_v33 = vrot.slane %v4257_v18, %v7293_v61  ;;  %v12780_v18 = vld [vmem:[#allocation78_spill] sm:$0xff] }
 0x2fb   :  { %v9523_v56 = vpop.permute.xlu1 %3590  ;;  %v9525_v53 = vpop.permute.xlu0 %3650 }
 0x2fc   :  { %12775 = vst [vmem:[#allocation73_spill] sm:$0xff] %v9523_v56  ;;  %12777 = vst [vmem:[#allocation179_spill] sm:$0xff] %v9531_v39 }
 0x2fd   :  { %3822 = vbcast.lane.b32.xlu1 %v12755_v0, 280  ;;  %3882 = vbcast.lane.b32.xlu0 %v12778_v22, 272 }
 0x2ff   :  { %v9547_v29 = vpop.permute.xlu1 %3598  ;;  %v9549_v23 = vpop.permute.xlu0 %3658 }
 0x300   :  { %12779 = vst [vmem:[#allocation74_spill] sm:$0xff] %v9547_v29  ;;  %v4296_v0 = vcombine.low %v9519_v28, %v9549_v23  ;;  %v12793_v29 = vld [vmem:[#allocation88_spill] sm:$0xff] }
 0x301   :  { %3830 = vbcast.lane.b32.xlu1 %v12758_v44, 280  ;;  %3890 = vbcast.lane.b32.xlu0 %v12780_v18, 272 }
 0x302   :  { %v4304_v44 = vrot.slane %v4296_v0, %v7234_v57 }
 0x303   :  { %v9555_v42 = vpop.permute.xlu1 %3606  ;;  %v9557_v34 = vpop.permute.xlu0 %3666 }
 0x304   :  { %12781 = vst [vmem:[#allocation78_spill] sm:$0xff] %v9555_v42  ;;  %v4312_v21 = vcombine.low %v9525_v53, %v9557_v34 }
 0x305   :  { %3838 = vbcast.lane.b32.xlu1 %v12761_v26, 280  ;;  %3898 = vbcast.lane.b32.xlu0 %v12782_v60, 272  ;;  %v12786_v26 = vld [vmem:[#allocation83_spill] sm:$0xff] }
 0x306   :  { %v4320_v1 = vrot.slane %v4312_v21, %v7234_v57 }
 0x307   :  { %v9565_v46 = vpop.permute.xlu1 %3614  ;;  %v9567_v25 = vpop.permute.xlu0 %3674 }
 0x308   :  { %12783 = vst [vmem:[#allocation80_spill] sm:$0xff] %v9565_v46  ;;  %v4361_v41 = vcombine.high %v4304_v44, %v4320_v1  ;;  %v12790_v46 = vld [vmem:[#allocation86_spill] sm:$0xff] }
 0x309   :  { %3846 = vbcast.lane.b32.xlu1 %v12764_v47, 280  ;;  %3906 = vbcast.lane.b32.xlu0 %v12784_v48, 272 }
 0x30b   :  { %v9571_v45 = vpop.permute.xlu1 %3622  ;;  %v9573_v4 = vpop.permute.xlu0 %3682 }
 0x30c   :  { %12785 = vst [vmem:[#allocation81_spill] sm:$0xff] %v9571_v45 }
 0x30d   :  { %3854 = vbcast.lane.b32.xlu1 %v12767_v9, 280  ;;  %3914 = vbcast.lane.b32.xlu0 %v12786_v26, 272 }
 0x30f   :  { %v9577_v21 = vpop.permute.xlu1 %3630  ;;  %v9579_v0 = vpop.permute.xlu0 %3690 }
 0x310   :  { %12787 = vst [vmem:[#allocation83_spill] sm:$0xff] %v9577_v21  ;;  %v4328_v47 = vcombine.low %v9567_v25, %v9579_v0  ;;  %v4360_v21 = vcombine.low %v4304_v44, %v4320_v1  ;;  %v9612_v44 = vrot.slane %v4361_v41, %v7293_v61 }
 0x311   :  { %3862 = vbcast.lane.b32.xlu1 %v12770_v20, 280  ;;  %3922 = vbcast.lane.b32.xlu0 %v12788_v40, 272 }
 0x312   :  { %v4336_v20 = vrot.slane %v4328_v47, %v7234_v57 }
 0x313   :  { %v9585_v24 = vpop.permute.xlu1 %3638  ;;  %v9587_v11 = vpop.permute.xlu0 %3698 }
 0x314   :  { %12789 = vst [vmem:[#allocation85_spill] sm:$0xff] %v9585_v24  ;;  %v4344_v9 = vcombine.low %v9573_v4, %v9587_v11 }
 0x315   :  { %3870 = vbcast.lane.b32.xlu1 %v12772_v37, 280  ;;  %3930 = vbcast.lane.b32.xlu0 %v12790_v46, 272 }
 0x316   :  { %v4352_v45 = vrot.slane %v4344_v9, %v7234_v57  ;;  %v9606_v9 = vrot.slane %v4360_v21, %v7293_v61 }
 0x317   :  { %v9595_v56 = vpop.permute.xlu1 %3646  ;;  %v9597_v42 = vpop.permute.xlu0 %3706 }
 0x318   :  { %12791 = vst [vmem:[#allocation86_spill] sm:$0xff] %v9595_v56  ;;  %12792 = vst [vmem:[#allocation180_spill] sm:$0xff] %v9597_v42  ;;  %v4392_v50 = vcombine.low %v4336_v20, %v4352_v45  ;;  %v4393_v24 = vcombine.high %v4336_v20, %v4352_v45  ;;  %v12798_v20 = vld [vmem:[#allocation91_spill] sm:$0xff]  ;;  %v12804_v56 = vld [vmem:[#allocation98_spill] sm:$0xff] }
 0x319   :  { %3878 = vbcast.lane.b32.xlu1 %v12774_v3, 280  ;;  %3938 = vbcast.lane.b32.xlu0 %v12793_v29, 272  ;;  %12796 = vst [vmem:[#allocation182_spill] sm:$0xff] %v9606_v9 }
 0x31a   :  { %v9609_v1 = vrot.slane %v4392_v50, %v7293_v61  ;;  %v9615_v47 = vrot.slane %v4393_v24, %v7293_v61  ;;  %v12801_v24 = vld [vmem:[#allocation95_spill] sm:$0xff] }
 0x31b   :  { %v9601_v7 = vpop.permute.xlu1 %3654  ;;  %v9603_v37 = vpop.permute.xlu0 %3714 }
 0x31c   :  { %12794 = vst [vmem:[#allocation88_spill] sm:$0xff] %v9601_v7  ;;  %12795 = vst [vmem:[#allocation181_spill] sm:$0xff] %v9603_v37 }
 0x31d   :  { %12797 = vst [vmem:[#allocation183_spill] sm:$0xff] %v9609_v1  ;;  %3886 = vbcast.lane.b32.xlu1 %v12778_v22, 280  ;;  %3946 = vbcast.lane.b32.xlu0 %v12798_v20, 272 }
 0x31f   :  { %v9625_v50 = vpop.permute.xlu1 %3662  ;;  %v9627_v41 = vpop.permute.xlu0 %3722 }
 0x320   :  { %12799 = vst [vmem:[#allocation91_spill] sm:$0xff] %v9625_v50  ;;  %12800 = vst [vmem:[#allocation184_spill] sm:$0xff] %v9627_v41  ;;  %v4432_v22 = vcombine.low %v9597_v42, %v9627_v41 }
 0x321   :  { %3894 = vbcast.lane.b32.xlu1 %v12780_v18, 280  ;;  %3954 = vbcast.lane.b32.xlu0 %v12801_v24, 272 }
 0x322   :  { %v4440_v18 = vrot.slane %v4432_v22, %v7234_v57 }
 0x323   :  { %v9633_v45 = vpop.permute.xlu1 %3670  ;;  %v9635_v7 = vpop.permute.xlu0 %3730 }
 0x324   :  { %12802 = vst [vmem:[#allocation95_spill] sm:$0xff] %v9633_v45  ;;  %12803 = vst [vmem:[#allocation185_spill] sm:$0xff] %v9635_v7  ;;  %v4448_v21 = vcombine.low %v9603_v37, %v9635_v7  ;;  %v12807_v45 = vld [vmem:[#allocation101_spill] sm:$0xff]  ;;  %v4425_v7 = vcombine.high %v9606_v9, %v9609_v1 }
 0x325   :  { %3902 = vbcast.lane.b32.xlu1 %v12782_v60, 280  ;;  %3962 = vbcast.lane.b32.xlu0 %v12804_v56, 272  ;;  %v12810_v60 = vld [vmem:[#allocation103_spill] sm:$0xff] }
 0x326   :  { %v4456_v3 = vrot.slane %v4448_v21, %v7234_v57 }
 0x327   :  { %v9643_v50 = vpop.permute.xlu1 %3678  ;;  %v9645_v19 = vpop.permute.xlu0 %3738 }
 0x328   :  { %12805 = vst [vmem:[#allocation98_spill] sm:$0xff] %v9643_v50  ;;  %12806 = vst [vmem:[#allocation186_spill] sm:$0xff] %v9645_v19  ;;  %v4497_v43 = vcombine.high %v4440_v18, %v4456_v3  ;;  %v12813_v50 = vld [vmem:[#allocation106_spill] sm:$0xff]  ;;  %v4496_v58 = vcombine.low %v4440_v18, %v4456_v3 }
 0x329   :  { %3910 = vbcast.lane.b32.xlu1 %v12784_v48, 280  ;;  %3970 = vbcast.lane.b32.xlu0 %v12807_v45, 272 }
 0x32a   :  { %v9690_v18 = vrot.slane %v4497_v43, %v7293_v61 }
 0x32b   :  { %v9649_v51 = vpop.permute.xlu1 %3686  ;;  %v9651_v49 = vpop.permute.xlu0 %3746 }
 0x32c   :  { %12808 = vst [vmem:[#allocation101_spill] sm:$0xff] %v9649_v51  ;;  %12809 = vst [vmem:[#allocation187_spill] sm:$0xff] %v9651_v49 }
 0x32d   :  { %3918 = vbcast.lane.b32.xlu1 %v12786_v26, 280  ;;  %3978 = vbcast.lane.b32.xlu0 %v12810_v60, 272 }
 0x32f   :  { %v9655_v21 = vpop.permute.xlu1 %3694  ;;  %v9657_v22 = vpop.permute.xlu0 %3754 }
 0x330   :  { %12811 = vst [vmem:[#allocation103_spill] sm:$0xff] %v9655_v21  ;;  %12812 = vst [vmem:[#allocation188_spill] sm:$0xff] %v9657_v22  ;;  %v4464_v48 = vcombine.low %v9645_v19, %v9657_v22  ;;  %v12818_v22 = vld [vmem:[#allocation111_spill] sm:$0xff] }
 0x331   :  { %3926 = vbcast.lane.b32.xlu1 %v12788_v40, 280  ;;  %3986 = vbcast.lane.b32.xlu0 %v12813_v50, 272 }
 0x332   :  { %v4472_v40 = vrot.slane %v4464_v48, %v7234_v57 }
 0x333   :  { %v9663_v5 = vpop.permute.xlu1 %3702  ;;  %v9665_v51 = vpop.permute.xlu0 %3762 }
 0x334   :  { %12814 = vst [vmem:[#allocation106_spill] sm:$0xff] %v9663_v5  ;;  %12815 = vst [vmem:[#allocation189_spill] sm:$0xff] %v9665_v51  ;;  %v4480_v26 = vcombine.low %v9651_v49, %v9665_v51 }
 0x335   :  { %3934 = vbcast.lane.b32.xlu1 %v12790_v46, 280  ;;  %3994 = vbcast.lane.b32.xlu0 %v12816_v54, 272 }
 0x336   :  { %v4488_v21 = vrot.slane %v4480_v26, %v7234_v57  ;;  %v9684_v26 = vrot.slane %v4496_v58, %v7293_v61 }
 0x337   :  { %v9673_v42 = vpop.permute.xlu1 %3710  ;;  %v9675_v41 = vpop.permute.xlu0 %3770 }
 0x338   :  { %12817 = vst [vmem:[#allocation109_spill] sm:$0xff] %v9673_v42  ;;  %v4528_v19 = vcombine.low %v4472_v40, %v4488_v21  ;;  %v4529_v5 = vcombine.high %v4472_v40, %v4488_v21  ;;  %12820 = vst [vmem:[#allocation190_spill] sm:$0xff] %v9684_v26  ;;  %v12822_v40 = vld [vmem:[#allocation113_spill] sm:$0xff]  ;;  %v4153_v21 = vcombine.high %v9446_v10, %v9449_v52 }
 0x339   :  { %3942 = vbcast.lane.b32.xlu1 %v12793_v29, 280  ;;  %4002 = vbcast.lane.b32.xlu0 %v12818_v22, 272 }
 0x33a   :  { %v9687_v3 = vrot.slane %v4528_v19, %v7293_v61  ;;  %v9693_v48 = vrot.slane %v4529_v5, %v7293_v61  ;;  %v12824_v5 = vld [vmem:[#allocation117_spill] sm:$0xff] }
 0x33b   :  { %v9679_v37 = vpop.permute.xlu1 %3718  ;;  %v9681_v46 = vpop.permute.xlu0 %3778 }
 0x33c   :  { %12819 = vst [vmem:[#allocation111_spill] sm:$0xff] %v9679_v37  ;;  %12821 = vst [vmem:[#allocation191_spill] sm:$0xff] %v9687_v3 }
 0x33d   :  { %3950 = vbcast.lane.b32.xlu1 %v12798_v20, 280  ;;  %4010 = vbcast.lane.b32.xlu0 %v12822_v40, 272 }
 0x33f   :  { %v9703_v19 = vpop.permute.xlu1 %3726  ;;  %v9705_v43 = vpop.permute.xlu0 %3786 }
 0x340   :  { %12823 = vst [vmem:[#allocation113_spill] sm:$0xff] %v9703_v19  ;;  %v4568_v20 = vcombine.low %v9675_v41, %v9705_v43 }
 0x341   :  { %3958 = vbcast.lane.b32.xlu1 %v12801_v24, 280  ;;  %4018 = vbcast.lane.b32.xlu0 %v12824_v5, 272 }
 0x342   :  { %v4576_v24 = vrot.slane %v4568_v20, %v7234_v57 }
 0x343   :  { %v9711_v29 = vpop.permute.xlu0 %3794  ;;  %v9713_v37 = vpop.permute.xlu1 %3734 }
 0x344   :  { %12825 = vst [vmem:[#allocation117_spill] sm:$0xff] %v9713_v37  ;;  %v4584_v58 = vcombine.low %v9681_v46, %v9711_v29 }
 0x345   :  { %3966 = vbcast.lane.b32.xlu1 %v12804_v56, 280  ;;  %6208 = vrot.lane.b32.xlu0 %v4153_v21, %s6987_s0 }
 0x346   :  { %v4592_v42 = vrot.slane %v4584_v58, %v7234_v57 }
 0x347   :  { %v9723_v19 = vpop.permute.xlu0 %3802  ;;  %v9728_v49 = vpop.permute.xlu1 %3742 }
 0x348   :  { %v4633_v37 = vcombine.high %v4576_v24, %v4592_v42  ;;  %12826 = vst [vmem:[#allocation192_spill] sm:$0xff] %v9728_v49  ;;  %v4632_v1 = vcombine.low %v4576_v24, %v4592_v42 }
 0x349   :  { %3974 = vbcast.lane.b32.xlu1 %v12807_v45, 280  ;;  %6212 = vrot.lane.b32.xlu0 %v4425_v7, %s6987_s0 }
 0x34a   :  { %v9754_v49 = vrot.slane %v4632_v1, %v7293_v61 }
 0x34b   :  { %v9731_v52 = vpop.permute.xlu0 %3810  ;;  %v9736_v21 = vpop.permute.xlu1 %3750 }
 0x34c   :  { %12827 = vst [vmem:[#allocation193_spill] sm:$0xff] %v9736_v21  ;;  %12830 = vst [vmem:[#allocation196_spill] sm:$0xff] %v9754_v49 }
 0x34d   :  { %3982 = vbcast.lane.b32.xlu1 %v12810_v60, 280 }
 0x34f   :  { %v9734_v56 = vpop.permute.xlu0 %3818  ;;  %v9746_v7 = vpop.permute.xlu1 %3758 }
 0x350   :  { %v4600_v58 = vcombine.low %v9723_v19, %v9734_v56  ;;  %12828 = vst [vmem:[#allocation194_spill] sm:$0xff] %v9746_v7 }
 0x351   :  { %3990 = vbcast.lane.b32.xlu1 %v12813_v50, 280 }
 0x352   :  { %v4608_v9 = vrot.slane %v4600_v58, %v7234_v57 }
 0x353   :  { %v9741_v20 = vpop.permute.xlu0 %3826  ;;  %v9765_v42 = vpop.permute.xlu1 %3766 }
 0x354   :  { %v4616_v45 = vcombine.low %v9731_v52, %v9741_v20  ;;  %12832 = vst [vmem:[#allocation198_spill] sm:$0xff] %v9765_v42 }
 0x355   :  { %3998 = vbcast.lane.b32.xlu1 %v12816_v54, 280  ;;  %v9760_v54 = vrot.slane %v4633_v37, %v7293_v61 }
 0x356   :  { %v4624_v60 = vrot.slane %v4616_v45, %v7234_v57 }
 0x357   :  { %v9750_v10 = vpop.permute.xlu0 %3834  ;;  %v9782_v58 = vpop.permute.xlu1 %3774 }
 0x358   :  { %12829 = vst [vmem:[#allocation195_spill] sm:$0xff] %v9750_v10  ;;  %v4664_v50 = vcombine.low %v4608_v9, %v4624_v60  ;;  %v4665_v21 = vcombine.high %v4608_v9, %v4624_v60  ;;  %12835 = vst [vmem:[#allocation201_spill] sm:$0xff] %v9782_v58  ;;  %v4289_v60 = vcombine.high %v9528_v30, %v9531_v39 }
 0x359   :  { %4006 = vbcast.lane.b32.xlu1 %v12818_v22, 280 }
 0x35a   :  { %v9757_v51 = vrot.slane %v4664_v50, %v7293_v61  ;;  %v9763_v45 = vrot.slane %v4665_v21, %v7293_v61 }
 0x35b   :  { %v9767_v24 = vpop.permute.xlu0 %3842  ;;  %v9797_v1 = vpop.permute.xlu1 %3782 }
 0x35c   :  { %12831 = vst [vmem:[#allocation197_spill] sm:$0xff] %v9757_v51  ;;  %12833 = vst [vmem:[#allocation199_spill] sm:$0xff] %v9767_v24  ;;  %v4697_v9 = vcombine.high %v9754_v49, %v9757_v51 }
 0x35d   :  { %4014 = vbcast.lane.b32.xlu1 %v12822_v40, 280  ;;  %12837 = vst [vmem:[#allocation203_spill] sm:$0xff] %v9797_v1 }
 0x35e   :  { %6216 = vrot.lane.b32.xlu0 %v4697_v9, %s6987_s0 }
 0x35f   :  { %v9779_v21 = vpop.permute.xlu0 %3850  ;;  %v9804_v30 = vpop.permute.xlu1 %3790 }
 0x360   :  { %12834 = vst [vmem:[#allocation200_spill] sm:$0xff] %v9779_v21  ;;  %v4704_v40 = vcombine.low %v9750_v10, %v9779_v21  ;;  %12840 = vst [vmem:[#allocation206_spill] sm:$0xff] %v9804_v30 }
 0x361   :  { %4022 = vbcast.lane.b32.xlu1 %v12824_v5, 280  ;;  %v4561_v5 = vcombine.high %v9684_v26, %v9687_v3 }
 0x362   :  { %v4712_v9 = vrot.slane %v4704_v40, %v7234_v57 }
 0x363   :  { %v9788_v50 = vpop.permute.xlu0 %3858 }
 0x364   :  { %12836 = vst [vmem:[#allocation202_spill] sm:$0xff] %v9788_v50  ;;  %v4720_v22 = vcombine.low %v9767_v24, %v9788_v50 }
 0x365   :  { %6210 = vrot.lane.b32.xlu1 %v4289_v60, %s6987_s0 }
 0x366   :  { %v4728_v37 = vrot.slane %v4720_v22, %v7234_v57  ;;  %v9810_v22 = vpop.permute.xlu1 %3798 }
 0x367   :  { %v9799_v51 = vpop.permute.xlu0 %3866  ;;  %12842 = vst [vmem:[#allocation208_spill] sm:$0xff] %v9810_v22 }
 0x368   :  { %12838 = vst [vmem:[#allocation204_spill] sm:$0xff] %v9799_v51  ;;  %v4769_v49 = vcombine.high %v4712_v9, %v4728_v37  ;;  %v4768_v26 = vcombine.low %v4712_v9, %v4728_v37 }
 0x369   :  { %6214 = vrot.lane.b32.xlu1 %v4561_v5, %s6987_s0 }
 0x36a   :  { %v9820_v10 = vpop.permute.xlu1 %3806  ;;  %v9823_v21 = vrot.slane %v4768_v26, %v7293_v61 }
 0x36b   :  { %v9802_v39 = vpop.permute.xlu0 %3874  ;;  %12844 = vst [vmem:[#allocation210_spill] sm:$0xff] %v9820_v10 }
 0x36c   :  { %12839 = vst [vmem:[#allocation205_spill] sm:$0xff] %v9802_v39  ;;  %12845 = vst [vmem:[#allocation211_spill] sm:$0xff] %v9823_v21 }
 0x36f   :  { %v9806_v42 = vpop.permute.xlu0 %3882 }
 0x370   :  { %12841 = vst [vmem:[#allocation207_spill] sm:$0xff] %v9806_v42  ;;  %v4736_v40 = vcombine.low %v9799_v51, %v9806_v42  ;;  %v9829_v51 = vrot.slane %v4769_v49, %v7293_v61  ;;  %v9845_v49 = vpop.permute.xlu1 %3814 }
 0x371   :  { %12847 = vst [vmem:[#allocation213_spill] sm:$0xff] %v9845_v49 }
 0x372   :  { %v4744_v7 = vrot.slane %v4736_v40, %v7234_v57 }
 0x373   :  { %v9812_v60 = vpop.permute.xlu0 %3890 }
 0x374   :  { %12843 = vst [vmem:[#allocation209_spill] sm:$0xff] %v9812_v60  ;;  %v4752_v3 = vcombine.low %v9802_v39, %v9812_v60 }
 0x376   :  { %v4760_v5 = vrot.slane %v4752_v3, %v7234_v57 }
 0x377   :  { %v9818_v1 = vpop.permute.xlu0 %3898 }
 0x378   :  { %v4800_v58 = vcombine.low %v4744_v7, %v4760_v5  ;;  %v4801_v30 = vcombine.high %v4744_v7, %v4760_v5  ;;  %v9851_v5 = vpop.permute.xlu1 %3822 }
 0x379   :  { %12848 = vst [vmem:[#allocation214_spill] sm:$0xff] %v9851_v5 }
 0x37a   :  { %v9826_v22 = vrot.slane %v4800_v58, %v7293_v61  ;;  %v9832_v37 = vrot.slane %v4801_v30, %v7293_v61 }
 0x37b   :  { %v9834_v9 = vpop.permute.xlu0 %3906 }
 0x37c   :  { %12846 = vst [vmem:[#allocation212_spill] sm:$0xff] %v9826_v22  ;;  %v4833_v3 = vcombine.high %v9823_v21, %v9826_v22  ;;  %v9855_v42 = vpop.permute.xlu1 %3830 }
 0x37d   :  { %12849 = vst [vmem:[#allocation215_spill] sm:$0xff] %v9855_v42 }
 0x37e   :  { %6218 = vrot.lane.b32.xlu1 %v4833_v3, %s6987_s0 }
 0x37f   :  { %v9847_v30 = vpop.permute.xlu0 %3914 }
 0x380   :  { %v4840_v3 = vcombine.low %v9818_v1, %v9847_v30  ;;  %v9865_v22 = vpop.permute.xlu1 %3838 }
 0x381   :  { %12850 = vst [vmem:[#allocation216_spill] sm:$0xff] %v9865_v22 }
 0x382   :  { %v4848_v42 = vrot.slane %v4840_v3, %v7234_v57 }
 0x383   :  { %v9849_v40 = vpop.permute.xlu0 %3922 }
 0x384   :  { %v4856_v26 = vcombine.low %v9834_v9, %v9849_v40  ;;  %v9877_v32 = vpop.permute.xlu1 %3846 }
 0x385   :  { %12851 = vst [vmem:[#allocation217_spill] sm:$0xff] %v9877_v32 }
 0x386   :  { %v4864_v21 = vrot.slane %v4856_v26, %v7234_v57 }
 0x387   :  { %v9853_v10 = vpop.permute.xlu0 %3930 }
 0x388   :  { %v4904_v50 = vcombine.low %v4848_v42, %v4864_v21  ;;  %v9891_v27 = vpop.permute.xlu1 %3854  ;;  %v4905_v16 = vcombine.high %v4848_v42, %v4864_v21 }
 0x389   :  { %12854 = vst [vmem:[#allocation220_spill] sm:$0xff] %v9891_v27  ;;  %v12857_v27 = vcombine.low %v9612_v44, %v9615_v47 }
 0x38a   :  { %v9882_v17 = vrot.slane %v4904_v50, %v7293_v61  ;;  %v12855_v50 = vcombine.low %v9452_v6, %v9455_v31 }
 0x38b   :  { %v9857_v7 = vpop.permute.xlu0 %3938 }
 0x38c   :  { %12852 = vst [vmem:[#allocation218_spill] sm:$0xff] %v9882_v17 }
 0x38f   :  { %v9861_v58 = vpop.permute.xlu0 %3946 }
 0x390   :  { %v4872_v49 = vcombine.low %v9853_v10, %v9861_v58 }
 0x392   :  { %v4880_v39 = vrot.slane %v4872_v49, %v7234_v57 }
 0x393   :  { %v9870_v5 = vpop.permute.xlu0 %3954 }
 0x394   :  { %v4888_v24 = vcombine.low %v9857_v7, %v9870_v5 }
 0x396   :  { %v4896_v60 = vrot.slane %v4888_v24, %v7234_v57 }
 0x397   :  { %v9879_v22 = vpop.permute.xlu0 %3962 }
 0x398   :  { %v4936_v26 = vcombine.low %v4880_v39, %v4896_v60  ;;  %v4937_v15 = vcombine.high %v4880_v39, %v4896_v60 }
 0x39a   :  { %v9885_v35 = vrot.slane %v4936_v26, %v7293_v61  ;;  %v9902_v26 = vpop.permute.xlu1 %3862 }
 0x39b   :  { %v9887_v3 = vpop.permute.xlu0 %3970  ;;  %12856 = vst [vmem:[#allocation221_spill] sm:$0xff] %v9902_v26  ;;  %v4025_v26 = vcombine.high %v9381_v8, %v9393_v59 }
 0x39c   :  { %12853 = vst [vmem:[#allocation219_spill] sm:$0xff] %v9885_v35  ;;  %v4969_v12 = vcombine.high %v9882_v17, %v9885_v35  ;;  %v4919_v17 = vrot.slane %v4905_v16, %v7293_v61 }
 0x39e   :  { %6220 = vrot.lane.b32.xlu0 %v4969_v12, %s6987_s0  ;;  %v4951_v12 = vrot.slane %v4937_v15, %v7293_v61  ;;  %v9913_v35 = vpop.permute.xlu1 %3870 }
 0x39f   :  { %v9896_v49 = vpop.permute.xlu0 %3978  ;;  %12858 = vst [vmem:[#allocation222_spill] sm:$0xff] %v9913_v35  ;;  %v4057_v35 = vcombine.high %v9411_v38, %v9423_v63  ;;  %v4345_v38 = vcombine.high %v9573_v4, %v9587_v11  ;;  %v4329_v11 = vcombine.high %v9567_v25, %v9579_v0 }
 0x3a0   :  { %v4970_v42 = vcombine.low %v4919_v17, %v4951_v12  ;;  %v4976_v16 = vcombine.low %v9879_v22, %v9896_v49 }
 0x3a2   :  { %6240 = vrot.lane.b32.xlu0 %v12855_v50, %s6988_s22  ;;  %v12859_v50 = vcombine.low %v9760_v54, %v9763_v45  ;;  %v9927_v15 = vpop.permute.xlu1 %3878  ;;  %v9959_v59 = vrot.slane %v4976_v16, %v7234_v57 }
 0x3a3   :  { %v9904_v32 = vpop.permute.xlu0 %3986  ;;  %12860 = vst [vmem:[#allocation223_spill] sm:$0xff] %v9927_v15 }
 0x3a4   :  { %v4992_v21 = vcombine.low %v9887_v3, %v9904_v32 }
 0x3a6   :  { %6244 = vrot.lane.b32.xlu0 %v12857_v27, %s6988_s22  ;;  %v4073_v27 = vcombine.high %v9417_v14, %v9431_v2  ;;  %v12861_v14 = vcombine.high %v9452_v6, %v9455_v31  ;;  %v9964_v6 = vrot.slane %v4057_v35, %v7234_v57  ;;  %v4313_v31 = vcombine.high %v9525_v53, %v9557_v34  ;;  %v9970_v4 = vpop.permute.xlu1 %3886 }
 0x3a7   :  { %v9910_v24 = vpop.permute.xlu0 %3994  ;;  %v12862_v35 = vcombine.high %v9612_v44, %v9615_v47  ;;  %v4297_v34 = vcombine.high %v9519_v28, %v9549_v23  ;;  %v9988_v53 = vrot.slane %v4345_v38, %v7234_v57  ;;  %v9998_v44 = vrot.slane %v4329_v11, %v7234_v57 }
 0x3a8   :  { %v4585_v47 = vcombine.high %v9681_v46, %v9711_v29  ;;  %v4601_v28 = vcombine.high %v9723_v19, %v9734_v56  ;;  %v12863_v23 = vcombine.high %v9760_v54, %v9763_v45  ;;  %v4569_v29 = vcombine.high %v9675_v41, %v9705_v43 }
 0x3a9   :  { %v10015_v38 = vrot.slane %v4297_v34, %v7234_v57  ;;  %v4408_v46 = vcombine.low %v9998_v44, %v9988_v53  ;;  %v4889_v45 = vcombine.high %v9857_v7, %v9870_v5 }
 0x3aa   :  { %6248 = vrot.lane.b32.xlu0 %v12859_v50, %s6988_s22  ;;  %v4041_v50 = vcombine.high %v9387_v55, %v9401_v13  ;;  %v9949_v13 = vrot.slane %v4073_v27, %v7234_v57  ;;  %v10021_v19 = vpop.permute.xlu1 %3894  ;;  %v10037_v41 = vrot.slane %v4601_v28, %v7234_v57 }
 0x3ab   :  { %v9920_v39 = vpop.permute.xlu0 %4002 }
 0x3ac   :  { %v9956_v8 = vrot.slane %v4041_v50, %v7234_v57  ;;  %v4136_v25 = vcombine.low %v9964_v6, %v9949_v13 }
 0x3ae   :  { %6252 = vrot.lane.b32.xlu0 %v4970_v42, %s6988_s22  ;;  %v9940_v42 = vrot.slane %v4992_v21, %v7234_v57  ;;  %v9973_v21 = vrot.slane %v4025_v26, %v7234_v57  ;;  %v4617_v26 = vcombine.high %v9731_v52, %v9741_v20  ;;  %v4144_v56 = vrot.slane %v4136_v25, %v7293_v61 }
 0x3af   :  { %v9929_v60 = vpop.permute.xlu0 %4010  ;;  %v10050_v25 = vrot.slane %v4569_v29, %v7234_v57 }
 0x3b0   :  { %v5008_v2 = vcombine.low %v9910_v24, %v9929_v60  ;;  %v5040_v27 = vcombine.low %v9959_v59, %v9940_v42  ;;  %v4104_v0 = vcombine.low %v9973_v21, %v9956_v8  ;;  %v10025_v54 = vrot.slane %v4617_v26, %v7234_v57 }
 0x3b2   :  { %6272 = vrot.lane.b32.xlu0 %v12861_v14, %s6989_s23  ;;  %v5016_v50 = vrot.slane %v5008_v2, %v7234_v57  ;;  %v9995_v14 = vrot.slane %v4313_v31, %v7234_v57  ;;  %v10009_v52 = vrot.slane %v5040_v27, %v7293_v61  ;;  %v10034_v27 = vrot.slane %v4585_v47, %v7234_v57 }
 0x3b3   :  { %v9953_v55 = vpop.permute.xlu0 %4018  ;;  %v4112_v43 = vrot.slane %v4104_v0, %v7293_v61  ;;  %v4680_v34 = vcombine.low %v10037_v41, %v10025_v54 }
 0x3b4   :  { %v5024_v63 = vcombine.low %v9920_v39, %v9953_v55  ;;  %12864 = vst [vmem:[#allocation224_spill] sm:$0xff] %v10009_v52  ;;  %v4376_v11 = vcombine.low %v10015_v38, %v9995_v14  ;;  %v4648_v0 = vcombine.low %v10050_v25, %v10034_v27 }
 0x3b5   :  { %v4156_v5 = vcombine.low %v4112_v43, %v4144_v56 }
 0x3b6   :  { %v5032_v16 = vrot.slane %v5024_v63, %v7234_v57  ;;  %6276 = vrot.lane.b32.xlu0 %v12862_v35, %s6989_s23  ;;  %v4971_v63 = vcombine.high %v4919_v17, %v4951_v12  ;;  %v4857_v35 = vcombine.high %v9834_v9, %v9849_v40  ;;  %v4873_v17 = vcombine.high %v9853_v10, %v9861_v58  ;;  %v10059_v58 = vpop.permute.xlu1 %3902 }
 0x3b7   :  { %v4416_v12 = vrot.slane %v4408_v46, %v7293_v61  ;;  %v4841_v9 = vcombine.high %v9818_v1, %v9847_v30  ;;  %v10057_v10 = vrot.slane %v4889_v45, %v7234_v57  ;;  %12866 = vst [vmem:[#allocation226_spill] sm:$0xff] %v10059_v58  ;;  %v4384_v40 = vrot.slane %v4376_v11, %v7293_v61 }
 0x3b8   :  { %v5072_v2 = vcombine.low %v5016_v50, %v5032_v16  ;;  %v10065_v26 = vrot.slane %v4857_v35, %v7234_v57  ;;  %v12867_v1 = vcombine.low %v9534_v62, %v9537_v33  ;;  %v4688_v46 = vrot.slane %v4680_v34, %v7293_v61 }
 0x3b9   :  { %v4428_v30 = vcombine.low %v4384_v40, %v4416_v12  ;;  %v10076_v47 = vrot.slane %v4841_v9, %v7234_v57  ;;  %v5041_v45 = vcombine.high %v9959_v59, %v9940_v42  ;;  %v12870_v42 = vcombine.low %v9829_v51, %v9832_v37 }
 0x3ba   :  { %6280 = vrot.lane.b32.xlu0 %v12863_v23, %s6989_s23  ;;  %v10012_v20 = vrot.slane %v5072_v2, %v7293_v61  ;;  %v10068_v2 = vrot.slane %v4873_v17, %v7234_v57  ;;  %v5073_v23 = vcombine.high %v5016_v50, %v5032_v16  ;;  %v10091_v11 = vpop.permute.xlu1 %3910 }
 0x3bb   :  { %v4920_v29 = vcombine.low %v10076_v47, %v10065_v26  ;;  %12869 = vst [vmem:[#allocation227_spill] sm:$0xff] %v10091_v11  ;;  %v5055_v17 = vrot.slane %v5041_v45, %v7293_v61 }
 0x3bc   :  { %12865 = vst [vmem:[#allocation225_spill] sm:$0xff] %v10012_v20  ;;  %v5105_v31 = vcombine.high %v10009_v52, %v10012_v20  ;;  %v4952_v28 = vcombine.low %v10068_v2, %v10057_v10  ;;  %v10097_v35 = vrot.slane %v5073_v23, %v7293_v61 }
 0x3bd   :  { %v4928_v59 = vrot.slane %v4920_v29, %v7293_v61  ;;  %v12875_v29 = vld [vmem:[#allocation174_spill] sm:$0xff] }
 0x3be   :  { %6284 = vrot.lane.b32.xlu0 %v4971_v63, %s6989_s23  ;;  %6222 = vrot.lane.b32.xlu1 %v5105_v31, %s6987_s0  ;;  %v12868_v63 = vcombine.low %v9690_v18, %v9693_v48  ;;  %v4656_v31 = vrot.slane %v4648_v0, %v7293_v61  ;;  %v10094_v16 = vrot.slane %v4952_v28, %v7293_v61  ;;  %v10108_v9 = vpop.permute.xlu1 %3918  ;;  %v12872_v0 = vld [vmem:[#allocation176_spill] sm:$0xff]  ;;  %v12874_v28 = vld [vmem:[#allocation175_spill] sm:$0xff] }
 0x3bf   :  { %v5106_v34 = vcombine.low %v5055_v17, %v10097_v35  ;;  %12871 = vst [vmem:[#allocation228_spill] sm:$0xff] %v10108_v9 }
 0x3c0   :  { %v4700_v50 = vcombine.low %v4656_v31, %v4688_v46 }
 0x3c2   :  { %6304 = vrot.lane.b32.xlu0 %v4156_v5, %s6990_s24  ;;  %6242 = vrot.lane.b32.xlu1 %v12867_v1, %s6988_s22  ;;  %v4972_v5 = vcombine.low %v4928_v59, %v10094_v16  ;;  %v4209_v1 = vcombine.high %v12872_v0, %v9509_v36  ;;  %v12877_v36 = vcombine.high %v9534_v62, %v9537_v33  ;;  %v12883_v62 = vld [vmem:[#allocation185_spill] sm:$0xff] }
 0x3c3   :  { %v12884_v33 = vld [vmem:[#allocation181_spill] sm:$0xff] }
 0x3c4   :  { %v10121_v7 = vrot.slane %v4209_v1, %v7234_v57  ;;  %v4429_v1 = vcombine.high %v4384_v40, %v4416_v12  ;;  %v12888_v40 = vld [vmem:[#allocation184_spill] sm:$0xff] }
 0x3c6   :  { %6308 = vrot.lane.b32.xlu0 %v4428_v30, %s6990_s24  ;;  %6246 = vrot.lane.b32.xlu1 %v12868_v63, %s6988_s22  ;;  %v12873_v30 = vld [vmem:[#allocation177_spill] sm:$0xff]  ;;  %v4157_v63 = vcombine.high %v4112_v43, %v4144_v56  ;;  %v12881_v43 = vld [vmem:[#allocation187_spill] sm:$0xff] }
 0x3c7   :  { %v4193_v23 = vcombine.high %v12874_v28, %v12873_v30  ;;  %v12880_v56 = vld [vmem:[#allocation189_spill] sm:$0xff]  ;;  %v10132_v28 = vpop.permute.xlu1 %3926 }
 0x3c8   :  { %v4481_v30 = vcombine.high %v12881_v43, %v12880_v56  ;;  %12882 = vst [vmem:[#allocation176_spill] sm:$0xff] %v10132_v28  ;;  %v12890_v43 = vld [vmem:[#allocation209_spill] sm:$0xff] }
 0x3ca   :  { %6312 = vrot.lane.b32.xlu0 %v4700_v50, %s6990_s24  ;;  %6250 = vrot.lane.b32.xlu1 %v12870_v42, %s6988_s22  ;;  %v12876_v50 = vld [vmem:[#allocation172_spill] sm:$0xff]  ;;  %v4137_v42 = vcombine.high %v9964_v6, %v9949_v13  ;;  %v4105_v13 = vcombine.high %v9973_v21, %v9956_v8  ;;  %v10137_v6 = vrot.slane %v4193_v23, %v7234_v57 }
 0x3cb   :  { %v4177_v45 = vcombine.high %v12876_v50, %v12875_v29  ;;  %v4449_v29 = vcombine.high %v12884_v33, %v12883_v62  ;;  %v12885_v50 = vld [vmem:[#allocation188_spill] sm:$0xff]  ;;  %v12887_v8 = vcombine.high %v9690_v18, %v9693_v48  ;;  %v10162_v56 = vrot.slane %v4481_v30, %v7234_v57  ;;  %v12891_v62 = vld [vmem:[#allocation205_spill] sm:$0xff] }
 0x3cc   :  { %v10154_v21 = vrot.slane %v4137_v42, %v7293_v61  ;;  %v12889_v23 = vld [vmem:[#allocation180_spill] sm:$0xff]  ;;  %v4701_v33 = vcombine.high %v4656_v31, %v4688_v46  ;;  %v12897_v31 = vcombine.high %v9829_v51, %v9832_v37  ;;  %v5025_v37 = vcombine.high %v9920_v39, %v9953_v55 }
 0x3cd   :  { %v10172_v48 = vrot.slane %v4449_v29, %v7234_v57  ;;  %v4993_v39 = vcombine.high %v9887_v3, %v9904_v32  ;;  %v5009_v55 = vcombine.high %v9910_v24, %v9929_v60  ;;  %v4977_v60 = vcombine.high %v9879_v22, %v9896_v49 }
 0x3ce   :  { %6316 = vrot.lane.b32.xlu0 %v4972_v5, %s6990_s24  ;;  %6254 = vrot.lane.b32.xlu1 %v5106_v34, %s6988_s22  ;;  %v12878_v5 = vld [vmem:[#allocation173_spill] sm:$0xff] }
 0x3cf   :  { %v12879_v34 = vld [vmem:[#allocation169_spill] sm:$0xff]  ;;  %v10264_v22 = vrot.slane %v5009_v55, %v7234_v57 }
 0x3d0   :  { %v4161_v0 = vcombine.high %v12879_v34, %v12878_v5  ;;  %v4272_v34 = vcombine.low %v10137_v6, %v10121_v7  ;;  %v12904_v55 = vld [vmem:[#allocation57_spill] sm:$0xff] }
 0x3d2   :  { %6336 = vrot.lane.b32.xlu0 %v4157_v63, %s6991_s25  ;;  %6274 = vrot.lane.b32.xlu1 %v12877_v36, %s6989_s23  ;;  %v10140_v63 = vrot.slane %v4177_v45, %v7234_v57  ;;  %v12886_v36 = vld [vmem:[#allocation186_spill] sm:$0xff]  ;;  %v10157_v12 = vrot.slane %v4161_v0, %v7234_v57  ;;  %v4433_v45 = vcombine.high %v12889_v23, %v12888_v40  ;;  %v12895_v40 = vld [vmem:[#allocation207_spill] sm:$0xff]  ;;  %v12896_v23 = vld [vmem:[#allocation204_spill] sm:$0xff] }
 0x3d3   :  { %v4465_v5 = vcombine.high %v12886_v36, %v12885_v50  ;;  %v10167_v50 = vrot.slane %v4105_v13, %v7293_v61  ;;  %v12892_v0 = vld [vmem:[#allocation202_spill] sm:$0xff]  ;;  %v12893_v36 = vld [vmem:[#allocation199_spill] sm:$0xff]  ;;  %v4737_v46 = vcombine.high %v12896_v23, %v12895_v40  ;;  %v10191_v29 = vrot.slane %v4272_v34, %v7293_v61 }
 0x3d4   :  { %v4240_v18 = vcombine.low %v10157_v12, %v10140_v63  ;;  %v4721_v30 = vcombine.high %v12893_v36, %v12892_v0  ;;  %v12899_v0 = vld [vmem:[#allocation195_spill] sm:$0xff]  ;;  %v4973_v34 = vcombine.high %v4928_v59, %v10094_v16  ;;  %v5107_v40 = vcombine.high %v5055_v17, %v10097_v35 }
 0x3d5   :  { %v10175_v42 = vrot.slane %v4465_v5, %v7234_v57  ;;  %v4158_v13 = vcombine.low %v10167_v50, %v10154_v21  ;;  %v4409_v5 = vcombine.high %v9998_v44, %v9988_v53  ;;  %v4377_v53 = vcombine.high %v10015_v38, %v9995_v14 }
 0x3d6   :  { %6340 = vrot.lane.b32.xlu0 %v4429_v1, %s6991_s25  ;;  %6278 = vrot.lane.b32.xlu1 %v12887_v8, %s6989_s23  ;;  %v4753_v1 = vcombine.high %v12891_v62, %v12890_v43  ;;  %v10179_v8 = vpop.permute.xlu1 %3934  ;;  %v10196_v43 = vrot.slane %v4433_v45, %v7234_v57  ;;  %v10214_v45 = vrot.slane %v4721_v30, %v7234_v57 }
 0x3d7   :  { %12894 = vst [vmem:[#allocation177_spill] sm:$0xff] %v10179_v8  ;;  %v4544_v62 = vcombine.low %v10175_v42, %v10162_v56  ;;  %v10217_v23 = vrot.slane %v4240_v18, %v7293_v61  ;;  %v4681_v14 = vcombine.high %v10037_v41, %v10025_v54  ;;  %v10235_v35 = vrot.slane %v4409_v5, %v7293_v61 }
 0x3d8   :  { %v10203_v51 = vrot.slane %v4753_v1, %v7234_v57  ;;  %v4512_v44 = vcombine.low %v10196_v43, %v10172_v48  ;;  %v10220_v1 = vrot.slane %v4737_v46, %v7234_v57  ;;  %v10248_v54 = vrot.slane %v5025_v37, %v7234_v57 }
 0x3d9   :  { %v4292_v16 = vcombine.low %v10217_v23, %v10191_v29  ;;  %v10238_v32 = vrot.slane %v4544_v62, %v7293_v61  ;;  %v4649_v41 = vcombine.high %v10050_v25, %v10034_v27  ;;  %v10253_v59 = vrot.slane %v4377_v53, %v7293_v61  ;;  %v12902_v53 = vld [vmem:[#allocation53_spill] sm:$0xff] }
 0x3da   :  { %6344 = vrot.lane.b32.xlu0 %v4701_v33, %s6991_s25  ;;  %6282 = vrot.lane.b32.xlu1 %v12897_v31, %s6989_s23  ;;  %v12898_v33 = vld [vmem:[#allocation200_spill] sm:$0xff]  ;;  %v10230_v38 = vpop.permute.xlu1 %3942  ;;  %v4816_v24 = vcombine.low %v10220_v1, %v10203_v51  ;;  %v10256_v17 = vrot.slane %v4512_v44, %v7293_v61  ;;  %v10261_v30 = vrot.slane %v4993_v39, %v7234_v57 }
 0x3db   :  { %v4705_v36 = vcombine.high %v12899_v0, %v12898_v33  ;;  %12900 = vst [vmem:[#allocation175_spill] sm:$0xff] %v10230_v38  ;;  %v4430_v49 = vcombine.low %v10253_v59, %v10235_v35  ;;  %v10273_v25 = vrot.slane %v4681_v14, %v7293_v61  ;;  %v4953_v46 = vcombine.high %v10068_v2, %v10057_v10  ;;  %v12903_v44 = vld [vmem:[#allocation48_spill] sm:$0xff]  ;;  %v12905_v14 = vld [vmem:[#allocation171_spill] sm:$0xff] }
 0x3dc   :  { %v4564_v27 = vcombine.low %v10256_v17, %v10238_v32  ;;  %v10278_v31 = vrot.slane %v4977_v60, %v7234_v57  ;;  %v10283_v5 = vrot.slane %v4816_v24, %v7293_v61  ;;  %v10288_v33 = vrot.slane %v4649_v41, %v7293_v61  ;;  %v12907_v60 = vld [vmem:[#allocation65_spill] sm:$0xff]  ;;  %v12908_v41 = vld [vmem:[#allocation60_spill] sm:$0xff] }
 0x3dd   :  { %v10241_v3 = vrot.slane %v4705_v36, %v7234_v57  ;;  %v4921_v0 = vcombine.high %v10076_v47, %v10065_v26  ;;  %v5112_v39 = vcombine.low %v12903_v44, %v12902_v53  ;;  %v4159_v52 = vcombine.high %v10167_v50, %v10154_v21  ;;  %v12918_v44 = vld [vmem:[#allocation101_spill] sm:$0xff] }
 0x3de   :  { %6348 = vrot.lane.b32.xlu0 %v4973_v34, %s6991_s25  ;;  %6286 = vrot.lane.b32.xlu1 %v5107_v40, %s6989_s23  ;;  %v10285_v62 = vpop.permute.xlu1 %3950  ;;  %v5056_v10 = vcombine.low %v10278_v31, %v10261_v30  ;;  %v4702_v36 = vcombine.low %v10288_v33, %v10273_v25  ;;  %v10301_v34 = vrot.slane %v4953_v46, %v7293_v61 }
 0x3df   :  { %v4784_v18 = vcombine.low %v10241_v3, %v10214_v45  ;;  %12901 = vst [vmem:[#allocation174_spill] sm:$0xff] %v10285_v62  ;;  %v10309_v26 = vrot.slane %v4921_v0, %v7293_v61  ;;  %v4241_v50 = vcombine.high %v10157_v12, %v10140_v63 }
 0x3e0   :  { %v10312_v47 = vrot.slane %v5056_v10, %v7293_v61  ;;  %v10331_v10 = vrot.slane %v5112_v39, %v7234_v57  ;;  %v12913_v39 = vld [vmem:[#allocation95_spill] sm:$0xff] }
 0x3e1   :  { %v4792_v2 = vrot.slane %v4784_v18, %v7293_v61  ;;  %v5144_v18 = vcombine.low %v12908_v41, %v12907_v60  ;;  %v12914_v41 = vld [vmem:[#allocation88_spill] sm:$0xff] }
 0x3e2   :  { %6368 = vrot.lane.b32.xlu0 %v4158_v13, %s6992_s26  ;;  %6306 = vrot.lane.b32.xlu1 %v4292_v16, %s6990_s24  ;;  %v5088_v13 = vcombine.low %v10264_v22, %v10248_v54  ;;  %v5128_v16 = vcombine.low %v12905_v14, %v12904_v55  ;;  %v10318_v24 = vpop.permute.xlu1 %3958  ;;  %v5400_v60 = vcombine.low %v12914_v41, %v12913_v39  ;;  %v12916_v14 = vld [vmem:[#allocation98_spill] sm:$0xff]  ;;  %v12927_v41 = vld [vmem:[#allocation213_spill] sm:$0xff] }
 0x3e3   :  { %v4836_v37 = vcombine.low %v4792_v2, %v10283_v5  ;;  %12906 = vst [vmem:[#allocation172_spill] sm:$0xff] %v10318_v24 }
 0x3e4   :  { %v10304_v40 = vrot.slane %v5088_v13, %v7293_v61  ;;  %v4974_v13 = vcombine.low %v10309_v26, %v10301_v34 }
 0x3e6   :  { %6372 = vrot.lane.b32.xlu0 %v4430_v49, %s6992_s26  ;;  %6310 = vrot.lane.b32.xlu1 %v4564_v27, %s6990_s24  ;;  %v12909_v49 = vld [vmem:[#allocation67_spill] sm:$0xff]  ;;  %v12910_v27 = vld [vmem:[#allocation62_spill] sm:$0xff]  ;;  %v5108_v0 = vcombine.low %v10312_v47, %v10304_v40 }
 0x3e7   :  { %v5160_v46 = vcombine.low %v12910_v27, %v12909_v49  ;;  %v12911_v27 = vld [vmem:[#allocation91_spill] sm:$0xff] }
 0x3e9   :  { %v10340_v20 = vrot.slane %v5160_v46, %v7234_v57  ;;  %v10354_v46 = vpop.permute.xlu1 %3966 }
 0x3ea   :  { %6376 = vrot.lane.b32.xlu0 %v4702_v36, %s6992_s26  ;;  %6314 = vrot.lane.b32.xlu1 %v4836_v37, %s6990_s24  ;;  %v10334_v36 = vrot.slane %v5128_v16, %v7234_v57  ;;  %v10337_v37 = vrot.slane %v5144_v18, %v7234_v57  ;;  %v12915_v16 = vld [vmem:[#allocation103_spill] sm:$0xff]  ;;  %v12917_v18 = vld [vmem:[#allocation106_spill] sm:$0xff]  ;;  %12919 = vst [vmem:[#allocation173_spill] sm:$0xff] %v10354_v46 }
 0x3eb   :  { %v5416_v55 = vcombine.low %v12916_v14, %v12915_v16  ;;  %v5432_v53 = vcombine.low %v12918_v44, %v12917_v18  ;;  %v4431_v44 = vcombine.high %v10253_v59, %v10235_v35  ;;  %v10374_v18 = vrot.slane %v5400_v60, %v7234_v57  ;;  %v12920_v14 = vld [vmem:[#allocation206_spill] sm:$0xff]  ;;  %v12922_v16 = vld [vmem:[#allocation208_spill] sm:$0xff]  ;;  %v12923_v35 = vld [vmem:[#allocation203_spill] sm:$0xff] }
 0x3ec   :  { %v5176_v21 = vcombine.low %v10331_v10, %v10334_v36  ;;  %v5672_v59 = vcombine.low %v12923_v35, %v12922_v16 }
 0x3ed   :  { %v10377_v63 = vrot.slane %v5416_v55, %v7234_v57  ;;  %v10380_v12 = vrot.slane %v5432_v53, %v7234_v57  ;;  %v10392_v39 = vpop.permute.xlu1 %3974  ;;  %v4703_v53 = vcombine.high %v10288_v33, %v10273_v25  ;;  %v4545_v25 = vcombine.high %v10175_v42, %v10162_v56 }
 0x3ee   :  { %6380 = vrot.lane.b32.xlu0 %v4974_v13, %s6992_s26  ;;  %6318 = vrot.lane.b32.xlu1 %v5108_v0, %s6990_s24  ;;  %v4293_v13 = vcombine.high %v10217_v23, %v10191_v29  ;;  %v12912_v0 = vld [vmem:[#allocation86_spill] sm:$0xff]  ;;  %v5208_v29 = vcombine.low %v10337_v37, %v10340_v20  ;;  %v4273_v23 = vcombine.high %v10137_v6, %v10121_v7  ;;  %v12921_v7 = vld [vmem:[#allocation201_spill] sm:$0xff] }
 0x3ef   :  { %v5384_v49 = vcombine.low %v12912_v0, %v12911_v27  ;;  %v5656_v6 = vcombine.low %v12921_v7, %v12920_v14  ;;  %12928 = vst [vmem:[#allocation169_spill] sm:$0xff] %v10392_v39  ;;  %v4837_v7 = vcombine.high %v4792_v2, %v10283_v5  ;;  %v10398_v14 = vrot.slane %v5176_v21, %v7293_v61 }
 0x3f0   :  { %v10419_v33 = vrot.slane %v5672_v59, %v7234_v57  ;;  %v4975_v56 = vcombine.high %v10309_v26, %v10301_v34  ;;  %v5944_v42 = vcombine.low %v10091_v11, %v10132_v28 }
 0x3f1   :  { %v10416_v5 = vrot.slane %v5656_v6, %v7234_v57  ;;  %v4513_v6 = vcombine.high %v10196_v43, %v10172_v48  ;;  %v10443_v59 = vpop.permute.xlu1 %3982 }
 0x3f2   :  { %6400 = vrot.lane.b32.xlu0 %v4159_v52, %s6993_s27  ;;  %6338 = vrot.lane.b32.xlu1 %v4293_v13, %s6991_s25  ;;  %v4565_v52 = vcombine.high %v10256_v17, %v10238_v32  ;;  %v10371_v13 = vrot.slane %v5384_v49, %v7234_v57  ;;  %v12924_v32 = vld [vmem:[#allocation214_spill] sm:$0xff]  ;;  %v12926_v49 = vld [vmem:[#allocation215_spill] sm:$0xff] }
 0x3f3   :  { %v12925_v17 = vld [vmem:[#allocation210_spill] sm:$0xff]  ;;  %v5704_v55 = vcombine.low %v12927_v41, %v12926_v49  ;;  %v10408_v41 = vrot.slane %v5208_v29, %v7293_v61  ;;  %v10411_v49 = vrot.slane %v4273_v23, %v7293_v61  ;;  %v5960_v29 = vcombine.low %v10179_v8, %v10285_v62  ;;  %v12938_v8 = vld [vmem:[#allocation80_spill] sm:$0xff] }
 0x3f4   :  { %v5688_v60 = vcombine.low %v12925_v17, %v12924_v32  ;;  %v5480_v17 = vcombine.low %v10377_v63, %v10380_v12  ;;  %v5976_v23 = vcombine.low %v10230_v38, %v10318_v24  ;;  %v5720_v48 = vcombine.low %v10416_v5, %v10419_v33  ;;  %v12936_v38 = vld [vmem:[#allocation73_spill] sm:$0xff]  ;;  %v12950_v32 = vld [vmem:[#allocation198_spill] sm:$0xff] }
 0x3f5   :  { %v10427_v21 = vrot.slane %v5704_v55, %v7234_v57  ;;  %v5240_v34 = vcombine.low %v10398_v14, %v10408_v41  ;;  %v10464_v55 = vrot.slane %v4545_v25, %v7293_v61  ;;  %v10487_v25 = vpop.permute.xlu1 %3990 }
 0x3f6   :  { %6404 = vrot.lane.b32.xlu0 %v4431_v44, %s6993_s27  ;;  %6342 = vrot.lane.b32.xlu1 %v4565_v52, %s6991_s25  ;;  %v10401_v44 = vrot.slane %v4241_v50, %v7293_v61  ;;  %v5448_v52 = vcombine.low %v10371_v13, %v10374_v18  ;;  %v10424_v2 = vrot.slane %v5688_v60, %v7234_v57 }
 0x3f7   :  { %v5928_v50 = vcombine.low %v10059_v58, %v10108_v9  ;;  %12930 = vst [vmem:[#allocation187_spill] sm:$0xff] %v10487_v25  ;;  %v12948_v58 = vld [vmem:[#allocation194_spill] sm:$0xff] }
 0x3f8   :  { %v4294_v26 = vcombine.low %v10401_v44, %v10411_v49  ;;  %v10452_v60 = vrot.slane %v5448_v52, %v7293_v61  ;;  %v5752_v43 = vcombine.low %v10424_v2, %v10427_v21  ;;  %v10470_v52 = vrot.slane %v5944_v42, %v7234_v57 }
 0x3fa   :  { %6408 = vrot.lane.b32.xlu0 %v4703_v53, %s6993_s27  ;;  %6346 = vrot.lane.b32.xlu1 %v4837_v7, %s6991_s25  ;;  %v5109_v7 = vcombine.high %v10312_v47, %v10304_v40  ;;  %v10455_v40 = vrot.slane %v5480_v17, %v7293_v61  ;;  %v4817_v47 = vcombine.high %v10220_v1, %v10203_v51  ;;  %v10483_v1 = vpop.permute.xlu0 %6208 }
 0x3fb   :  { %v10467_v53 = vrot.slane %v5928_v50, %v7234_v57  ;;  %v10473_v17 = vrot.slane %v5960_v29, %v7234_v57  ;;  %v4785_v51 = vcombine.high %v10241_v3, %v10214_v45  ;;  %12929 = vst [vmem:[#allocation189_spill] sm:$0xff] %v10483_v1  ;;  %v10494_v29 = vrot.slane %v5720_v48, %v7293_v61 }
 0x3fc   :  { %v5512_v50 = vcombine.low %v10452_v60, %v10455_v40 }
 0x3fd   :  { %v5992_v45 = vcombine.low %v10467_v53, %v10470_v52  ;;  %v10513_v48 = vrot.slane %v4785_v51, %v7293_v61 }
 0x3fe   :  { %6412 = vrot.lane.b32.xlu0 %v4975_v56, %s6993_s27  ;;  %6350 = vrot.lane.b32.xlu1 %v5109_v7, %s6991_s25  ;;  %v10476_v56 = vrot.slane %v5976_v23, %v7234_v57  ;;  %v10479_v7 = vrot.slane %v4513_v6, %v7293_v61  ;;  %v10497_v23 = vrot.slane %v5752_v43, %v7293_v61  ;;  %v10517_v1 = vpop.permute.xlu0 %6212 }
 0x3ff   :  { %v5089_v6 = vcombine.high %v10264_v22, %v10248_v54  ;;  %12931 = vst [vmem:[#allocation185_spill] sm:$0xff] %v10517_v1  ;;  %v10522_v22 = vrot.slane %v5992_v45, %v7293_v61  ;;  %v12935_v45 = vld [vmem:[#allocation78_spill] sm:$0xff] }
 0x400   :  { %v4566_v42 = vcombine.low %v10479_v7, %v10464_v55  ;;  %v6024_v3 = vcombine.low %v10473_v17, %v10476_v56  ;;  %v5784_v43 = vcombine.low %v10494_v29, %v10497_v23  ;;  %v5264_v24 = vcombine.low %v12936_v38, %v12935_v45 }
 0x402   :  { %6432 = vrot.lane.b32.xlu0 %v5240_v34, %s6994_s28  ;;  %6370 = vrot.lane.b32.xlu1 %v4294_v26, %s6992_s26  ;;  %v10506_v34 = vrot.slane %v4817_v47, %v7293_v61  ;;  %v5057_v26 = vcombine.high %v10278_v31, %v10261_v30  ;;  %v10525_v30 = vrot.slane %v6024_v3, %v7293_v61  ;;  %v10530_v47 = vpop.permute.xlu1 %3998  ;;  %v12937_v3 = vld [vmem:[#allocation83_spill] sm:$0xff] }
 0x403   :  { %v10528_v31 = vrot.slane %v5089_v6, %v7293_v61  ;;  %12932 = vst [vmem:[#allocation181_spill] sm:$0xff] %v10530_v47  ;;  %v5280_v62 = vcombine.low %v12938_v8, %v12937_v3  ;;  %v10543_v6 = vpop.permute.xlu0 %6216  ;;  %v5241_v8 = vcombine.high %v10398_v14, %v10408_v41  ;;  %v10561_v3 = vrot.slane %v5264_v24, %v7234_v57  ;;  %v12946_v41 = vld [vmem:[#allocation117_spill] sm:$0xff]  ;;  %v12949_v24 = vld [vmem:[#allocation192_spill] sm:$0xff] }
 0x404   :  { %v4838_v54 = vcombine.low %v10513_v48, %v10506_v34  ;;  %v10535_v51 = vrot.slane %v5057_v26, %v7293_v61  ;;  %12939 = vst [vmem:[#allocation188_spill] sm:$0xff] %v10543_v6  ;;  %v6056_v11 = vcombine.low %v10522_v22, %v10525_v30  ;;  %v12941_v26 = vld [vmem:[#allocation81_spill] sm:$0xff]  ;;  %v5552_v9 = vcombine.low %v12949_v24, %v12948_v58 }
 0x405   :  { %v10564_v38 = vrot.slane %v5280_v62, %v7234_v57  ;;  %v12951_v62 = vld [vmem:[#allocation193_spill] sm:$0xff]  ;;  %v5513_v24 = vcombine.high %v10452_v60, %v10455_v40  ;;  %v12954_v60 = vld [vmem:[#allocation220_spill] sm:$0xff] }
 0x406   :  { %6436 = vrot.lane.b32.xlu0 %v5512_v50, %s6994_s28  ;;  %6374 = vrot.lane.b32.xlu1 %v4566_v42, %s6992_s26  ;;  %v12933_v50 = vld [vmem:[#allocation74_spill] sm:$0xff]  ;;  %v5568_v35 = vcombine.low %v12951_v62, %v12950_v32  ;;  %v4567_v62 = vcombine.high %v10479_v7, %v10464_v55  ;;  %v12955_v40 = vld [vmem:[#allocation216_spill] sm:$0xff]  ;;  %v12956_v7 = vld [vmem:[#allocation221_spill] sm:$0xff] }
 0x407   :  { %v12934_v42 = vld [vmem:[#allocation70_spill] sm:$0xff]  ;;  %v5792_v55 = vcombine.low %v12955_v40, %v12954_v60  ;;  %v5785_v40 = vcombine.high %v10494_v29, %v10497_v23 }
 0x408   :  { %v5248_v1 = vcombine.low %v12934_v42, %v12933_v50  ;;  %v10553_v42 = vpop.permute.xlu1 %4006 }
 0x409   :  { %12942 = vst [vmem:[#allocation186_spill] sm:$0xff] %v10553_v42 }
 0x40a   :  { %6440 = vrot.lane.b32.xlu0 %v5784_v43, %s6994_s28  ;;  %6378 = vrot.lane.b32.xlu1 %v4838_v54, %s6992_s26  ;;  %v5110_v43 = vcombine.low %v10535_v51, %v10528_v31  ;;  %v12940_v54 = vld [vmem:[#allocation85_spill] sm:$0xff]  ;;  %v10558_v6 = vrot.slane %v5248_v1, %v7234_v57  ;;  %v12947_v1 = vld [vmem:[#allocation111_spill] sm:$0xff] }
 0x40b   :  { %v5296_v28 = vcombine.low %v12941_v26, %v12940_v54  ;;  %v12944_v26 = vld [vmem:[#allocation113_spill] sm:$0xff]  ;;  %v5536_v50 = vcombine.low %v12947_v1, %v12946_v41 }
 0x40c   :  { %v12945_v54 = vld [vmem:[#allocation109_spill] sm:$0xff] }
 0x40d   :  { %v5520_v14 = vcombine.low %v12945_v54, %v12944_v26 }
 0x40e   :  { %6444 = vrot.lane.b32.xlu0 %v6056_v11, %s6994_s28  ;;  %6382 = vrot.lane.b32.xlu1 %v5110_v43, %s6992_s26  ;;  %v4295_v11 = vcombine.high %v10401_v44, %v10411_v49  ;;  %v10571_v43 = vrot.slane %v5296_v28, %v7234_v57  ;;  %v5177_v28 = vcombine.high %v10331_v10, %v10334_v36  ;;  %v10606_v36 = vpop.permute.xlu1 %4014 }
 0x40f   :  { %v5209_v49 = vcombine.high %v10337_v37, %v10340_v20  ;;  %v5312_v44 = vcombine.low %v10558_v6, %v10561_v3  ;;  %v10601_v10 = vrot.slane %v5536_v50, %v7234_v57  ;;  %v10604_v20 = vrot.slane %v5552_v9, %v7234_v57  ;;  %12953 = vst [vmem:[#allocation209_spill] sm:$0xff] %v10606_v36  ;;  %v12958_v50 = vld [vmem:[#allocation222_spill] sm:$0xff] }
 0x410   :  { %v10566_v45 = vpop.permute.xlu0 %6220  ;;  %v10609_v37 = vrot.slane %v5568_v35, %v7234_v57  ;;  %v5840_v9 = vcombine.low %v9927_v15, %v10021_v19  ;;  %v10622_v58 = vrot.slane %v5177_v28, %v7293_v61  ;;  %v5449_v15 = vcombine.high %v10371_v13, %v10374_v18 }
 0x411   :  { %12943 = vst [vmem:[#allocation184_spill] sm:$0xff] %v10566_v45  ;;  %v5481_v28 = vcombine.high %v10377_v63, %v10380_v12  ;;  %v6057_v12 = vcombine.high %v10522_v22, %v10525_v30 }
 0x412   :  { %6464 = vrot.lane.b32.xlu0 %v5241_v8, %s6995_s29  ;;  %6402 = vrot.lane.b32.xlu1 %v4295_v11, %s6993_s27  ;;  %v5344_v8 = vcombine.low %v10564_v38, %v10571_v43  ;;  %v10598_v11 = vrot.slane %v5520_v14, %v7234_v57  ;;  %v5824_v14 = vcombine.low %v12958_v50, %v9970_v4  ;;  %v10661_v63 = vpop.permute.xlu1 %4022 }
 0x413   :  { %v5616_v23 = vcombine.low %v10604_v20, %v10609_v37  ;;  %v10659_v13 = vrot.slane %v5840_v9, %v7234_v57  ;;  %12960 = vst [vmem:[#allocation202_spill] sm:$0xff] %v10661_v63  ;;  %v5721_v9 = vcombine.high %v10416_v5, %v10419_v33 }
 0x414   :  { %v10589_v45 = vpop.permute.xlu0 %6240  ;;  %v10643_v29 = vrot.slane %v5344_v8, %v7293_v61  ;;  %v10656_v18 = vrot.slane %v5824_v14, %v7234_v57  ;;  %v6112_v8 = vcombine.low %v10553_v42, %v10661_v63  ;;  %v12970_v42 = vld [vmem:[#allocation171_spill] sm:$0xff]  ;;  %v12971_v63 = vld [vmem:[#allocation65_spill] sm:$0xff] }
 0x415   :  { %12952 = vst [vmem:[#allocation180_spill] sm:$0xff] %v10589_v45  ;;  %v12957_v45 = vld [vmem:[#allocation217_spill] sm:$0xff]  ;;  %v10693_v14 = vrot.slane %v5616_v23, %v7293_v61 }
 0x416   :  { %v5808_v32 = vcombine.low %v12957_v45, %v12956_v7  ;;  %6468 = vrot.lane.b32.xlu0 %v5513_v24, %s6995_s29  ;;  %6406 = vrot.lane.b32.xlu1 %v4567_v62, %s6993_s27  ;;  %v4839_v45 = vcombine.high %v10513_v48, %v10506_v34  ;;  %v10631_v24 = vrot.slane %v5209_v49, %v7293_v61 }
 0x417   :  { %v10634_v62 = vrot.slane %v5312_v44, %v7293_v61  ;;  %v10648_v34 = vrot.slane %v5792_v55, %v7234_v57  ;;  %v5111_v49 = vcombine.high %v10535_v51, %v10528_v31  ;;  %v6096_v44 = vcombine.low %v10530_v47, %v10606_v36  ;;  %v12972_v47 = vld [vmem:[#allocation60_spill] sm:$0xff]  ;;  %v12973_v36 = vld [vmem:[#allocation67_spill] sm:$0xff] }
 0x418   :  { %v10624_v35 = vpop.permute.xlu0 %6244  ;;  %v10651_v48 = vrot.slane %v5808_v32, %v7234_v57  ;;  %v6064_v32 = vcombine.low %v10354_v46, %v10443_v59  ;;  %v5242_v22 = vcombine.low %v10622_v58, %v10631_v24  ;;  %v10682_v31 = vrot.slane %v5449_v15, %v7293_v61  ;;  %v12983_v46 = vld [vmem:[#allocation101_spill] sm:$0xff] }
 0x419   :  { %12959 = vst [vmem:[#allocation205_spill] sm:$0xff] %v10624_v35  ;;  %v5584_v35 = vcombine.low %v10598_v11, %v10601_v10  ;;  %v5376_v30 = vcombine.low %v10634_v62, %v10643_v29  ;;  %v10687_v51 = vrot.slane %v5481_v28, %v7293_v61  ;;  %v5753_v15 = vcombine.high %v10424_v2, %v10427_v21  ;;  %v10717_v2 = vpop.permute.xlu1 %6210 }
 0x41a   :  { %6472 = vrot.lane.b32.xlu0 %v5785_v40, %s6995_s29  ;;  %6410 = vrot.lane.b32.xlu1 %v4839_v45, %s6993_s27  ;;  %v6080_v45 = vcombine.low %v10392_v39, %v10487_v25  ;;  %v10704_v28 = vrot.slane %v6064_v32, %v7234_v57  ;;  %v10710_v23 = vrot.slane %v6096_v44, %v7234_v57  ;;  %v12974_v39 = vld [vmem:[#allocation62_spill] sm:$0xff] }
 0x41b   :  { %v10690_v55 = vrot.slane %v5584_v35, %v7293_v61  ;;  %v10713_v5 = vrot.slane %v6112_v8, %v7234_v57  ;;  %12963 = vst [vmem:[#allocation204_spill] sm:$0xff] %v10717_v2  ;;  %v5514_v21 = vcombine.low %v10682_v31, %v10687_v51  ;;  %v10729_v44 = vrot.slane %v5753_v15, %v7293_v61 }
 0x41c   :  { %v10675_v40 = vpop.permute.xlu0 %6248  ;;  %v10707_v35 = vrot.slane %v6080_v45, %v7234_v57  ;;  %v10726_v45 = vrot.slane %v5721_v9, %v7293_v61 }
 0x41d   :  { %12961 = vst [vmem:[#allocation199_spill] sm:$0xff] %v10675_v40  ;;  %v5648_v32 = vcombine.low %v10690_v55, %v10693_v14  ;;  %v6160_v9 = vcombine.low %v10710_v23, %v10713_v5 }
 0x41e   :  { %6476 = vrot.lane.b32.xlu0 %v6057_v12, %s6995_s29  ;;  %6414 = vrot.lane.b32.xlu1 %v5111_v49, %s6993_s27  ;;  %v5856_v12 = vcombine.low %v10648_v34, %v10651_v48  ;;  %v5888_v49 = vcombine.low %v10656_v18, %v10659_v13  ;;  %v6128_v40 = vcombine.low %v10704_v28, %v10707_v35 }
 0x420   :  { %v10715_v33 = vpop.permute.xlu0 %6252  ;;  %v10732_v8 = vrot.slane %v5856_v12, %v7293_v61  ;;  %v10735_v2 = vrot.slane %v5888_v49, %v7293_v61  ;;  %v5786_v12 = vcombine.low %v10726_v45, %v10729_v44 }
 0x421   :  { %12962 = vst [vmem:[#allocation207_spill] sm:$0xff] %v10715_v33 }
 0x422   :  { %6496 = vrot.lane.b32.xlu0 %v5242_v22, %s6996_s30  ;;  %6434 = vrot.lane.b32.xlu1 %v5376_v30, %s6994_s28  ;;  %v5993_v22 = vcombine.high %v10467_v53, %v10470_v52  ;;  %v6025_v30 = vcombine.high %v10473_v17, %v10476_v56  ;;  %v5920_v53 = vcombine.low %v10732_v8, %v10735_v2  ;;  %v10753_v52 = vpop.permute.xlu1 %6214 }
 0x423   :  { %12965 = vst [vmem:[#allocation195_spill] sm:$0xff] %v10753_v52  ;;  %v12968_v52 = vld [vmem:[#allocation48_spill] sm:$0xff] }
 0x424   :  { %v10745_v15 = vpop.permute.xlu0 %6272  ;;  %v10758_v56 = vrot.slane %v5993_v22, %v7293_v61  ;;  %v10761_v49 = vrot.slane %v6025_v30, %v7293_v61  ;;  %v5145_v30 = vcombine.high %v12972_v47, %v12971_v63 }
 0x425   :  { %12964 = vst [vmem:[#allocation200_spill] sm:$0xff] %v10745_v15  ;;  %v12967_v15 = vld [vmem:[#allocation53_spill] sm:$0xff] }
 0x426   :  { %6500 = vrot.lane.b32.xlu0 %v5514_v21, %s6996_s30  ;;  %6438 = vrot.lane.b32.xlu1 %v5648_v32, %s6994_s28  ;;  %v10764_v21 = vrot.slane %v6128_v40, %v7293_v61  ;;  %v10767_v32 = vrot.slane %v6160_v9, %v7293_v61  ;;  %v5113_v33 = vcombine.high %v12968_v52, %v12967_v15  ;;  %v10779_v25 = vpop.permute.xlu1 %6218 }
 0x427   :  { %v5161_v40 = vcombine.high %v12974_v39, %v12973_v36  ;;  %12975 = vst [vmem:[#allocation86_spill] sm:$0xff] %v10779_v25  ;;  %v10796_v39 = vrot.slane %v5145_v30, %v7234_v57  ;;  %v5243_v52 = vcombine.high %v10622_v58, %v10631_v24  ;;  %v12981_v25 = vld [vmem:[#allocation98_spill] sm:$0xff] }
 0x428   :  { %v10755_v17 = vpop.permute.xlu0 %6276 }
 0x429   :  { %12966 = vst [vmem:[#allocation91_spill] sm:$0xff] %v10755_v17  ;;  %v12969_v17 = vld [vmem:[#allocation57_spill] sm:$0xff]  ;;  %v10799_v36 = vrot.slane %v5161_v40, %v7234_v57 }
 0x42a   :  { %6504 = vrot.lane.b32.xlu0 %v5786_v12, %s6996_s30  ;;  %6442 = vrot.lane.b32.xlu1 %v5920_v53, %s6994_s28  ;;  %v5129_v22 = vcombine.high %v12970_v42, %v12969_v17  ;;  %v6058_v12 = vcombine.low %v10758_v56, %v10761_v49  ;;  %v6192_v53 = vcombine.low %v10764_v21, %v10767_v32 }
 0x42b   :  { %v10790_v42 = vrot.slane %v5113_v33, %v7234_v57  ;;  %v5377_v33 = vcombine.high %v10634_v62, %v10643_v29  ;;  %v5385_v17 = vcombine.high %v12912_v0, %v12911_v27  ;;  %v5224_v24 = vcombine.low %v10796_v39, %v10799_v36 }
 0x42c   :  { %v10781_v9 = vpop.permute.xlu0 %6280  ;;  %v10793_v47 = vrot.slane %v5129_v22, %v7234_v57  ;;  %v12978_v22 = vld [vmem:[#allocation95_spill] sm:$0xff]  ;;  %v5313_v27 = vcombine.high %v10558_v6, %v10561_v3  ;;  %v5345_v0 = vcombine.high %v10564_v38, %v10571_v43  ;;  %v5649_v29 = vcombine.high %v10690_v55, %v10693_v14  ;;  %v12985_v6 = vld [vmem:[#allocation206_spill] sm:$0xff]  ;;  %v12986_v43 = vld [vmem:[#allocation201_spill] sm:$0xff] }
 0x42d   :  { %12976 = vst [vmem:[#allocation208_spill] sm:$0xff] %v10781_v9  ;;  %v12982_v9 = vld [vmem:[#allocation106_spill] sm:$0xff] }
 0x42e   :  { %6508 = vrot.lane.b32.xlu0 %v6058_v12, %s6996_s30  ;;  %6446 = vrot.lane.b32.xlu1 %v6192_v53, %s6994_s28  ;;  %v12979_v12 = vld [vmem:[#allocation88_spill] sm:$0xff]  ;;  %v12980_v53 = vld [vmem:[#allocation103_spill] sm:$0xff]  ;;  %v5192_v58 = vcombine.low %v10790_v42, %v10793_v47  ;;  %v12988_v55 = vld [vmem:[#allocation214_spill] sm:$0xff] }
 0x42f   :  { %v5401_v30 = vcombine.high %v12979_v12, %v12978_v22  ;;  %v5417_v40 = vcombine.high %v12981_v25, %v12980_v53  ;;  %v12989_v14 = vld [vmem:[#allocation210_spill] sm:$0xff]  ;;  %v12990_v22 = vld [vmem:[#allocation215_spill] sm:$0xff]  ;;  %v12991_v12 = vld [vmem:[#allocation213_spill] sm:$0xff] }
 0x430   :  { %v10801_v63 = vpop.permute.xlu1 %6222  ;;  %v10803_v15 = vpop.permute.xlu0 %6284  ;;  %v10858_v53 = vrot.slane %v5192_v58, %v7293_v61 }
 0x431   :  { %12977 = vst [vmem:[#allocation113_spill] sm:$0xff] %v10801_v63  ;;  %v5433_v63 = vcombine.high %v12983_v46, %v12982_v9  ;;  %v5515_v46 = vcombine.high %v10682_v31, %v10687_v51  ;;  %v10836_v9 = vrot.slane %v5385_v17, %v7234_v57  ;;  %v10842_v3 = vrot.slane %v5417_v40, %v7234_v57  ;;  %v12987_v31 = vld [vmem:[#allocation203_spill] sm:$0xff] }
 0x432   :  { %6528 = vrot.lane.b32.xlu0 %v5243_v52, %s6997_s2  ;;  %6466 = vrot.lane.b32.xlu1 %v5377_v33, %s6995_s29  ;;  %v10839_v52 = vrot.slane %v5401_v30, %v7234_v57  ;;  %v5657_v33 = vcombine.high %v12986_v43, %v12985_v6  ;;  %v5673_v51 = vcombine.high %v12987_v31, %v12922_v16 }
 0x433   :  { %v10845_v38 = vrot.slane %v5433_v63, %v7234_v57  ;;  %v5689_v17 = vcombine.high %v12989_v14, %v12988_v55  ;;  %v5705_v30 = vcombine.high %v12991_v12, %v12990_v22  ;;  %v5787_v16 = vcombine.high %v10726_v45, %v10729_v44  ;;  %v12998_v55 = vld [vmem:[#allocation174_spill] sm:$0xff]  ;;  %v12999_v14 = vld [vmem:[#allocation177_spill] sm:$0xff]  ;;  %v13000_v22 = vld [vmem:[#allocation172_spill] sm:$0xff] }
 0x434   :  { %v10827_v25 = vpop.permute.xlu1 %6242  ;;  %v10829_v62 = vpop.permute.xlu0 %6304  ;;  %v10872_v6 = vrot.slane %v5313_v27, %v7293_v61  ;;  %v5464_v58 = vcombine.low %v10836_v9, %v10839_v52  ;;  %v5585_v31 = vcombine.high %v10598_v11, %v10601_v10  ;;  %v10881_v45 = vrot.slane %v5345_v0, %v7293_v61  ;;  %v12994_v10 = vld [vmem:[#allocation228_spill] sm:$0xff]  ;;  %v12995_v27 = vld [vmem:[#allocation226_spill] sm:$0xff]  ;;  %v13001_v12 = vld [vmem:[#allocation175_spill] sm:$0xff] }
 0x435   :  { %12984 = vst [vmem:[#allocation109_spill] sm:$0xff] %v10827_v25  ;;  %v5496_v43 = vcombine.low %v10842_v3, %v10845_v38  ;;  %v10886_v44 = vrot.slane %v5657_v33, %v7234_v57  ;;  %v10897_v11 = vrot.slane %v5705_v30, %v7234_v57  ;;  %v5929_v0 = vcombine.high %v12995_v27, %v12994_v10 }
 0x436   :  { %6532 = vrot.lane.b32.xlu0 %v5515_v46, %s6997_s2  ;;  %6470 = vrot.lane.b32.xlu1 %v5649_v29, %s6995_s29  ;;  %v5921_v46 = vcombine.high %v10732_v8, %v10735_v2  ;;  %v10869_v29 = vrot.slane %v5224_v24, %v7293_v61  ;;  %v5617_v2 = vcombine.high %v10604_v20, %v10609_v37  ;;  %v12996_v20 = vld [vmem:[#allocation176_spill] sm:$0xff]  ;;  %v12997_v37 = vld [vmem:[#allocation227_spill] sm:$0xff] }
 0x437   :  { %v10889_v8 = vrot.slane %v5673_v51, %v7234_v57  ;;  %v10894_v24 = vrot.slane %v5689_v17, %v7234_v57  ;;  %v5945_v33 = vcombine.high %v12997_v37, %v12996_v20  ;;  %v5961_v51 = vcombine.high %v12999_v14, %v12998_v55 }
 0x438   :  { %v10860_v63 = vpop.permute.xlu1 %6246  ;;  %v10862_v40 = vpop.permute.xlu0 %6308  ;;  %v6059_v17 = vcombine.high %v10758_v56, %v10761_v49  ;;  %v6193_v30 = vcombine.high %v10764_v21, %v10767_v32  ;;  %v5244_v10 = vcombine.low %v10858_v53, %v10869_v29  ;;  %v5378_v27 = vcombine.low %v10872_v6, %v10881_v45 }
 0x439   :  { %12992 = vst [vmem:[#allocation117_spill] sm:$0xff] %v10860_v63  ;;  %12993 = vst [vmem:[#allocation111_spill] sm:$0xff] %v10862_v40  ;;  %v10920_v20 = vrot.slane %v5464_v58, %v7293_v61  ;;  %v10925_v37 = vrot.slane %v5496_v43, %v7293_v61  ;;  %v10928_v56 = vrot.slane %v5585_v31, %v7293_v61  ;;  %v13013_v40 = vld [vmem:[#allocation81_spill] sm:$0xff] }
 0x43a   :  { %6536 = vrot.lane.b32.xlu0 %v5787_v16, %s6997_s2  ;;  %6474 = vrot.lane.b32.xlu1 %v5921_v46, %s6995_s29  ;;  %v5977_v16 = vcombine.high %v13001_v12, %v13000_v22  ;;  %v10931_v49 = vrot.slane %v5617_v2, %v7293_v61  ;;  %v5736_v21 = vcombine.low %v10886_v44, %v10889_v8 }
 0x43b   :  { %v5768_v32 = vcombine.low %v10894_v24, %v10897_v11  ;;  %v5857_v58 = vcombine.high %v10648_v34, %v10651_v48  ;;  %v5889_v55 = vcombine.high %v10656_v18, %v10659_v13  ;;  %v10942_v43 = vrot.slane %v5929_v0, %v7234_v57 }
 0x43c   :  { %v10907_v63 = vpop.permute.xlu1 %6250  ;;  %v10909_v46 = vpop.permute.xlu0 %6312  ;;  %v10945_v31 = vrot.slane %v5945_v33, %v7234_v57  ;;  %v10948_v2 = vrot.slane %v5961_v51, %v7234_v57  ;;  %v10951_v14 = vrot.slane %v5977_v16, %v7234_v57  ;;  %v5516_v34 = vcombine.low %v10920_v20, %v10925_v37 }
 0x43d   :  { %13002 = vst [vmem:[#allocation220_spill] sm:$0xff] %v10907_v63  ;;  %13003 = vst [vmem:[#allocation221_spill] sm:$0xff] %v10909_v46  ;;  %v5650_v48 = vcombine.low %v10928_v56, %v10931_v49  ;;  %v10964_v18 = vrot.slane %v5736_v21, %v7293_v61  ;;  %v10967_v13 = vrot.slane %v5768_v32, %v7293_v61  ;;  %v13006_v21 = vld [vmem:[#allocation74_spill] sm:$0xff]  ;;  %v13009_v63 = vld [vmem:[#allocation73_spill] sm:$0xff] }
 0x43e   :  { %6540 = vrot.lane.b32.xlu0 %v6059_v17, %s6997_s2  ;;  %6478 = vrot.lane.b32.xlu1 %v6193_v30, %s6995_s29  ;;  %v10970_v0 = vrot.slane %v5857_v58, %v7293_v61  ;;  %v10973_v33 = vrot.slane %v5889_v55, %v7293_v61  ;;  %v6008_v51 = vcombine.low %v10942_v43, %v10945_v31  ;;  %v13007_v32 = vld [vmem:[#allocation70_spill] sm:$0xff]  ;;  %v13011_v46 = vld [vmem:[#allocation80_spill] sm:$0xff] }
 0x43f   :  { %v6040_v16 = vcombine.low %v10948_v2, %v10951_v14  ;;  %v6129_v17 = vcombine.high %v10704_v28, %v10707_v35  ;;  %v6161_v30 = vcombine.high %v10710_v23, %v10713_v5  ;;  %v5249_v58 = vcombine.high %v13007_v32, %v13006_v21  ;;  %v13008_v55 = vld [vmem:[#allocation78_spill] sm:$0xff]  ;;  %v13012_v35 = vld [vmem:[#allocation85_spill] sm:$0xff] }
 0x440   :  { %v10953_v22 = vpop.permute.xlu1 %6254  ;;  %v10955_v12 = vpop.permute.xlu0 %6316  ;;  %v5265_v25 = vcombine.high %v13009_v63, %v13008_v55  ;;  %v5297_v23 = vcombine.high %v13013_v40, %v13012_v35  ;;  %v5788_v5 = vcombine.low %v10964_v18, %v10967_v13  ;;  %v11006_v63 = vrot.slane %v6008_v51, %v7293_v61  ;;  %v13019_v35 = vld [vmem:[#allocation192_spill] sm:$0xff] }
 0x441   :  { %13004 = vst [vmem:[#allocation222_spill] sm:$0xff] %v10953_v22  ;;  %v13010_v22 = vld [vmem:[#allocation83_spill] sm:$0xff]  ;;  %v11015_v40 = vrot.slane %v6161_v30, %v7293_v61 }
 0x442   :  { %6560 = vrot.lane.b32.xlu0 %v5244_v10, %s6998_s3  ;;  %6498 = vrot.lane.b32.xlu1 %v5378_v27, %s6996_s30  ;;  %v5281_v28 = vcombine.high %v13011_v46, %v13010_v22  ;;  %v11012_v46 = vrot.slane %v6129_v17, %v7293_v61  ;;  %v11020_v22 = vrot.slane %v5249_v58, %v7234_v57 }
 0x443   :  { %v5537_v58 = vcombine.high %v12947_v1, %v12946_v41 }
 0x444   :  { %v10983_v10 = vpop.permute.xlu1 %6274  ;;  %v10985_v27 = vpop.permute.xlu0 %6336  ;;  %v11026_v51 = vrot.slane %v5281_v28, %v7234_v57  ;;  %v13018_v28 = vld [vmem:[#allocation194_spill] sm:$0xff] }
 0x445   :  { %13005 = vst [vmem:[#allocation53_spill] sm:$0xff] %v10983_v10  ;;  %v5922_v10 = vcombine.low %v10970_v0, %v10973_v33 }
 0x446   :  { %6564 = vrot.lane.b32.xlu0 %v5516_v34, %s6998_s3  ;;  %6502 = vrot.lane.b32.xlu1 %v5650_v48, %s6996_s30  ;;  %v11009_v34 = vrot.slane %v6040_v16, %v7293_v61  ;;  %v11023_v48 = vrot.slane %v5265_v25, %v7234_v57  ;;  %v11029_v16 = vrot.slane %v5297_v23, %v7234_v57 }
 0x447   :  { %v5521_v25 = vcombine.high %v12945_v54, %v12944_v26  ;;  %v5553_v23 = vcombine.high %v13019_v35, %v13018_v28 }
 0x448   :  { %v11001_v21 = vpop.permute.xlu1 %6278  ;;  %v11003_v32 = vpop.permute.xlu0 %6340  ;;  %v6060_v55 = vcombine.low %v11006_v63, %v11009_v34  ;;  %v5328_v54 = vcombine.low %v11020_v22, %v11023_v48  ;;  %v5360_v26 = vcombine.low %v11026_v51, %v11029_v16 }
 0x449   :  { %13014 = vst [vmem:[#allocation48_spill] sm:$0xff] %v11001_v21  ;;  %13015 = vst [vmem:[#allocation57_spill] sm:$0xff] %v11003_v32  ;;  %v13021_v21 = vld [vmem:[#allocation193_spill] sm:$0xff]  ;;  %v5225_v32 = vcombine.high %v10796_v39, %v10799_v36  ;;  %v11072_v39 = vrot.slane %v5553_v23, %v7234_v57 }
 0x44a   :  { %6568 = vrot.lane.b32.xlu0 %v5788_v5, %s6998_s3  ;;  %6506 = vrot.lane.b32.xlu1 %v5922_v10, %s6996_s30  ;;  %v6194_v10 = vcombine.low %v11012_v46, %v11015_v40  ;;  %v13020_v5 = vld [vmem:[#allocation198_spill] sm:$0xff] }
 0x44c   :  { %v11031_v17 = vpop.permute.xlu1 %6282  ;;  %v11033_v30 = vpop.permute.xlu0 %6344 }
 0x44d   :  { %13016 = vst [vmem:[#allocation171_spill] sm:$0xff] %v11031_v17  ;;  %13017 = vst [vmem:[#allocation65_spill] sm:$0xff] %v11033_v30  ;;  %v5569_v17 = vcombine.high %v13021_v21, %v13020_v5  ;;  %v5193_v30 = vcombine.high %v10790_v42, %v10793_v47  ;;  %v5379_v21 = vcombine.high %v10872_v6, %v10881_v45 }
 0x44e   :  { %6572 = vrot.lane.b32.xlu0 %v6060_v55, %s6998_s3  ;;  %6510 = vrot.lane.b32.xlu1 %v6194_v10, %s6996_s30  ;;  %v5245_v55 = vcombine.high %v10858_v53, %v10869_v29  ;;  %v11066_v42 = vrot.slane %v5521_v25, %v7234_v57  ;;  %v11069_v47 = vrot.slane %v5537_v58, %v7234_v57 }
 0x44f   :  { %v11075_v36 = vrot.slane %v5569_v17, %v7234_v57  ;;  %v5465_v6 = vcombine.high %v10836_v9, %v10839_v52  ;;  %v5497_v53 = vcombine.high %v10842_v3, %v10845_v38  ;;  %v11084_v29 = vrot.slane %v5193_v30, %v7293_v61  ;;  %v13022_v38 = vld [vmem:[#allocation216_spill] sm:$0xff] }
 0x450   :  { %v11057_v41 = vpop.permute.xlu1 %6286  ;;  %v11059_v1 = vpop.permute.xlu0 %6348  ;;  %v5651_v17 = vcombine.high %v10928_v56, %v10931_v49  ;;  %v5517_v25 = vcombine.high %v10920_v20, %v10925_v37  ;;  %v11095_v58 = vrot.slane %v5328_v54, %v7293_v61  ;;  %v11098_v9 = vrot.slane %v5225_v32, %v7293_v61  ;;  %v13023_v20 = vld [vmem:[#allocation217_spill] sm:$0xff]  ;;  %v13024_v32 = vld [vmem:[#allocation223_spill] sm:$0xff] }
 0x451   :  { %v5600_v52 = vcombine.low %v11066_v42, %v11069_v47  ;;  %v5632_v3 = vcombine.low %v11072_v39, %v11075_v36  ;;  %v5793_v30 = vcombine.high %v13022_v38, %v12954_v60  ;;  %v11107_v56 = vrot.slane %v5360_v26, %v7293_v61  ;;  %v13029_v38 = vld [vmem:[#allocation181_spill] sm:$0xff] }
 0x452   :  { %6530 = vrot.lane.b32.xlu1 %v5379_v21, %s6997_s2  ;;  %6592 = vrot.lane.b32.xlu0 %v5245_v55, %s6999_s4  ;;  %v5809_v37 = vcombine.high %v13023_v20, %v12956_v7  ;;  %v5825_v49 = vcombine.high %v12958_v50, %v9970_v4  ;;  %v5841_v28 = vcombine.high %v13024_v32, %v10021_v19  ;;  %v13030_v20 = vld [vmem:[#allocation202_spill] sm:$0xff]  ;;  %v13032_v32 = vld [vmem:[#allocation184_spill] sm:$0xff] }
 0x453   :  { %v11118_v60 = vrot.slane %v5465_v6, %v7293_v61  ;;  %v11121_v35 = vrot.slane %v5497_v53, %v7293_v61  ;;  %v5923_v4 = vcombine.high %v10970_v0, %v10973_v33  ;;  %v5789_v19 = vcombine.high %v10964_v18, %v10967_v13  ;;  %v13025_v33 = vld [vmem:[#allocation173_spill] sm:$0xff]  ;;  %v13026_v6 = vld [vmem:[#allocation187_spill] sm:$0xff] }
 0x454   :  { %v11086_v45 = vpop.permute.xlu1 %6306  ;;  %v11088_v10 = vpop.permute.xlu0 %6368  ;;  %v5246_v50 = vcombine.low %v11084_v29, %v11098_v9  ;;  %v11134_v5 = vrot.slane %v5793_v30, %v7234_v57  ;;  %v5380_v54 = vcombine.low %v11095_v58, %v11107_v56  ;;  %v11139_v26 = vrot.slane %v5600_v52, %v7293_v61  ;;  %v13027_v53 = vld [vmem:[#allocation169_spill] sm:$0xff] }
 0x455   :  { %v11142_v21 = vrot.slane %v5632_v3, %v7293_v61  ;;  %v11145_v0 = vrot.slane %v5809_v37, %v7234_v57  ;;  %v11148_v18 = vrot.slane %v5825_v49, %v7234_v57  ;;  %v11151_v13 = vrot.slane %v5841_v28, %v7234_v57  ;;  %v13028_v3 = vld [vmem:[#allocation209_spill] sm:$0xff]  ;;  %v13031_v37 = vld [vmem:[#allocation186_spill] sm:$0xff] }
 0x456   :  { %6534 = vrot.lane.b32.xlu1 %v5651_v17, %s6997_s2  ;;  %6596 = vrot.lane.b32.xlu0 %v5517_v25, %s6999_s4  ;;  %v6065_v55 = vcombine.high %v13025_v33, %v10443_v59  ;;  %v6081_v17 = vcombine.high %v13027_v53, %v13026_v6  ;;  %v6061_v25 = vcombine.high %v11006_v63, %v11009_v34  ;;  %v13033_v28 = vld [vmem:[#allocation218_spill] sm:$0xff] }
 0x457   :  { %v5518_v52 = vcombine.low %v11118_v60, %v11121_v35  ;;  %v6097_v30 = vcombine.high %v13029_v38, %v13028_v3  ;;  %v6113_v49 = vcombine.high %v13031_v37, %v13030_v20  ;;  %v6195_v63 = vcombine.high %v11012_v46, %v11015_v40  ;;  %v13037_v3 = vld [vmem:[#allocation207_spill] sm:$0xff] }
 0x458   :  { %v11123_v7 = vpop.permute.xlu1 %6310  ;;  %v11125_v23 = vpop.permute.xlu0 %6372  ;;  %v5737_v34 = vcombine.high %v10886_v44, %v10889_v8  ;;  %v5769_v53 = vcombine.high %v10894_v24, %v10897_v11  ;;  %v5652_v20 = vcombine.low %v11139_v26, %v11142_v21  ;;  %v5872_v37 = vcombine.low %v11134_v5, %v11145_v0  ;;  %v13038_v44 = vld [vmem:[#allocation189_spill] sm:$0xff]  ;;  %v13039_v8 = vld [vmem:[#allocation50_spill] sm:$0xff] }
 0x459   :  { %v13040_v24 = vld [vmem:[#allocation170_spill] sm:$0xff] }
 0x45a   :  { %6538 = vrot.lane.b32.xlu1 %v5923_v4, %s6997_s2  ;;  %6600 = vrot.lane.b32.xlu0 %v5789_v19, %s6999_s4  ;;  %v13034_v4 = vld [vmem:[#allocation219_spill] sm:$0xff]  ;;  %v13041_v11 = vcombine.low %v13039_v8, %v13040_v24  ;;  %v13044_v8 = vld [vmem:[#allocation185_spill] sm:$0xff]  ;;  %v13045_v24 = vld [vmem:[#allocation182_spill] sm:$0xff] }
 0x45b   :  { %v13035_v19 = vcombine.low %v13033_v28, %v13034_v4  ;;  %v11200_v28 = vrot.slane %v6065_v55, %v7234_v57  ;;  %v11203_v4 = vrot.slane %v6081_v17, %v7234_v57  ;;  %v13043_v17 = vld [vmem:[#allocation200_spill] sm:$0xff] }
 0x45c   :  { %v11172_v33 = vpop.permute.xlu1 %6314  ;;  %v11174_v6 = vpop.permute.xlu0 %6376  ;;  %v6680_v40 = vsel %vm3377_vm0, %v13041_v11, %v13038_v44  ;;  %v13046_v11 = vld [vmem:[#allocation183_spill] sm:$0xff] }
 0x45d   :  { %v6686_v59 = vsel %vm3377_vm0, %v13035_v19, %v13032_v32  ;;  %13036 = vst [vmem:[#allocation60_spill] sm:$0xff] %v11172_v33  ;;  %v5904_v32 = vcombine.low %v11148_v18, %v11151_v13 }
 0x45e   :  { %v6694_v38 = vsel %vm3386_vm1, %v6686_v59, %v13037_v3  ;;  %6542 = vrot.lane.b32.xlu1 %v6195_v63, %s6997_s2  ;;  %6604 = vrot.lane.b32.xlu0 %v6061_v25, %s6999_s4  ;;  %v11211_v25 = vrot.slane %v6113_v49, %v7234_v57  ;;  %v13042_v59 = vld [vmem:[#allocation180_spill] sm:$0xff] }
 0x45f   :  { %v6702_v46 = vsel %vm3395_vm2, %v6694_v38, %v10803_v15  ;;  %v11208_v15 = vrot.slane %v6097_v30, %v7234_v57  ;;  %v6688_v63 = vsel %vm3386_vm1, %v6680_v40, %v13042_v59  ;;  %v11225_v30 = vrot.slane %v5737_v34, %v7293_v61  ;;  %v13048_v40 = vld [vmem:[#allocation205_spill] sm:$0xff] }
 0x460   :  { %v6710_v19 = vsel %vm3404_vm3, %v6702_v46, %v10955_v12  ;;  %v11217_v55 = vpop.permute.xlu1 %6318  ;;  %v6381_v38 = vpop.permute.xlu0 %6380  ;;  %v6696_v44 = vsel %vm3395_vm2, %v6688_v63, %v13043_v17  ;;  %v11228_v57 = vrot.slane %v5769_v53, %v7293_v61  ;;  %v11238_v46 = vrot.slane %v5904_v32, %v7293_v61  ;;  %v13050_v63 = vld [vmem:[#allocation111_spill] sm:$0xff]  ;;  %v13051_v17 = vld [vmem:[#allocation188_spill] sm:$0xff] }
 0x461   :  { %v6718_v3 = vsel %vm3413_vm4, %v6710_v19, %v11059_v1  ;;  %v6704_v49 = vsel %vm3404_vm3, %v6696_v44, %v10829_v62  ;;  %v11235_v1 = vrot.slane %v5872_v37, %v7293_v61  ;;  %v6009_v34 = vcombine.high %v10942_v43, %v10945_v31  ;;  %v13049_v19 = vld [vmem:[#allocation91_spill] sm:$0xff]  ;;  %v13052_v44 = vld [vmem:[#allocation196_spill] sm:$0xff] }
 0x462   :  { %v11222_v12 = vsel %vm3422_vm5, %v6718_v3, %v6381_v38  ;;  %6562 = vrot.lane.b32.xlu1 %v5380_v54, %s6998_s3  ;;  %6624 = vrot.lane.b32.xlu0 %v5246_v50, %s7000_s5  ;;  %v6041_v53 = vcombine.high %v10948_v2, %v10951_v14  ;;  %v13047_v62 = vcombine.low %v13045_v24, %v13046_v11  ;;  %v13055_v11 = vld [vmem:[#allocation57_spill] sm:$0xff] }
 0x463   :  { %v6712_v50 = vsel %vm3413_vm4, %v6704_v49, %v10985_v27  ;;  %v6144_v37 = vcombine.low %v11200_v28, %v11203_v4  ;;  %v6176_v32 = vcombine.low %v11208_v15, %v11211_v25  ;;  %v5924_v38 = vcombine.low %v11235_v1, %v11238_v46  ;;  %v13053_v49 = vld [vmem:[#allocation197_spill] sm:$0xff] }
 0x464   :  { %v6682_v54 = vsel %vm3377_vm0, %v13047_v62, %v13044_v8  ;;  %v6720_v31 = vsel %vm3422_vm5, %v6712_v50, %v11088_v10  ;;  %v11259_v2 = vpop.permute.xlu1 %6338  ;;  %v6401_v14 = vpop.permute.xlu0 %6400  ;;  %v5790_v10 = vcombine.low %v11225_v30, %v11228_v57  ;;  %v13054_v8 = vcombine.low %v13052_v44, %v13053_v49  ;;  %v13062_v49 = vld [vmem:[#allocation102_spill] sm:$0xff] }
 0x465   :  { %v6690_v43 = vsel %vm3386_vm1, %v6682_v54, %v13048_v40  ;;  %v11264_v27 = vsel %vm3431_vm6, %v6720_v31, %v6401_v14  ;;  %v11282_v54 = vrot.slane %v6009_v34, %v7293_v61  ;;  %v11294_v14 = vrot.slane %v6144_v37, %v7293_v61  ;;  %v13057_v34 = vld [vmem:[#allocation92_spill] sm:$0xff] }
 0x466   :  { %v6698_v59 = vsel %vm3395_vm2, %v6690_v43, %v13049_v19  ;;  %6566 = vrot.lane.b32.xlu1 %v5652_v20, %s6998_s3  ;;  %6628 = vrot.lane.b32.xlu0 %v5518_v52, %s7000_s5  ;;  %v6684_v24 = vsel %vm3377_vm0, %v13054_v8, %v13051_v17  ;;  %v11285_v52 = vrot.slane %v6041_v53, %v7293_v61  ;;  %v13056_v20 = vld [vmem:[#allocation199_spill] sm:$0xff]  ;;  %v13061_v17 = vld [vmem:[#allocation208_spill] sm:$0xff]  ;;  %v13063_v8 = vld [vmem:[#allocation93_spill] sm:$0xff] }
 0x467   :  { %v6706_v3 = vsel %vm3404_vm3, %v6698_v59, %v13050_v63  ;;  %v6692_v50 = vsel %vm3386_vm1, %v6684_v24, %v13056_v20  ;;  %v11297_v19 = vrot.slane %v6176_v32, %v7293_v61  ;;  %v13058_v59 = vld [vmem:[#allocation55_spill] sm:$0xff]  ;;  %v13059_v63 = vld [vmem:[#allocation56_spill] sm:$0xff]  ;;  %v13064_v24 = vld [vmem:[#allocation94_spill] sm:$0xff] }
 0x468   :  { %v6714_v62 = vsel %vm3413_vm4, %v6706_v3, %v13055_v11  ;;  %v11291_v43 = vpop.permute.xlu1 %6342  ;;  %v6405_v31 = vpop.permute.xlu0 %6404  ;;  %v13060_v53 = vcombine.low %v13058_v59, %v13059_v63  ;;  %v6700_v44 = vsel %vm3395_vm2, %v6692_v50, %v13061_v17  ;;  %v13065_v37 = vcombine.low %v13063_v8, %v13064_v24  ;;  %v13066_v32 = vld [vmem:[#allocation110_spill] sm:$0xff]  ;;  %v13068_v20 = vld [vmem:[#allocation125_spill] sm:$0xff] }
 0x469   :  { %v6722_v40 = vsel %vm3422_vm5, %v6714_v62, %v11125_v23  ;;  %v13067_v62 = vld [vmem:[#allocation124_spill] sm:$0xff]  ;;  %v13071_v50 = vld [vmem:[#allocation97_spill] sm:$0xff] }
 0x46a   :  { %v3378_v3 = vsel %vm3377_vm0, %v13060_v53, %v13057_v34  ;;  %v11307_v23 = vsel %vm3431_vm6, %v6722_v40, %v6405_v31  ;;  %v3380_v11 = vsel %vm3377_vm0, %v13065_v37, %v13062_v49  ;;  %v13069_v33 = vcombine.low %v13067_v62, %v13068_v20  ;;  %v13070_v34 = vld [vmem:[#allocation221_spill] sm:$0xff]  ;;  %6570 = vrot.lane.b32.xlu1 %v5924_v38, %s6998_s3  ;;  %v13072_v40 = vld [vmem:[#allocation146_spill] sm:$0xff]  ;;  %v13073_v31 = vld [vmem:[#allocation147_spill] sm:$0xff] }
 0x46b   :  { %v6708_v63 = vsel %vm3404_vm3, %v6700_v44, %v13070_v34  ;;  %6632 = vrot.lane.b32.xlu0 %v5790_v10, %s7000_s5  ;;  %v13074_v53 = vcombine.low %v13072_v40, %v13073_v31  ;;  %v13075_v49 = vld [vmem:[#allocation136_spill] sm:$0xff]  ;;  %v13076_v24 = vld [vmem:[#allocation65_spill] sm:$0xff]  ;;  %v6196_v37 = vcombine.low %v11294_v14, %v11297_v19  ;;  %v13078_v20 = vld [vmem:[#allocation126_spill] sm:$0xff] }
 0x46c   :  { %v3382_v59 = vsel %vm3377_vm0, %v13069_v33, %v13066_v32  ;;  %v3387_v8 = vsel %vm3386_vm1, %v3378_v3, %v13075_v49  ;;  %v6716_v33 = vsel %vm3413_vm4, %v6708_v63, %v13076_v24  ;;  %v11334_v38 = vpop.permute.xlu1 %6346  ;;  %v6409_v10 = vpop.permute.xlu0 %6408  ;;  %v6062_v32 = vcombine.low %v11282_v54, %v11285_v52  ;;  %v13077_v62 = vld [vmem:[#allocation133_spill] sm:$0xff]  ;;  %v13079_v63 = vld [vmem:[#allocation134_spill] sm:$0xff]  ;;  %v13082_v24 = vld [vmem:[#allocation84_spill] sm:$0xff] }
 0x46d   :  { %v3384_v17 = vsel %vm3377_vm0, %v13074_v53, %v13071_v50  ;;  %v6724_v44 = vsel %vm3422_vm5, %v6716_v33, %v11174_v6  ;;  %v3389_v3 = vsel %vm3386_vm1, %v3380_v11, %v13077_v62  ;;  %v3391_v34 = vsel %vm3386_vm1, %v3382_v59, %v13078_v20  ;;  %v13080_v40 = vld [vmem:[#allocation145_spill] sm:$0xff]  ;;  %v13081_v53 = vld [vmem:[#allocation128_spill] sm:$0xff] }
 0x46e   :  { %v3393_v50 = vsel %vm3386_vm1, %v3384_v17, %v13079_v63  ;;  %v11347_v6 = vsel %vm3431_vm6, %v6724_v44, %v6409_v10  ;;  %v3396_v31 = vsel %vm3395_vm2, %v3387_v8, %v13080_v40  ;;  %v3398_v49 = vsel %vm3395_vm2, %v3389_v3, %v13081_v53  ;;  %6574 = vrot.lane.b32.xlu1 %v6196_v37, %s6998_s3  ;;  %v13083_v11 = vld [vmem:[#allocation132_spill] sm:$0xff]  ;;  %v13084_v17 = vld [vmem:[#allocation141_spill] sm:$0xff]  ;;  %v13088_v63 = vld [vmem:[#allocation47_spill] sm:$0xff] }
 0x46f   :  { %v3400_v33 = vsel %vm3395_vm2, %v3391_v34, %v13082_v24  ;;  %6636 = vrot.lane.b32.xlu0 %v6062_v32, %s7000_s5  ;;  %v3402_v59 = vsel %vm3395_vm2, %v3393_v50, %v13083_v11  ;;  %v3405_v44 = vsel %vm3404_vm3, %v3396_v31, %v13084_v17  ;;  %v13085_v10 = vld [vmem:[#allocation116_spill] sm:$0xff]  ;;  %v13087_v20 = vld [vmem:[#allocation41_spill] sm:$0xff]  ;;  %v5381_v50 = vcombine.high %v11095_v58, %v11107_v56  ;;  %v13090_v24 = vld [vmem:[#allocation39_spill] sm:$0xff] }
 0x470   :  { %v3407_v8 = vsel %vm3404_vm3, %v3398_v49, %v13085_v10  ;;  %v13086_v62 = vld [vmem:[#allocation148_spill] sm:$0xff]  ;;  %v3411_v34 = vsel %vm3404_vm3, %v3402_v59, %v13087_v20  ;;  %v3414_v37 = vsel %vm3413_vm4, %v3405_v44, %v13088_v63  ;;  %v11369_v40 = vpop.permute.xlu1 %6350  ;;  %v6413_v32 = vpop.permute.xlu0 %6412  ;;  %v5247_v31 = vcombine.high %v11084_v29, %v11098_v9  ;;  %v13089_v53 = vld [vmem:[#allocation49_spill] sm:$0xff]  ;;  %v13091_v11 = vld [vmem:[#allocation87_spill] sm:$0xff] }
 0x471   :  { %v3409_v3 = vsel %vm3404_vm3, %v3400_v33, %v13086_v62  ;;  %v3416_v49 = vsel %vm3413_vm4, %v3407_v8, %v13089_v53  ;;  %v3420_v59 = vsel %vm3413_vm4, %v3411_v34, %v13091_v11  ;;  %v11383_v17 = vsel %vm3431_vm6, %v11222_v12, %v6413_v32  ;;  %v13092_v44 = vld [vmem:[#allocation100_spill] sm:$0xff]  ;;  %v13094_v29 = vld [vmem:[#allocation127_spill] sm:$0xff]  ;;  %v13095_v8 = vld [vmem:[#allocation142_spill] sm:$0xff] }
 0x472   :  { %v3418_v33 = vsel %vm3413_vm4, %v3409_v3, %v13090_v24  ;;  %v3423_v10 = vsel %vm3422_vm5, %v3414_v37, %v13092_v44  ;;  %v13093_v58 = vld [vmem:[#allocation104_spill] sm:$0xff]  ;;  %6594 = vrot.lane.b32.xlu1 %v5381_v50, %s6999_s4  ;;  %v3429_v62 = vsel %vm3422_vm5, %v3420_v59, %v13095_v8  ;;  %v13096_v3 = vld [vmem:[#allocation158_spill] sm:$0xff]  ;;  %v13097_v20 = vld [vmem:[#allocation59_spill] sm:$0xff]  ;;  %v5519_v11 = vcombine.high %v11118_v60, %v11121_v35 }
 0x473   :  { %v3425_v56 = vsel %vm3422_vm5, %v3416_v49, %v13093_v58  ;;  %v3427_v9 = vsel %vm3422_vm5, %v3418_v33, %v13094_v29  ;;  %6656 = vrot.lane.b32.xlu0 %v5247_v31, %s7001_s6  ;;  %v3432_v12 = vsel %vm3431_vm6, %v3423_v10, %v13096_v3  ;;  %v13098_v63 = vld [vmem:[#allocation66_spill] sm:$0xff]  ;;  %v13099_v32 = vld [vmem:[#allocation69_spill] sm:$0xff]  ;;  %v5653_v33 = vcombine.high %v11139_v26, %v11142_v21  ;;  %v13102_v10 = vld [vmem:[#allocation72_spill] sm:$0xff] }
 0x474   :  { %v3434_v34 = vsel %vm3431_vm6, %v3425_v56, %v13097_v20  ;;  %v3436_v37 = vsel %vm3431_vm6, %v3427_v9, %v13098_v63  ;;  %v3438_v53 = vsel %vm3431_vm6, %v3429_v62, %v13099_v32  ;;  %v13100_v49 = vld [vmem:[#allocation58_spill] sm:$0xff]  ;;  %v11405_v24 = vpop.permute.xlu1 %6370  ;;  %v6433_v31 = vpop.permute.xlu0 %6432  ;;  %v13101_v59 = vld [vmem:[#allocation61_spill] sm:$0xff]  ;;  %v13103_v56 = vld [vmem:[#allocation75_spill] sm:$0xff] }
 0x475   :  { %v3441_v50 = vsel %vm3440_vm7, %v3432_v12, %v13100_v49  ;;  %v3443_v44 = vsel %vm3440_vm7, %v3434_v34, %v13101_v59  ;;  %v3445_v58 = vsel %vm3440_vm7, %v3436_v37, %v13102_v10  ;;  %v3447_v29 = vsel %vm3440_vm7, %v3438_v53, %v13103_v56  ;;  %v13104_v8 = vld [vmem:[#allocation108_spill] sm:$0xff]  ;;  %v13105_v26 = vld [vmem:[#allocation121_spill] sm:$0xff]  ;;  %v13106_v60 = vld [vmem:[#allocation123_spill] sm:$0xff] }
 0x476   :  { %v11419_v9 = vsel %vm3440_vm7, %v11264_v27, %v6433_v31  ;;  %v3450_v62 = vsel %vm3449_vm8, %v3441_v50, %v13104_v8  ;;  %v3452_v21 = vsel %vm3449_vm8, %v3443_v44, %v13105_v26  ;;  %v3454_v35 = vsel %vm3449_vm8, %v3445_v58, %v13106_v60  ;;  %6598 = vrot.lane.b32.xlu1 %v5653_v33, %s6999_s4  ;;  %v13107_v3 = vld [vmem:[#allocation143_spill] sm:$0xff]  ;;  %v13108_v20 = vld [vmem:[#allocation153_spill] sm:$0xff]  ;;  %v13109_v34 = vld [vmem:[#allocation152_spill] sm:$0xff] }
 0x477   :  { %6660 = vrot.lane.b32.xlu0 %v5519_v11, %s7001_s6  ;;  %v3456_v12 = vsel %vm3449_vm8, %v3447_v29, %v13107_v3  ;;  %v3459_v27 = vsel %vm3458_vm9, %v3450_v62, %v13108_v20  ;;  %v3461_v63 = vsel %vm3458_vm9, %v3452_v21, %v13109_v34  ;;  %v5329_v37 = vcombine.high %v11020_v22, %v11023_v48  ;;  %v13110_v32 = vld [vmem:[#allocation63_spill] sm:$0xff]  ;;  %v13112_v22 = vld [vmem:[#allocation105_spill] sm:$0xff]  ;;  %v13116_v29 = vld [vmem:[#allocation14_spill] sm:$0xff] }
 0x478   :  { %v3463_v53 = vsel %vm3458_vm9, %v3454_v35, %v13110_v32  ;;  %v5361_v49 = vcombine.high %v11026_v51, %v11029_v16  ;;  %v11441_v50 = vpop.permute.xlu1 %6374  ;;  %v6437_v31 = vpop.permute.xlu0 %6436  ;;  %v5925_v33 = vcombine.high %v11235_v1, %v11238_v46  ;;  %v5791_v11 = vcombine.high %v11225_v30, %v11228_v57  ;;  %v13111_v59 = vld [vmem:[#allocation107_spill] sm:$0xff]  ;;  %v13113_v10 = vld [vmem:[#allocation5_spill] sm:$0xff]  ;;  %v13114_v16 = vld [vmem:[#allocation8_spill] sm:$0xff] }
 0x479   :  { %v11449_v44 = vsel %vm3458_vm9, %v3456_v12, %v13111_v59  ;;  %v3468_v48 = vsel %vm3467_vm10, %v3459_v27, %v13112_v22  ;;  %v3470_v58 = vsel %vm3467_vm10, %v3461_v63, %v13113_v10  ;;  %v11457_v51 = vsel %vm3440_vm7, %v11307_v23, %v6437_v31  ;;  %v13115_v46 = vld [vmem:[#allocation12_spill] sm:$0xff]  ;;  %v13120_v21 = vld [vmem:[#allocation225_spill] sm:$0xff]  ;;  %v13123_v63 = vld [vmem:[#allocation22_spill] sm:$0xff] }
 0x47a   :  { %v3472_v1 = vsel %vm3467_vm10, %v3463_v53, %v13114_v16  ;;  %v5601_v30 = vcombine.high %v11066_v42, %v11069_v47  ;;  %v5633_v57 = vcombine.high %v11072_v39, %v11075_v36  ;;  %6602 = vrot.lane.b32.xlu1 %v5925_v33, %s6999_s4  ;;  %v3477_v56 = vsel %vm3476_vm11, %v3468_v48, %v13115_v46  ;;  %v13117_v8 = vld [vmem:[#allocation16_spill] sm:$0xff]  ;;  %v13118_v42 = vld [vmem:[#allocation113_spill] sm:$0xff]  ;;  %v13124_v32 = vld [vmem:[#allocation222_spill] sm:$0xff] }
 0x47b   :  { %6664 = vrot.lane.b32.xlu0 %v5791_v11, %s7001_s6  ;;  %v3479_v23 = vsel %vm3476_vm11, %v3470_v58, %v13116_v29  ;;  %v3481_v62 = vsel %vm3476_vm11, %v3472_v1, %v13117_v8  ;;  %v11474_v26 = vrot.slane %v5329_v37, %v7293_v61  ;;  %v13119_v47 = vld [vmem:[#allocation224_spill] sm:$0xff]  ;;  %v6197_v3 = vcombine.high %v11294_v14, %v11297_v19  ;;  %v13126_v33 = vld [vmem:[#allocation178_spill] sm:$0xff]  ;;  %v13127_v11 = vld [vmem:[#allocation179_spill] sm:$0xff] }
 0x47c   :  { %v13121_v39 = vcombine.low %v13119_v47, %v13120_v21  ;;  %v11481_v60 = vpop.permute.xlu1 %6378  ;;  %v6441_v35 = vpop.permute.xlu0 %6440  ;;  %v6063_v12 = vcombine.high %v11282_v54, %v11285_v52  ;;  %v11488_v20 = vrot.slane %v5361_v49, %v7293_v61  ;;  %v13122_v27 = vld [vmem:[#allocation20_spill] sm:$0xff]  ;;  %v3488_v37 = vsel %vm3485_vm12, %v3479_v23, %v13123_v63  ;;  %v13129_v48 = vld [vmem:[#allocation161_spill] sm:$0xff]  ;;  %v13133_v29 = vld [vmem:[#allocation162_spill] sm:$0xff] }
 0x47d   :  { %v3486_v34 = vsel %vm3485_vm12, %v3477_v56, %v13122_v27  ;;  %v11498_v31 = vsel %vm3440_vm7, %v11347_v6, %v6441_v35  ;;  %v11505_v52 = vrot.slane %v5601_v30, %v7293_v61  ;;  %v11508_v14 = vrot.slane %v5633_v57, %v7293_v61  ;;  %v13125_v49 = vld [vmem:[#allocation204_spill] sm:$0xff]  ;;  %v13130_v58 = vld [vmem:[#allocation109_spill] sm:$0xff]  ;;  %v13135_v47 = vld [vmem:[#allocation190_spill] sm:$0xff] }
 0x47e   :  { %v6687_v36 = vsel %vm3377_vm0, %v13121_v39, %v13118_v42  ;;  %6606 = vrot.lane.b32.xlu1 %v6197_v3, %s6999_s4  ;;  %v5873_v19 = vcombine.high %v11134_v5, %v11145_v0  ;;  %v5905_v6 = vcombine.high %v11148_v18, %v11151_v13  ;;  %v3495_v10 = vsel %vm3494_vm13, %v3486_v34, %v13129_v48  ;;  %v13131_v1 = vld [vmem:[#allocation165_spill] sm:$0xff]  ;;  %v13134_v42 = vld [vmem:[#allocation195_spill] sm:$0xff]  ;;  %v13148_v48 = vld [vmem:[#allocation220_spill] sm:$0xff] }
 0x47f   :  { %v6695_v53 = vsel %vm3386_vm1, %v6687_v36, %v13124_v32  ;;  %6668 = vrot.lane.b32.xlu0 %v6063_v12, %s7001_s6  ;;  %v5382_v13 = vcombine.low %v11474_v26, %v11488_v20  ;;  %v11531_v30 = vsel %vm3503_vm14, %v3495_v10, %v13131_v1  ;;  %v13132_v57 = vld [vmem:[#allocation53_spill] sm:$0xff]  ;;  %v5654_v8 = vcombine.low %v11505_v52, %v11508_v14  ;;  %v13136_v21 = vld [vmem:[#allocation191_spill] sm:$0xff]  ;;  %v13139_v32 = vld [vmem:[#allocation166_spill] sm:$0xff] }
 0x480   :  { %v6703_v54 = vsel %vm3395_vm2, %v6695_v53, %v11057_v41  ;;  %v13128_v41 = vcombine.low %v13126_v33, %v13127_v11  ;;  %v6383_v0 = vpop.permute.xlu1 %6382  ;;  %v6445_v18 = vpop.permute.xlu0 %6444  ;;  %v13137_v39 = vcombine.low %v13135_v47, %v13136_v21  ;;  %v11558_v35 = vrot.slane %v5905_v6, %v7293_v61  ;;  %v13138_v27 = vld [vmem:[#allocation117_spill] sm:$0xff]  ;;  %v13142_v6 = vld [vmem:[#allocation159_spill] sm:$0xff]  ;;  %v13154_v21 = vld [vmem:[#allocation164_spill] sm:$0xff] }
 0x481   :  { %v6711_v22 = vsel %vm3404_vm3, %v6703_v54, %v11217_v55  ;;  %v6742_v56 = vsel %vm3440_vm7, %v11383_v17, %v6445_v18  ;;  %v6145_v3 = vcombine.high %v11200_v28, %v11203_v4  ;;  %v6177_v12 = vcombine.high %v11208_v15, %v11211_v25  ;;  %v13140_v54 = vld [vmem:[#allocation48_spill] sm:$0xff]  ;;  %v13141_v15 = vld [vmem:[#allocation10_spill] sm:$0xff]  ;;  %v13143_v33 = vld [vmem:[#allocation163_spill] sm:$0xff] }
 0x482   :  { %v6681_v59 = vsel %vm3377_vm0, %v13128_v41, %v13125_v49  ;;  %v6719_v5 = vsel %vm3413_vm4, %v6711_v22, %v11369_v40  ;;  %v3497_v40 = vsel %vm3494_vm13, %v3488_v37, %v13133_v29  ;;  %6626 = vrot.lane.b32.xlu1 %v5382_v13, %s7000_s5  ;;  %v6683_v17 = vsel %vm3377_vm0, %v13137_v39, %v13134_v42  ;;  %v13144_v41 = vld [vmem:[#allocation86_spill] sm:$0xff]  ;;  %v13149_v13 = vld [vmem:[#allocation167_spill] sm:$0xff] }
 0x483   :  { %v6689_v16 = vsel %vm3386_vm1, %v6681_v59, %v13130_v58  ;;  %v6727_v46 = vsel %vm3422_vm5, %v6719_v5, %v6383_v0  ;;  %6808 = vrot.lane.b32.xlu0 %v11531_v30, %s7002_s7  ;;  %v6691_v34 = vsel %vm3386_vm1, %v6683_v17, %v13138_v27  ;;  %v11570_v53 = vsel %vm3503_vm14, %v3497_v40, %v13139_v32  ;;  %v13146_v59 = vld [vmem:[#allocation212_spill] sm:$0xff]  ;;  %v13150_v1 = vld [vmem:[#allocation171_spill] sm:$0xff]  ;;  %v13151_v29 = vld [vmem:[#allocation18_spill] sm:$0xff] }
 0x484   :  { %v6697_v55 = vsel %vm3395_vm2, %v6689_v16, %v13132_v57  ;;  %v6403_v37 = vpop.permute.xlu1 %6402  ;;  %v3474_v25 = vsel %vm3467_vm10, %v11449_v44, %v13141_v15  ;;  %v11603_v0 = vrot.slane %v6145_v3, %v7293_v61  ;;  %v11606_v18 = vrot.slane %v6177_v12, %v7293_v61  ;;  %v13155_v12 = vld [vmem:[#allocation168_spill] sm:$0xff]  ;;  %v13158_v15 = vld [vmem:[#allocation77_spill] sm:$0xff] }
 0x485   :  { %v6705_v23 = vsel %vm3404_vm3, %v6697_v55, %v11086_v45  ;;  %v11555_v45 = vrot.slane %v5873_v19, %v7293_v61  ;;  %v6699_v19 = vsel %vm3395_vm2, %v6691_v34, %v13140_v54  ;;  %v3483_v40 = vsel %vm3476_vm11, %v3474_v25, %v13151_v29  ;;  %v13153_v61 = vld [vmem:[#allocation160_spill] sm:$0xff]  ;;  %v13156_v54 = vld [vmem:[#allocation131_spill] sm:$0xff] }
 0x486   :  { %v6713_v36 = vsel %vm3413_vm4, %v6705_v23, %v11259_v2  ;;  %v6465_v2 = vpop.permute.xlu0 %6464  ;;  %v6707_v49 = vsel %vm3404_vm3, %v6699_v19, %v11123_v7  ;;  %6630 = vrot.lane.b32.xlu1 %v5654_v8, %s7000_s5  ;;  %v13152_v23 = vld [vmem:[#allocation60_spill] sm:$0xff]  ;;  %v3492_v42 = vsel %vm3485_vm12, %v3483_v40, %v13153_v61  ;;  %v6198_v3 = vcombine.low %v11603_v0, %v11606_v18 }
 0x487   :  { %v6721_v63 = vsel %vm3422_vm5, %v6713_v36, %v11405_v24  ;;  %v6744_v4 = vsel %vm3449_vm8, %v11419_v9, %v6465_v2  ;;  %v3490_v24 = vsel %vm3485_vm12, %v3481_v62, %v13142_v6  ;;  %6812 = vrot.lane.b32.xlu0 %v11570_v53, %s7002_s7  ;;  %v13145_v9 = vld [vmem:[#allocation211_spill] sm:$0xff]  ;;  %v6715_v62 = vsel %vm3413_vm4, %v6707_v49, %v11291_v43  ;;  %v13157_v19 = vld [vmem:[#allocation76_spill] sm:$0xff] }
 0x488   :  { %v6729_v28 = vsel %vm3431_vm6, %v6721_v63, %v6403_v37  ;;  %v3499_v11 = vsel %vm3494_vm13, %v3490_v24, %v13143_v33  ;;  %v13147_v22 = vcombine.low %v13145_v9, %v13146_v59  ;;  %v5926_v7 = vcombine.low %v11555_v45, %v11558_v35  ;;  %v6407_v16 = vpop.permute.xlu1 %6406  ;;  %v13160_v6 = vld [vmem:[#allocation135_spill] sm:$0xff]  ;;  %v13163_v59 = vld [vmem:[#allocation149_spill] sm:$0xff]  ;;  %v13175_v61 = vld [vmem:[#allocation68_spill] sm:$0xff] }
 0x489   :  { %v6723_v58 = vsel %vm3422_vm5, %v6715_v62, %v11441_v50  ;;  %v11610_v43 = vsel %vm3503_vm14, %v3499_v11, %v13149_v13  ;;  %v5383_v37 = vcombine.high %v11474_v26, %v11488_v20  ;;  %v5655_v26 = vcombine.high %v11505_v52, %v11508_v14  ;;  %v13161_v20 = vld [vmem:[#allocation36_spill] sm:$0xff]  ;;  %v13173_v13 = vld [vmem:[#allocation71_spill] sm:$0xff] }
 0x48a   :  { %v6685_v44 = vsel %vm3377_vm0, %v13147_v22, %v13144_v41  ;;  %v6469_v5 = vpop.permute.xlu0 %6468  ;;  %v6731_v55 = vsel %vm3431_vm6, %v6723_v58, %v6407_v16  ;;  %6634 = vrot.lane.b32.xlu1 %v5926_v7, %s7000_s5  ;;  %v13162_v41 = vld [vmem:[#allocation82_spill] sm:$0xff]  ;;  %v13167_v14 = vld [vmem:[#allocation140_spill] sm:$0xff]  ;;  %v13172_v16 = vld [vmem:[#allocation137_spill] sm:$0xff]  ;;  %v5927_v40 = vcombine.high %v11555_v45, %v11558_v35 }
 0x48b   :  { %v6693_v10 = vsel %vm3386_vm1, %v6685_v44, %v13148_v48  ;;  %v6746_v50 = vsel %vm3449_vm8, %v11457_v51, %v6469_v5  ;;  %6816 = vrot.lane.b32.xlu0 %v11610_v43, %s7002_s7  ;;  %v3501_v51 = vsel %vm3494_vm13, %v3492_v42, %v13154_v21  ;;  %v13164_v22 = vld [vmem:[#allocation114_spill] sm:$0xff]  ;;  %v13165_v44 = vld [vmem:[#allocation115_spill] sm:$0xff]  ;;  %v13179_v35 = vld [vmem:[#allocation45_spill] sm:$0xff] }
 0x48c   :  { %v6701_v57 = vsel %vm3395_vm2, %v6693_v10, %v13150_v1  ;;  %v6411_v17 = vpop.permute.xlu1 %6410  ;;  %v11636_v27 = vsel %vm3503_vm14, %v3501_v51, %v13155_v12  ;;  %v13166_v62 = vcombine.low %v13164_v22, %v13165_v44  ;;  %v13168_v48 = vld [vmem:[#allocation122_spill] sm:$0xff]  ;;  %v13170_v10 = vld [vmem:[#allocation139_spill] sm:$0xff] }
 0x48d   :  { %v6709_v8 = vsel %vm3404_vm3, %v6701_v57, %v13152_v23  ;;  %v13174_v23 = vld [vmem:[#allocation43_spill] sm:$0xff]  ;;  %v13176_v51 = vld [vmem:[#allocation118_spill] sm:$0xff] }
 0x48e   :  { %v6717_v47 = vsel %vm3413_vm4, %v6709_v8, %v11334_v38  ;;  %v6473_v36 = vpop.permute.xlu0 %6472  ;;  %6638 = vrot.lane.b32.xlu1 %v6198_v3, %s7000_s5  ;;  %v3381_v52 = vsel %vm3377_vm0, %v13166_v62, %v13163_v59  ;;  %v13178_v3 = vld [vmem:[#allocation144_spill] sm:$0xff]  ;;  %v13187_v59 = vld [vmem:[#allocation79_spill] sm:$0xff]  ;;  %v13188_v22 = vld [vmem:[#allocation154_spill] sm:$0xff] }
 0x48f   :  { %v6725_v39 = vsel %vm3422_vm5, %v6717_v47, %v11481_v60  ;;  %v6748_v38 = vsel %vm3449_vm8, %v11498_v31, %v6473_v36  ;;  %6820 = vrot.lane.b32.xlu0 %v11636_v27, %s7002_s7  ;;  %v13159_v31 = vcombine.low %v13157_v19, %v13158_v15  ;;  %v3390_v5 = vsel %vm3386_vm1, %v3381_v52, %v13172_v16  ;;  %v13183_v19 = vld [vmem:[#allocation51_spill] sm:$0xff] }
 0x490   :  { %v6733_v34 = vsel %vm3431_vm6, %v6725_v39, %v6411_v17  ;;  %v6415_v60 = vpop.permute.xlu1 %6414  ;;  %v3399_v8 = vsel %vm3395_vm2, %v3390_v5, %v13174_v23  ;;  %v13177_v17 = vld [vmem:[#allocation90_spill] sm:$0xff]  ;;  %v13189_v44 = vld [vmem:[#allocation155_spill] sm:$0xff]  ;;  %v13197_v5 = vld [vmem:[#allocation29_spill] sm:$0xff] }
 0x491   :  { %v6735_v2 = vsel %vm3431_vm6, %v6727_v46, %v6415_v60  ;;  %v3379_v25 = vsel %vm3377_vm0, %v13159_v31, %v13156_v54  ;;  %v3408_v36 = vsel %vm3404_vm3, %v3399_v8, %v13177_v17  ;;  %v13180_v60 = vld [vmem:[#allocation156_spill] sm:$0xff]  ;;  %v13184_v31 = vld [vmem:[#allocation11_spill] sm:$0xff]  ;;  %v13190_v62 = vcombine.low %v13188_v22, %v13189_v44  ;;  %v13200_v23 = vld [vmem:[#allocation13_spill] sm:$0xff] }
 0x492   :  { %v6477_v63 = vpop.permute.xlu0 %6476  ;;  %6658 = vrot.lane.b32.xlu1 %v5383_v37, %s7001_s6  ;;  %v3388_v24 = vsel %vm3386_vm1, %v3379_v25, %v13160_v6  ;;  %v13182_v37 = vld [vmem:[#allocation96_spill] sm:$0xff]  ;;  %v13202_v17 = vld [vmem:[#allocation21_spill] sm:$0xff] }
 0x493   :  { %v6750_v32 = vsel %vm3449_vm8, %v6742_v56, %v6477_v63  ;;  %v3397_v46 = vsel %vm3395_vm2, %v3388_v24, %v13161_v20  ;;  %v13181_v63 = vld [vmem:[#allocation129_spill] sm:$0xff]  ;;  %v13186_v20 = vld [vmem:[#allocation19_spill] sm:$0xff]  ;;  %v3385_v52 = vsel %vm3377_vm0, %v13190_v62, %v13187_v59  ;;  %v13213_v22 = vld [vmem:[#allocation120_spill] sm:$0xff] }
 0x494   :  { %v6435_v49 = vpop.permute.xlu1 %6434  ;;  %v3406_v9 = vsel %vm3404_vm3, %v3397_v46, %v13162_v41  ;;  %v13214_v62 = vld [vmem:[#allocation23_spill] sm:$0xff] }
 0x495   :  { %v11661_v56 = vsel %vm3440_vm7, %v6729_v28, %v6435_v49  ;;  %v3415_v7 = vsel %vm3413_vm4, %v3406_v9, %v13167_v14  ;;  %v13169_v28 = vld [vmem:[#allocation138_spill] sm:$0xff]  ;;  %v6199_v49 = vcombine.high %v11603_v0, %v11606_v18  ;;  %v13191_v14 = vld [vmem:[#allocation157_spill] sm:$0xff]  ;;  %v13192_v18 = vld [vmem:[#allocation151_spill] sm:$0xff] }
 0x496   :  { %v6497_v33 = vpop.permute.xlu0 %6496  ;;  %6662 = vrot.lane.b32.xlu1 %v5655_v26, %s7001_s6  ;;  %v13171_v58 = vcombine.low %v13169_v28, %v13170_v10  ;;  %v3424_v1 = vsel %vm3422_vm5, %v3415_v7, %v13173_v13  ;;  %v13195_v10 = vld [vmem:[#allocation54_spill] sm:$0xff] }
 0x497   :  { %v11664_v11 = vsel %vm3458_vm9, %v6744_v4, %v6497_v33  ;;  %v3433_v42 = vsel %vm3431_vm6, %v3424_v1, %v13175_v61  ;;  %v13185_v33 = vld [vmem:[#allocation112_spill] sm:$0xff]  ;;  %v13198_v1 = vld [vmem:[#allocation37_spill] sm:$0xff] }
 0x498   :  { %v3383_v4 = vsel %vm3377_vm0, %v13171_v58, %v13168_v48  ;;  %v6439_v57 = vpop.permute.xlu1 %6438  ;;  %v3442_v45 = vsel %vm3440_vm7, %v3433_v42, %v13178_v3  ;;  %v13193_v48 = vld [vmem:[#allocation25_spill] sm:$0xff]  ;;  %v13203_v3 = vld [vmem:[#allocation40_spill] sm:$0xff]  ;;  %vm6897_vm0 = vcmask 523264  }
 0x499   :  { %v11692_v47 = vsel %vm3440_vm7, %v6731_v55, %v6439_v57  ;;  %v3392_v39 = vsel %vm3386_vm1, %v3383_v4, %v13176_v51  ;;  %v3417_v55 = vsel %vm3413_vm4, %v3408_v36, %v13180_v60  ;;  %v13196_v4 = vld [vmem:[#allocation6_spill] sm:$0xff]  ;;  %v13201_v61 = vld [vmem:[#allocation33_spill] sm:$0xff] }
 0x49a   :  { %v6501_v29 = vpop.permute.xlu0 %6500  ;;  %6666 = vrot.lane.b32.xlu1 %v5927_v40, %s7001_s6  ;;  %v3401_v12 = vsel %vm3395_vm2, %v3392_v39, %v13179_v35  ;;  %v3426_v15 = vsel %vm3422_vm5, %v3417_v55, %v13183_v19  ;;  %v13204_v60 = vld [vmem:[#allocation130_spill] sm:$0xff]  ;;  %v13207_v19 = vld [vmem:[#allocation52_spill] sm:$0xff] }
 0x49b   :  { %v11695_v21 = vsel %vm3458_vm9, %v6746_v50, %v6501_v29  ;;  %v3451_v50 = vsel %vm3449_vm8, %v3442_v45, %v13181_v63  ;;  %v3410_v54 = vsel %vm3404_vm3, %v3401_v12, %v13182_v37  ;;  %v3435_v26 = vsel %vm3431_vm6, %v3426_v15, %v13185_v33  ;;  %v13199_v29 = vld [vmem:[#allocation119_spill] sm:$0xff]  ;;  %v13206_v37 = vld [vmem:[#allocation26_spill] sm:$0xff] }
 0x49c   :  { %v3460_v25 = vsel %vm3458_vm9, %v3451_v50, %v13184_v31  ;;  %v6443_v6 = vpop.permute.xlu1 %6442  ;;  %v3419_v0 = vsel %vm3413_vm4, %v3410_v54, %v13191_v14  ;;  %v3444_v7 = vsel %vm3440_vm7, %v3435_v26, %v13192_v18  ;;  %v13205_v63 = vld [vmem:[#allocation99_spill] sm:$0xff]  ;;  %v13212_v26 = vld [vmem:[#allocation34_spill] sm:$0xff] }
 0x49d   :  { %v3469_v46 = vsel %vm3467_vm10, %v3460_v25, %v13186_v20  ;;  %v6741_v41 = vsel %vm3440_vm7, %v6733_v34, %v6443_v6  ;;  %v13194_v34 = vld [vmem:[#allocation150_spill] sm:$0xff]  ;;  %v3428_v58 = vsel %vm3422_vm5, %v3419_v0, %v13195_v10  ;;  %v3453_v16 = vsel %vm3449_vm8, %v3444_v7, %v13196_v4  ;;  %v13208_v31 = vld [vmem:[#allocation7_spill] sm:$0xff]  ;;  %v13210_v6 = vld [vmem:[#allocation64_spill] sm:$0xff] }
 0x49e   :  { %v6505_v24 = vpop.permute.xlu0 %6504  ;;  %v3478_v28 = vsel %vm3476_vm11, %v3469_v46, %v13193_v48  ;;  %6670 = vrot.lane.b32.xlu1 %v6199_v49, %s7001_s6  ;;  %v3437_v40 = vsel %vm3431_vm6, %v3428_v58, %v13199_v29  ;;  %v3462_v8 = vsel %vm3458_vm9, %v3453_v16, %v13200_v23  ;;  %v13211_v49 = vld [vmem:[#allocation15_spill] sm:$0xff]  ;;  %v13215_v14 = vld [vmem:[#allocation42_spill] sm:$0xff]  ;;  %v13216_v7 = vld [vmem:[#allocation89_spill] sm:$0xff] }
 0x49f   :  { %v11724_v9 = vsel %vm3458_vm9, %v6748_v38, %v6505_v24  ;;  %v3394_v38 = vsel %vm3386_vm1, %v3385_v52, %v13194_v34  ;;  %v3487_v13 = vsel %vm3485_vm12, %v3478_v28, %v13197_v5  ;;  %v3471_v36 = vsel %vm3467_vm10, %v3462_v8, %v13202_v17  ;;  %v13217_v28 = vld [vmem:[#allocation27_spill] sm:$0xff]  ;;  %v13220_v16 = vld [vmem:[#allocation17_spill] sm:$0xff]  ;;  %v13222_v29 = vld [vmem:[#allocation24_spill] sm:$0xff] }
 0x4a0   :  { %v3403_v57 = vsel %vm3395_vm2, %v3394_v38, %v13198_v1  ;;  %v3496_v42 = vsel %vm3494_vm13, %v3487_v13, %v13201_v61  ;;  %v6447_v51 = vpop.permute.xlu1 %6446  ;;  %v3446_v50 = vsel %vm3440_vm7, %v3437_v40, %v13205_v63  ;;  %v3480_v54 = vsel %vm3476_vm11, %v3471_v36, %v13206_v37  ;;  %v13218_v38 = vld [vmem:[#allocation9_spill] sm:$0xff]  ;;  %v13219_v58 = vld [vmem:[#allocation31_spill] sm:$0xff]  ;;  %v13223_v23 = vld [vmem:[#allocation44_spill] sm:$0xff] }
 0x4a1   :  { %v11758_v45 = vsel %vm3503_vm14, %v3496_v42, %v13203_v3  ;;  %v6743_v35 = vsel %vm3440_vm7, %v6735_v2, %v6447_v51  ;;  %v3412_v55 = vsel %vm3404_vm3, %v3403_v57, %v13204_v60  ;;  %v3455_v2 = vsel %vm3449_vm8, %v3446_v50, %v13208_v31  ;;  %v13221_v13 = vld [vmem:[#allocation35_spill] sm:$0xff]  ;;  %v13224_v42 = vld [vmem:[#allocation28_spill] sm:$0xff]  ;;  %v13226_v36 = vld [vmem:[#allocation38_spill] sm:$0xff] }
 0x4a2   :  { %v6509_v39 = vpop.permute.xlu0 %6508  ;;  %6810 = vrot.lane.b32.xlu1 %v11758_v45, %s7002_s7  ;;  %v3421_v15 = vsel %vm3413_vm4, %v3412_v55, %v13207_v19  ;;  %v3464_v33 = vsel %vm3458_vm9, %v3455_v2, %v13211_v49  ;;  %v13227_v63 = vld [vmem:[#allocation46_spill] sm:$0xff]  ;;  %vm6906_vm1 = vcmask 785408  }
 0x4a3   :  { %v11762_v12 = vsel %vm3458_vm9, %v6750_v32, %v6509_v39  ;;  %v13209_v32 = vld [vmem:[#allocation30_spill] sm:$0xff]  ;;  %v3430_v24 = vsel %vm3422_vm5, %v3421_v15, %v13210_v6  ;;  %v3473_v52 = vsel %vm3467_vm10, %v3464_v33, %v13214_v62  ;;  %v13225_v39 = vld [vmem:[#allocation32_spill] sm:$0xff] }
 0x4a4   :  { %v3489_v25 = vsel %vm3485_vm12, %v3480_v54, %v13209_v32  ;;  %v6467_v46 = vpop.permute.xlu1 %6466  ;;  %v3439_v44 = vsel %vm3431_vm6, %v3430_v24, %v13213_v22  ;;  %v3482_v34 = vsel %vm3476_vm11, %v3473_v52, %v13217_v28 }
 0x4a5   :  { %v3498_v20 = vsel %vm3494_vm13, %v3489_v25, %v13212_v26  ;;  %v6745_v18 = vsel %vm3449_vm8, %v11661_v56, %v6467_v46  ;;  %v3448_v48 = vsel %vm3440_vm7, %v3439_v44, %v13216_v7  ;;  %v3491_v4 = vsel %vm3485_vm12, %v3482_v34, %v13219_v58 }
 0x4a6   :  { %v6529_v59 = vpop.permute.xlu0 %6528  ;;  %v11790_v0 = vsel %vm3503_vm14, %v3498_v20, %v13215_v14  ;;  %v3457_v10 = vsel %vm3449_vm8, %v3448_v48, %v13218_v38  ;;  %v3500_v56 = vsel %vm3494_vm13, %v3491_v4, %v13221_v13 }
 0x4a7   :  { %6814 = vrot.lane.b32.xlu1 %v11790_v0, %s7002_s7  ;;  %v3466_v5 = vsel %vm3458_vm9, %v3457_v10, %v13220_v16  ;;  %v11812_v8 = vsel %vm3503_vm14, %v3500_v56, %v13223_v23  ;;  %v6760_v16 = vsel %vm3467_vm10, %v11664_v11, %v6529_v59 }
 0x4a8   :  { %v6471_v1 = vpop.permute.xlu1 %6470  ;;  %v3475_v40 = vsel %vm3467_vm10, %v3466_v5, %v13222_v29 }
 0x4a9   :  { %v6747_v61 = vsel %vm3449_vm8, %v11692_v47, %v6471_v1  ;;  %v3484_v51 = vsel %vm3476_vm11, %v3475_v40, %v13224_v42 }
 0x4aa   :  { %v6533_v57 = vpop.permute.xlu0 %6532  ;;  %v3493_v17 = vsel %vm3485_vm12, %v3484_v51, %v13225_v39 }
 0x4ab   :  { %6818 = vrot.lane.b32.xlu1 %v11812_v8, %s7002_s7  ;;  %v3502_v3 = vsel %vm3494_vm13, %v3493_v17, %v13226_v36  ;;  %v6762_v40 = vsel %vm3467_vm10, %v11695_v21, %v6533_v57 }
 0x4ac   :  { %v6475_v60 = vpop.permute.xlu1 %6474  ;;  %v11826_v50 = vsel %vm3503_vm14, %v3502_v3, %v13227_v63 }
 0x4ad   :  { %v6749_v47 = vsel %vm3449_vm8, %v6741_v41, %v6475_v60 }
 0x4ae   :  { %v6537_v55 = vpop.permute.xlu0 %6536 }
 0x4af   :  { %6822 = vrot.lane.b32.xlu1 %v11826_v50, %s7002_s7  ;;  %v6764_v39 = vsel %vm3467_vm10, %v11724_v9, %v6537_v55 }
 0x4b0   :  { %v6479_v37 = vpop.permute.xlu1 %6478 }
 0x4b1   :  { %v6751_v19 = vsel %vm3449_vm8, %v6743_v35, %v6479_v37 }
 0x4b2   :  { %v6541_v54 = vpop.permute.xlu0 %6540 }
 0x4b3   :  { %v6766_v63 = vsel %vm3467_vm10, %v11762_v12, %v6541_v54 }
 0x4b4   :  { %v6499_v15 = vpop.permute.xlu1 %6498 }
 0x4b5   :  { %v11833_v2 = vsel %vm3458_vm9, %v6745_v18, %v6499_v15 }
 0x4b6   :  { %v6561_v31 = vpop.permute.xlu0 %6560 }
 0x4b7   :  { %v6768_v5 = vsel %vm3476_vm11, %v6760_v16, %v6561_v31 }
 0x4b8   :  { %v6503_v32 = vpop.permute.xlu1 %6502 }
 0x4b9   :  { %v11836_v6 = vsel %vm3458_vm9, %v6747_v61, %v6503_v32 }
 0x4ba   :  { %v6565_v25 = vpop.permute.xlu0 %6564 }
 0x4bb   :  { %v6770_v61 = vsel %vm3476_vm11, %v6762_v40, %v6565_v25 }
 0x4bc   :  { %v6507_v24 = vpop.permute.xlu1 %6506 }
 0x4bd   :  { %v11839_v41 = vsel %vm3458_vm9, %v6749_v47, %v6507_v24 }
 0x4be   :  { %v6569_v49 = vpop.permute.xlu0 %6568 }
 0x4bf   :  { %v6772_v21 = vsel %vm3476_vm11, %v6764_v39, %v6569_v49 }
 0x4c0   :  { %v6511_v33 = vpop.permute.xlu1 %6510 }
 0x4c1   :  { %v11842_v20 = vsel %vm3458_vm9, %v6751_v19, %v6511_v33 }
 0x4c2   :  { %v6573_v26 = vpop.permute.xlu0 %6572 }
 0x4c3   :  { %v6774_v37 = vsel %vm3476_vm11, %v6766_v63, %v6573_v26 }
 0x4c4   :  { %v6531_v35 = vpop.permute.xlu1 %6530 }
 0x4c5   :  { %v6761_v24 = vsel %vm3467_vm10, %v11833_v2, %v6531_v35 }
 0x4c6   :  { %v6593_v46 = vpop.permute.xlu0 %6592 }
 0x4c7   :  { %v6776_v13 = vsel %vm3485_vm12, %v6768_v5, %v6593_v46 }
 0x4c8   :  { %v6535_v22 = vpop.permute.xlu1 %6534 }
 0x4ca   :  { %v6597_v44 = vpop.permute.xlu0 %6596 }
 0x4cb   :  { %v6778_v11 = vsel %vm3485_vm12, %v6770_v61, %v6597_v44  ;;  %v6763_v44 = vsel %vm3467_vm10, %v11836_v6, %v6535_v22 }
 0x4cc   :  { %v11844_v62 = vpop.permute.xlu1 %6538 }
 0x4ce   :  { %v6601_v52 = vpop.permute.xlu0 %6600 }
 0x4cf   :  { %v6780_v57 = vsel %vm3485_vm12, %v6772_v21, %v6601_v52 }
 0x4d0   :  { %v11846_v14 = vpop.permute.xlu1 %6542 }
 0x4d2   :  { %v6605_v18 = vpop.permute.xlu0 %6604 }
 0x4d3   :  { %v6782_v9 = vsel %vm3485_vm12, %v6774_v37, %v6605_v18 }
 0x4d4   :  { %v6563_v7 = vpop.permute.xlu1 %6562 }
 0x4d5   :  { %v6769_v49 = vsel %vm3476_vm11, %v6761_v24, %v6563_v7 }
 0x4d6   :  { %v6625_v48 = vpop.permute.xlu0 %6624 }
 0x4d7   :  { %v6784_v56 = vsel %vm3494_vm13, %v6776_v13, %v6625_v48  ;;  %v6765_v48 = vsel %vm3467_vm10, %v11839_v41, %v11844_v62 }
 0x4d8   :  { %v6567_v28 = vpop.permute.xlu1 %6566 }
 0x4d9   :  { %v6771_v18 = vsel %vm3476_vm11, %v6763_v44, %v6567_v28 }
 0x4da   :  { %v6629_v34 = vpop.permute.xlu0 %6628 }
 0x4db   :  { %v6786_v59 = vsel %vm3494_vm13, %v6778_v11, %v6629_v34 }
 0x4dc   :  { %v6571_v38 = vpop.permute.xlu1 %6570 }
 0x4de   :  { %v6633_v10 = vpop.permute.xlu0 %6632 }
 0x4df   :  { %v6788_v36 = vsel %vm3494_vm13, %v6780_v57, %v6633_v10  ;;  %v6773_v10 = vsel %vm3476_vm11, %v6765_v48, %v6571_v38 }
 0x4e0   :  { %v11848_v58 = vpop.permute.xlu1 %6574 }
 0x4e2   :  { %v6637_v4 = vpop.permute.xlu0 %6636 }
 0x4e3   :  { %v6790_v55 = vsel %vm3494_vm13, %v6782_v9, %v6637_v4  ;;  %v6767_v4 = vsel %vm3467_vm10, %v11842_v20, %v11846_v14 }
 0x4e4   :  { %v6595_v1 = vpop.permute.xlu1 %6594  ;;  %v6775_v41 = vsel %vm3476_vm11, %v6767_v4, %v11848_v58 }
 0x4e5   :  { %v6777_v33 = vsel %vm3485_vm12, %v6769_v49, %v6595_v1 }
 0x4e6   :  { %v6657_v29 = vpop.permute.xlu0 %6656 }
 0x4e7   :  { %v6792_v23 = vsel %vm3503_vm14, %v6784_v56, %v6657_v29 }
 0x4e8   :  { %6840 = vrot.lane.b32.xlu0 %v6792_v23, %s7003_s8  ;;  %v6599_v42 = vpop.permute.xlu1 %6598 }
 0x4e9   :  { %v6779_v2 = vsel %vm3485_vm12, %v6771_v18, %v6599_v42 }
 0x4ea   :  { %v6661_v51 = vpop.permute.xlu0 %6660 }
 0x4eb   :  { %v6794_v17 = vsel %vm3503_vm14, %v6786_v59, %v6661_v51 }
 0x4ec   :  { %6844 = vrot.lane.b32.xlu0 %v6794_v17, %s7003_s8  ;;  %v6603_v3 = vpop.permute.xlu1 %6602 }
 0x4ed   :  { %v6781_v6 = vsel %vm3485_vm12, %v6773_v10, %v6603_v3 }
 0x4ee   :  { %v6665_v60 = vpop.permute.xlu0 %6664 }
 0x4ef   :  { %v6796_v47 = vsel %vm3503_vm14, %v6788_v36, %v6665_v60 }
 0x4f0   :  { %6848 = vrot.lane.b32.xlu0 %v6796_v47, %s7003_s8  ;;  %v6607_v19 = vpop.permute.xlu1 %6606 }
 0x4f1   :  { %v6783_v62 = vsel %vm3485_vm12, %v6775_v41, %v6607_v19 }
 0x4f2   :  { %v6669_v15 = vpop.permute.xlu0 %6668 }
 0x4f3   :  { %v6798_v31 = vsel %vm3503_vm14, %v6790_v55, %v6669_v15 }
 0x4f4   :  { %6852 = vrot.lane.b32.xlu0 %v6798_v31, %s7003_s8  ;;  %v6627_v32 = vpop.permute.xlu1 %6626 }
 0x4f5   :  { %v6785_v26 = vsel %vm3494_vm13, %v6777_v33, %v6627_v32 }
 0x4f6   :  { %v6809_v20 = vpop.permute.xlu0 %6808 }
 0x4f7   :  { %v6889_v11 = vsel %vm6888_vm15, %v11531_v30, %v6809_v20 }
 0x4f8   :  { %6864 = vrot.lane.b32.xlu0 %v6792_v23, %s7004_s9  ;;  %v6631_v12 = vpop.permute.xlu1 %6630 }
 0x4f9   :  { %v6787_v35 = vsel %vm3494_vm13, %v6779_v2, %v6631_v12 }
 0x4fa   :  { %v6813_v14 = vpop.permute.xlu0 %6812 }
 0x4fc   :  { %6868 = vrot.lane.b32.xlu0 %v6794_v17, %s7004_s9  ;;  %v6635_v54 = vpop.permute.xlu1 %6634  ;;  %v6891_v17 = vsel %vm6888_vm15, %v11570_v53, %v6813_v14 }
 0x4fd   :  { %v6789_v22 = vsel %vm3494_vm13, %v6781_v6, %v6635_v54 }
 0x4fe   :  { %v6817_v58 = vpop.permute.xlu0 %6816 }
 0x4ff   :  { %v6893_v30 = vsel %vm6888_vm15, %v11610_v43, %v6817_v58 }
 0x500   :  { %6872 = vrot.lane.b32.xlu0 %v6796_v47, %s7004_s9  ;;  %v6639_v25 = vpop.permute.xlu1 %6638 }
 0x501   :  { %v6791_v38 = vsel %vm3494_vm13, %v6783_v62, %v6639_v25 }
 0x502   :  { %v6821_v56 = vpop.permute.xlu0 %6820 }
 0x503   :  { %v6895_v37 = vsel %vm6888_vm15, %v11636_v27, %v6821_v56 }
 0x504   :  { %6876 = vrot.lane.b32.xlu0 %v6798_v31, %s7004_s9  ;;  %v6659_v46 = vpop.permute.xlu1 %6658 }
 0x505   :  { %v6793_v52 = vsel %vm3503_vm14, %v6785_v26, %v6659_v46 }
 0x506   :  { %6842 = vrot.lane.b32.xlu1 %v6793_v52, %s7003_s8 }
 0x508   :  { %v6663_v7 = vpop.permute.xlu1 %6662 }
 0x509   :  { %v6795_v34 = vsel %vm3503_vm14, %v6787_v35, %v6663_v7 }
 0x50a   :  { %6846 = vrot.lane.b32.xlu1 %v6795_v34, %s7003_s8 }
 0x50c   :  { %v6667_v28 = vpop.permute.xlu1 %6666 }
 0x50d   :  { %v6797_v16 = vsel %vm3503_vm14, %v6789_v22, %v6667_v28 }
 0x50e   :  { %6850 = vrot.lane.b32.xlu1 %v6797_v16, %s7003_s8 }
 0x510   :  { %v6671_v5 = vpop.permute.xlu1 %6670 }
 0x511   :  { %v6799_v13 = vsel %vm3503_vm14, %v6791_v38, %v6671_v5 }
 0x512   :  { %6854 = vrot.lane.b32.xlu1 %v6799_v13, %s7003_s8 }
 0x514   :  { %v6811_v23 = vpop.permute.xlu1 %6810 }
 0x515   :  { %v6890_v12 = vsel %vm6888_vm15, %v11758_v45, %v6811_v23 }
 0x516   :  { %6866 = vrot.lane.b32.xlu1 %v6793_v52, %s7004_s9 }
 0x519   :  { %v6815_v59 = vpop.permute.xlu1 %6814 }
 0x51a   :  { %6870 = vrot.lane.b32.xlu1 %v6795_v34, %s7004_s9  ;;  %v6892_v27 = vsel %vm6888_vm15, %v11790_v0, %v6815_v59 }
 0x51d   :  { %v6819_v3 = vpop.permute.xlu1 %6818 }
 0x51e   :  { %6874 = vrot.lane.b32.xlu1 %v6797_v16, %s7004_s9  ;;  %v6894_v46 = vsel %vm6888_vm15, %v11812_v8, %v6819_v3 }
 0x521   :  { %v6823_v53 = vpop.permute.xlu1 %6822 }
 0x522   :  { %6878 = vrot.lane.b32.xlu1 %v6799_v13, %s7004_s9  ;;  %v6896_v0 = vsel %vm6888_vm15, %v11826_v50, %v6823_v53 }
 0x55a   :  { %v6841_v1 = vpop.permute.xlu0 %6840 }
 0x55b   :  { %v6898_v42 = vsel %vm6897_vm0, %v6889_v11, %v6841_v1 }
 0x55e   :  { %v6845_v29 = vpop.permute.xlu0 %6844 }
 0x55f   :  { %v6900_v21 = vsel %vm6897_vm0, %v6891_v17, %v6845_v29 }
 0x562   :  { %v6849_v40 = vpop.permute.xlu0 %6848 }
 0x563   :  { %v6902_v60 = vsel %vm6897_vm0, %v6893_v30, %v6849_v40 }
 0x566   :  { %v6853_v61 = vpop.permute.xlu0 %6852 }
 0x567   :  { %v6904_v9 = vsel %vm6897_vm0, %v6895_v37, %v6853_v61 }
 0x56a   :  { %v6865_v51 = vpop.permute.xlu0 %6864 }
 0x56b   :  { %v6907_v39 = vsel %vm6906_vm1, %v6898_v42, %v6865_v51 }
 0x56c   :  { %6915 = vst [vmem:[#allocation2] sm:$0xff] %v6907_v39 }
 0x56e   :  { %v6869_v57 = vpop.permute.xlu0 %6868 }
 0x56f   :  { %v6909_v36 = vsel %vm6906_vm1, %v6900_v21, %v6869_v57 }
 0x570   :  { %6917 = vst [vmem:[#allocation2 + $0x10] sm:$0xff] %v6909_v36 }
 0x572   :  { %v6873_v63 = vpop.permute.xlu0 %6872 }
 0x573   :  { %v6911_v47 = vsel %vm6906_vm1, %v6902_v60, %v6873_v63 }
 0x574   :  { %6919 = vst [vmem:[#allocation2 + $0x20] sm:$0xff] %v6911_v47 }
 0x576   :  { %v6877_v55 = vpop.permute.xlu0 %6876 }
 0x577   :  { %v6913_v19 = vsel %vm6906_vm1, %v6904_v9, %v6877_v55 }
 0x578   :  { %6921 = vst [vmem:[#allocation2 + $0x30] sm:$0xff] %v6913_v19  ;;  %v6843_v15 = vpop.permute.xlu1 %6842 }
 0x579   :  { %v6899_v54 = vsel %vm6897_vm0, %v6890_v12, %v6843_v15 }
 0x57c   :  { %v6847_v31 = vpop.permute.xlu1 %6846 }
 0x57d   :  { %v6901_v49 = vsel %vm6897_vm0, %v6892_v27, %v6847_v31 }
 0x580   :  { %v6851_v32 = vpop.permute.xlu1 %6850 }
 0x581   :  { %v6903_v45 = vsel %vm6897_vm0, %v6894_v46, %v6851_v32 }
 0x584   :  { %v6855_v43 = vpop.permute.xlu1 %6854 }
 0x585   :  { %v6905_v18 = vsel %vm6897_vm0, %v6896_v0, %v6855_v43 }
 0x588   :  { %v6867_v25 = vpop.permute.xlu1 %6866 }
 0x589   :  { %v6908_v24 = vsel %vm6906_vm1, %v6899_v54, %v6867_v25 }
 0x58a   :  { %6916 = vst [vmem:[#allocation2 + $0x8] sm:$0xff] %v6908_v24 }
 0x58c   :  { %v6871_v33 = vpop.permute.xlu1 %6870 }
 0x58d   :  { %v6910_v26 = vsel %vm6906_vm1, %v6901_v49, %v6871_v33 }
 0x58e   :  { %6918 = vst [vmem:[#allocation2 + $0x18] sm:$0xff] %v6910_v26 }
 0x590   :  { %v6875_v44 = vpop.permute.xlu1 %6874 }
 0x591   :  { %v6912_v52 = vsel %vm6906_vm1, %v6903_v45, %v6875_v44 }
 0x592   :  { %6920 = vst [vmem:[#allocation2 + $0x28] sm:$0xff] %v6912_v52 }
 0x594   :  { %v6879_v2 = vpop.permute.xlu1 %6878 }
 0x595   :  { %v6914_v35 = vsel %vm6906_vm1, %v6905_v18, %v6879_v2 }
 0x596   :  { %6922 = vst [vmem:[#allocation2 + $0x38] sm:$0xff] %v6914_v35 }
 0x597   :  { %6972 = shalt.err (!%p6969_p4)
}
 0x598   :  { %s6973_s15 = scalar_lea.hbm %s11963_s1, 1024 }
 0x599   :  { %p6974_p5 = scmp.ne.s32.totalorder %s11963_s1, %s6973_s15  ;;  %p6977_p6 = scmp.lt.u32.totalorder %s6973_s15, %s11963_s1 }
 0x59b   :  { %p6979_p7 = pnand %p6977_p6, %p6974_p5 }
 0x59d   :  { %6982 = shalt.err (!%p6979_p7)
}
 0x59e   :  { %s7006_s20 = smov 128  }
 0x59f   :  { %6934 = dma.vmem_to_hbm [thread:$0]  %s6929_s11, 1024, %s11963_s1, [#allocation3], %s7006_s20, %s7006_s20, %s6990_s24  }
 0x5a0   :  { %6983 = dma.done.wait [#allocation3], 1024  }
 0x5a1   :  { %6984 = vsyncadd [#allocation3], 4294966272 }
 0x5a2   :  { %6938 = vsyncpa [#allocation3], 1 }

</bundles_post_ra>
